<compile_context>
chip_gen: v5e
topology: v5e:2x2
jax: 0.10.0
libtpu: 0.0.40
codegen_flags: <defaults>
</compile_context>

<pallas_src>
import functools
import math

import jax
import jax.numpy as jnp
from jax import lax
from jax.experimental import pallas as pl
from jax.experimental.pallas import tpu as pltpu

CNN_OUTPUT_WIDTH = 32
MAX_IMAGE_HEIGHT = 1024
LN_EPS = 1e-5
_VMEM_LIMIT = 48 * 1024 * 1024  # headroom under v7x's 64 MiB physical VMEM


def _round_up(x, m):
    return ((x + m - 1) // m) * m


# ----------------------------------------------------------------------------
# In-kernel building blocks
# ----------------------------------------------------------------------------
def _layernorm(z, g, b, eps=LN_EPS):
    mean = jnp.mean(z, axis=-1, keepdims=True)
    var = jnp.mean(jnp.square(z - mean), axis=-1, keepdims=True)
    return (z - mean) * lax.rsqrt(var + eps) * g + b


def _mha(x_q, x_kv, wq_ref, bq_ref, wk_ref, bk_ref, wv_ref, bv_ref,
         wo_ref, bo_ref, nhead):
    """Multi-head attention with packed, lane-dense projections.

    wq/wk/wv/wo are (D, D) with heads packed along columns (rows for wo);
    wq/bq are pre-scaled by 1/sqrt(Dh) host-side.  Heads are split with
    static slices of the packed Q/K/V; the output projection is one
    (S,D)@(D,D) matmul over the concatenated per-head outputs, which is
    mathematically identical to PyTorch's packed in_proj / out_proj.
    """
    f32, bf16 = jnp.float32, jnp.bfloat16
    d_model = wq_ref.shape[-1]
    dh = d_model // nhead
    xq = x_q.astype(bf16)
    xkv = x_kv.astype(bf16)
    # Packed projections: three lane-dense (S,D)@(D,D) matmuls, single bias add each.
    q = jnp.dot(xq, wq_ref[...], preferred_element_type=f32) + bq_ref[...]
    k = jnp.dot(xkv, wk_ref[...], preferred_element_type=f32) + bk_ref[...]
    v = jnp.dot(xkv, wv_ref[...], preferred_element_type=f32) + bv_ref[...]
    heads = []
    for h in range(nhead):                       # static unroll (nhead is a Python int)
        sl = slice(h * dh, (h + 1) * dh)
        qh = q[:, sl].astype(bf16)
        kh = k[:, sl].astype(bf16)
        vh = v[:, sl].astype(bf16)
        # NT form: contract over Dh without materializing a transpose.
        s = lax.dot_general(qh, kh, (((1,), (1,)), ((), ())),
                            preferred_element_type=f32)          # (Sq, Skv)
        m = jnp.max(s, axis=-1, keepdims=True)
        e = jnp.exp(s - m)
        denom = jnp.sum(e, axis=-1, keepdims=True)
        oh = jnp.dot(e.astype(bf16), vh, preferred_element_type=f32)   # (Sq, Dh)
        # Normalize the small (Sq, Dh) output instead of the (Sq, Skv) scores.
        heads.append(oh * pl.reciprocal(denom, approx=True))           # EUP slot
    attn = jnp.concatenate(heads, axis=-1).astype(bf16)                # (Sq, D)
    out = jnp.dot(attn, wo_ref[...], preferred_element_type=f32)       # one (D,D) out-proj
    return out + bo_ref[...]


# ----------------------------------------------------------------------------
# Fused encoder STACK kernel (all layers, post-LN, ReLU FFN — PyTorch defaults)
# grid = (batch, num_layers); activation carried in the resident output block.
# ----------------------------------------------------------------------------
def _encoder_stack_kernel(x_ref,
                          wq, bq, wk, bk, wv, bv, wo, bo, ln1g, ln1b,
                          w1, b1, w2, b2, ln2g, ln2b,
                          o_ref, *, nhead):
    f32, bf16 = jnp.float32, jnp.bfloat16
    layer = pl.program_id(1)

    @pl.when(layer == 0)
    def _():
        o_ref[...] = x_ref[...]          # seed the resident activation with the input

    x = o_ref[...].astype(f32)           # (S, D) carried across the layer axis
    a = _mha(x, x, wq, bq, wk, bk, wv, bv, wo, bo, nhead)
    x = _layernorm(x + a, ln1g[...], ln1b[...])
    h = jnp.dot(x.astype(bf16), w1[...], preferred_element_type=f32) + b1[...]
    h = jnp.maximum(h, 0.0)
    h = jnp.dot(h.astype(bf16), w2[...], preferred_element_type=f32) + b2[...]
    x = _layernorm(x + h, ln2g[...], ln2b[...])
    o_ref[...] = x.astype(o_ref.dtype)


# ----------------------------------------------------------------------------
# Fused decoder STACK kernel (self-attn, cross-attn, FFN; no masks, per spec)
# ----------------------------------------------------------------------------
def _decoder_stack_kernel(tgt_ref, mem_ref,
                          s_wq, s_bq, s_wk, s_bk, s_wv, s_bv, s_wo, s_bo,
                          ln1g, ln1b,
                          c_wq, c_bq, c_wk, c_bk, c_wv, c_bv, c_wo, c_bo,
                          ln2g, ln2b,
                          w1, b1, w2, b2, ln3g, ln3b,
                          o_ref, *, nhead):
    f32, bf16 = jnp.float32, jnp.bfloat16
    layer = pl.program_id(1)

    @pl.when(layer == 0)
    def _():
        o_ref[...] = tgt_ref[...]

    x = o_ref[...].astype(f32)           # (L, D)
    mem = mem_ref[...].astype(f32)       # (S, D) — constant block index over layers
    a = _mha(x, x, s_wq, s_bq, s_wk, s_bk, s_wv, s_bv, s_wo, s_bo, nhead)
    x = _layernorm(x + a, ln1g[...], ln1b[...])
    c = _mha(x, mem, c_wq, c_bq, c_wk, c_bk, c_wv, c_bv, c_wo, c_bo, nhead)
    x = _layernorm(x + c, ln2g[...], ln2b[...])
    h = jnp.dot(x.astype(bf16), w1[...], preferred_element_type=f32) + b1[...]
    h = jnp.maximum(h, 0.0)
    h = jnp.dot(h.astype(bf16), w2[...], preferred_element_type=f32) + b2[...]
    x = _layernorm(x + h, ln3g[...], ln3b[...])
    o_ref[...] = x.astype(o_ref.dtype)


# ----------------------------------------------------------------------------
# pallas_call wrappers
# ----------------------------------------------------------------------------
_ENC_WEIGHT_NAMES = ("wq", "bq", "wk", "bk", "wv", "bv", "wo", "bo",
                     "ln1_g", "ln1_b", "ff_w1", "ff_b1", "ff_w2", "ff_b2",
                     "ln2_g", "ln2_b")

_DEC_WEIGHT_NAMES = ("s_wq", "s_bq", "s_wk", "s_bk", "s_wv", "s_bv", "s_wo", "s_bo",
                     "ln1_g", "ln1_b",
                     "c_wq", "c_bq", "c_wk", "c_bk", "c_wv", "c_bv", "c_wo", "c_bo",
                     "ln2_g", "ln2_b",
                     "ff_w1", "ff_b1", "ff_w2", "ff_b2", "ln3_g", "ln3_b")


def _layer_weight_spec(arr):
    """Per-layer block of a layer-stacked weight: indexed by the layer grid axis."""
    ndim = arr.ndim

    def idx(b, l, _n=ndim):
        return (l,) + (0,) * (_n - 1)

    return pl.BlockSpec((None,) + arr.shape[1:], idx)


def encoder_stack(x, stacked, nhead):
    B, S, D = x.shape
    num_layers = stacked["wq"].shape[0]
    weights = [stacked[n] for n in _ENC_WEIGHT_NAMES]
    kernel = functools.partial(_encoder_stack_kernel, nhead=nhead)
    return pl.pallas_call(
        kernel,
        out_shape=jax.ShapeDtypeStruct((B, S, D), x.dtype),
        grid=(B, num_layers),
        in_specs=[pl.BlockSpec((None, S, D), lambda b, l: (b, 0, 0))]
                 + [_layer_weight_spec(w) for w in weights],
        out_specs=pl.BlockSpec((None, S, D), lambda b, l: (b, 0, 0)),
        compiler_params=pltpu.CompilerParams(
            dimension_semantics=("parallel", "arbitrary"),
            vmem_limit_bytes=_VMEM_LIMIT),
    )(x, *weights)


def decoder_stack(tgt, mem, stacked, nhead):
    B, L, D = tgt.shape
    S = mem.shape[1]
    num_layers = stacked["s_wq"].shape[0]
    weights = [stacked[n] for n in _DEC_WEIGHT_NAMES]
    kernel = functools.partial(_decoder_stack_kernel, nhead=nhead)
    return pl.pallas_call(
        kernel,
        out_shape=jax.ShapeDtypeStruct((B, L, D), tgt.dtype),
        grid=(B, num_layers),
        in_specs=[pl.BlockSpec((None, L, D), lambda b, l: (b, 0, 0)),
                  pl.BlockSpec((None, S, D), lambda b, l: (b, 0, 0))]
                 + [_layer_weight_spec(w) for w in weights],
        out_specs=pl.BlockSpec((None, L, D), lambda b, l: (b, 0, 0)),
        compiler_params=pltpu.CompilerParams(
            dimension_semantics=("parallel", "arbitrary"),
            vmem_limit_bytes=_VMEM_LIMIT),
    )(tgt, mem, *weights)


def _linear_kernel(x_ref, w_ref, b_ref, o_ref):
    y = jnp.dot(x_ref[...].astype(jnp.bfloat16), w_ref[...].astype(jnp.bfloat16),
                preferred_element_type=jnp.float32)
    o_ref[...] = (y + b_ref[...]).astype(o_ref.dtype)


def pallas_linear(x, w, b, *, block_m=256, block_n=512):
    """y = x @ w + b. Pads M to a multiple of 8 and N to a multiple of 128
    (lane-dense, unmasked stores), tiles both, and slices the padding off."""
    M, K = x.shape
    N = w.shape[1]
    bm = min(block_m, _round_up(M, 8))
    bn = min(block_n, _round_up(N, 128))
    Mp = _round_up(M, bm)
    Np = _round_up(N, bn)
    if Mp != M:
        x = jnp.pad(x, ((0, Mp - M), (0, 0)))
    if Np != N:
        w = jnp.pad(w, ((0, 0), (0, Np - N)))
        b = jnp.pad(b, (0, Np - N))
    out = pl.pallas_call(
        _linear_kernel,
        out_shape=jax.ShapeDtypeStruct((Mp, Np), x.dtype),
        grid=(Mp // bm, Np // bn),
        in_specs=[
            pl.BlockSpec((bm, K), lambda i, j: (i, 0)),
            pl.BlockSpec((K, bn), lambda i, j: (0, j)),
            pl.BlockSpec((1, bn), lambda i, j: (0, j)),
        ],
        out_specs=pl.BlockSpec((bm, bn), lambda i, j: (i, j)),
        compiler_params=pltpu.CompilerParams(
            dimension_semantics=("parallel", "parallel"),
            vmem_limit_bytes=_VMEM_LIMIT),
    )(x, w.astype(jnp.bfloat16), b.reshape(1, Np))
    return out[:M, :N]


# ----------------------------------------------------------------------------
# Host-side weight preparation (layer stacking, bf16 cast, scale folding)
# ----------------------------------------------------------------------------
def _prep_attn(a, nhead, prefix=""):
    d_model = a["wq"].shape[0]
    scale = 1.0 / math.sqrt(d_model // nhead)
    bf16 = jnp.bfloat16
    return {
        prefix + "wq": (a["wq"] * scale).astype(bf16),   # fold 1/sqrt(Dh) into Wq/bq
        prefix + "bq": a["bq"] * scale,
        prefix + "wk": a["wk"].astype(bf16),
        prefix + "bk": a["bk"],
        prefix + "wv": a["wv"].astype(bf16),
        prefix + "bv": a["bv"],
        prefix + "wo": a["wo"].astype(bf16),
        prefix + "bo": a["bo"],
    }


def _prep_encoder_layer(p, nhead):
    d = _prep_attn(p["self_attn"], nhead)
    d.update({
        "ln1_g": p["ln1_g"], "ln1_b": p["ln1_b"],
        "ff_w1": p["ff_w1"].astype(jnp.bfloat16), "ff_b1": p["ff_b1"],
        "ff_w2": p["ff_w2"].astype(jnp.bfloat16), "ff_b2": p["ff_b2"],
        "ln2_g": p["ln2_g"], "ln2_b": p["ln2_b"],
    })
    return d


def _prep_decoder_layer(p, nhead):
    d = _prep_attn(p["self_attn"], nhead, "s_")
    d.update(_prep_attn(p["cross_attn"], nhead, "c_"))
    d.update({
        "ln1_g": p["ln1_g"], "ln1_b": p["ln1_b"],
        "ln2_g": p["ln2_g"], "ln2_b": p["ln2_b"],
        "ff_w1": p["ff_w1"].astype(jnp.bfloat16), "ff_b1": p["ff_b1"],
        "ff_w2": p["ff_w2"].astype(jnp.bfloat16), "ff_b2": p["ff_b2"],
        "ln3_g": p["ln3_g"], "ln3_b": p["ln3_b"],
    })
    return d


def _stack_layers(layer_dicts):
    return {n: jnp.stack([d[n] for d in layer_dicts]) for n in layer_dicts[0]}


# ----------------------------------------------------------------------------
# Forward pass (matches KuzushijiTransformer.forward, inference semantics)
# ----------------------------------------------------------------------------
def kuzushiji_transformer_forward(params, src_features, *, nhead):
    B, C, H, W = src_features.shape
    D = C * W
    # (B, C, H, W) -> permute(0,2,3,1) -> (B, H, W, C) -> reshape (B, H, C*W)
    src = jnp.transpose(src_features, (0, 2, 3, 1)).reshape(B, H, D)
    src = src + params["image_pos_encoding"][:, :H, :]

    enc_stacked = _stack_layers(
        [_prep_encoder_layer(p, nhead) for p in params["encoder_layers"]])
    enc = encoder_stack(src, enc_stacked, nhead)                     # (B, H, D)
    enc2d = enc.reshape(B * H, D)

    # Fused encoder output heads: [char | top | box] in one lane-dense matmul.
    cw, cb = params["encoder_char_head"]
    tw, tb = params["encoder_top_head"]
    bw, bb = params["encoder_box_head"]
    head_w = jnp.concatenate([cw, tw, bw], axis=1)
    head_b = jnp.concatenate([cb, tb, bb], axis=0)
    head_out = pallas_linear(enc2d, head_w, head_b)
    V = cw.shape[1]
    encoder_char_logits = head_out[:, :V].reshape(B, H, V)
    encoder_top_logits = head_out[:, V].reshape(B, H)                # squeeze(-1)
    encoder_box_logits = head_out[:, V + 1:].reshape(B, H, CNN_OUTPUT_WIDTH)

    # Decoder queries: nn.Embedding(arange) == the full embedding table.
    L = params["query_embed"].shape[0]
    tgt = jnp.broadcast_to(params["query_embed"][None], (B, L, D))
    dec_stacked = _stack_layers(
        [_prep_decoder_layer(p, nhead) for p in params["decoder_layers"]])
    dec = decoder_stack(tgt, enc, dec_stacked, nhead)                # (B, L, D)
    dw, db = params["decoder_char_head"]
    decoder_char_logits = pallas_linear(dec.reshape(B * L, D), dw, db).reshape(B, L, V)

    return {
        "encoder_char_logits": encoder_char_logits,
        "encoder_top_logits": encoder_top_logits,
        "encoder_box_logits": encoder_box_logits,
        "decoder_char_logits": decoder_char_logits,
    }


# ----------------------------------------------------------------------------
# Deterministic synthetic parameters (shapes from __init__)
# ----------------------------------------------------------------------------
def init_params(key, d_model, nhead, num_encoder_layers, num_decoder_layers,
                dim_feedforward, vocab_size, max_target_seq_len):
    keys = iter(jax.random.split(key, 4096))

    def normal(shape, scale):
        return scale * jax.random.normal(next(keys), shape, jnp.float32)

    def dense(d_in, d_out):
        return (normal((d_in, d_out), 0.05), normal((d_out,), 0.02))

    def attn():
        # Packed layout: columns of wq/wk/wv (rows of wo) are heads x Dh,
        # i.e. wq == in_proj_weight[:D].T, wo == out_proj.weight.T in PyTorch.
        return {"wq": normal((d_model, d_model), 0.05),
                "bq": normal((1, d_model), 0.02),
                "wk": normal((d_model, d_model), 0.05),
                "bk": normal((1, d_model), 0.02),
                "wv": normal((d_model, d_model), 0.05),
                "bv": normal((1, d_model), 0.02),
                "wo": normal((d_model, d_model), 0.05),
                "bo": normal((1, d_model), 0.02)}

    def ln():
        return (jnp.ones((1, d_model), jnp.float32),
                jnp.zeros((1, d_model), jnp.float32))

    def enc_layer():
        g1, b1 = ln(); g2, b2 = ln()
        return {"self_attn": attn(),
                "ff_w1": normal((d_model, dim_feedforward), 0.05),
                "ff_b1": normal((1, dim_feedforward), 0.02),
                "ff_w2": normal((dim_feedforward, d_model), 0.05),
                "ff_b2": normal((1, d_model), 0.02),
                "ln1_g": g1, "ln1_b": b1, "ln2_g": g2, "ln2_b": b2}

    def dec_layer():
        g1, b1 = ln(); g2, b2 = ln(); g3, b3 = ln()
        return {"self_attn": attn(), "cross_attn": attn(),
                "ff_w1": normal((d_model, dim_feedforward), 0.05),
                "ff_b1": normal((1, dim_feedforward), 0.02),
                "ff_w2": normal((dim_feedforward, d_model), 0.05),
                "ff_b2": normal((1, d_model), 0.02),
                "ln1_g": g1, "ln1_b": b1, "ln2_g": g2, "ln2_b": b2,
                "ln3_g": g3, "ln3_b": b3}

    return {
        "image_pos_encoding": normal((1, MAX_IMAGE_HEIGHT // 2, d_model), 0.02),
        "encoder_layers": [enc_layer() for _ in range(num_encoder_layers)],
        "decoder_layers": [dec_layer() for _ in range(num_decoder_layers)],
        "query_embed": normal((max_target_seq_len, d_model), 0.02),
        "encoder_char_head": dense(d_model, vocab_size),
        "encoder_top_head": dense(d_model, 1),
        "encoder_box_head": dense(d_model, CNN_OUTPUT_WIDTH),
        "decoder_char_head": dense(d_model, vocab_size),
    }


# ----------------------------------------------------------------------------
if __name__ == "__main__":
    # Small config:  d_model = C_out * W_out = 4 * 8 = 32
    d_model = 32
    nhead = 4
    num_encoder_layers = 2
    num_decoder_layers = 2
    dim_feedforward = 64
    vocab_size = 16
    max_target_seq_len = 16

    B, C_out, H_out, W_out = 2, 4, 16, 8
    assert d_model == C_out * W_out

    root = jax.random.PRNGKey(0)
    pkey, xkey = jax.random.split(root)
    params = init_params(pkey, d_model, nhead, num_encoder_layers,
                         num_decoder_layers, dim_feedforward, vocab_size,
                         max_target_seq_len)
    src_features = jax.random.normal(xkey, (B, C_out, H_out, W_out), jnp.float32)

    fwd = jax.jit(functools.partial(kuzushiji_transformer_forward, nhead=nhead))
    out = fwd(params, src_features)
    out = jax.block_until_ready(out)

    assert out["encoder_char_logits"].shape == (B, H_out, vocab_size)
    assert out["encoder_top_logits"].shape == (B, H_out)
    assert out["encoder_box_logits"].shape == (B, H_out, CNN_OUTPUT_WIDTH)
    assert out["decoder_char_logits"].shape == (B, max_target_seq_len, vocab_size)
    for v in out.values():
        assert bool(jnp.all(jnp.isfinite(v)))

    print("KERNEL_OK")
</pallas_src>

<mosaic_0001>
module attributes {stable_mosaic.version = 11 : i64} {
  func.func @_encoder_stack_kernel(%arg0: i32, %arg1: i32, %arg2: memref<1x16x32xf32, #tpu.memory_space<vmem>>, %arg3: memref<1x32x32xbf16, #tpu.memory_space<vmem>>, %arg4: memref<1x1x32xf32, #tpu.memory_space<vmem>>, %arg5: memref<1x32x32xbf16, #tpu.memory_space<vmem>>, %arg6: memref<1x1x32xf32, #tpu.memory_space<vmem>>, %arg7: memref<1x32x32xbf16, #tpu.memory_space<vmem>>, %arg8: memref<1x1x32xf32, #tpu.memory_space<vmem>>, %arg9: memref<1x32x32xbf16, #tpu.memory_space<vmem>>, %arg10: memref<1x1x32xf32, #tpu.memory_space<vmem>>, %arg11: memref<1x1x32xf32, #tpu.memory_space<vmem>>, %arg12: memref<1x1x32xf32, #tpu.memory_space<vmem>>, %arg13: memref<1x32x64xbf16, #tpu.memory_space<vmem>>, %arg14: memref<1x1x64xf32, #tpu.memory_space<vmem>>, %arg15: memref<1x64x32xbf16, #tpu.memory_space<vmem>>, %arg16: memref<1x1x32xf32, #tpu.memory_space<vmem>>, %arg17: memref<1x1x32xf32, #tpu.memory_space<vmem>>, %arg18: memref<1x1x32xf32, #tpu.memory_space<vmem>>, %arg19: memref<1x16x32xf32, #tpu.memory_space<vmem>>) attributes {dimension_semantics = [#tpu.dimension_semantics<parallel>, #tpu.dimension_semantics<arbitrary>], iteration_bounds = array<i64: 2, 2>, scalar_prefetch = 0 : i64, scratch_operands = 0 : i64, tpu.core_type = #tpu.core_type<tc>, window_params = [{transform_indices = @transform_0, window_bounds = array<i64: 1, 16, 32>}, {transform_indices = @transform_1, window_bounds = array<i64: 1, 32, 32>}, {transform_indices = @transform_2, window_bounds = array<i64: 1, 1, 32>}, {transform_indices = @transform_3, window_bounds = array<i64: 1, 32, 32>}, {transform_indices = @transform_4, window_bounds = array<i64: 1, 1, 32>}, {transform_indices = @transform_5, window_bounds = array<i64: 1, 32, 32>}, {transform_indices = @transform_6, window_bounds = array<i64: 1, 1, 32>}, {transform_indices = @transform_7, window_bounds = array<i64: 1, 32, 32>}, {transform_indices = @transform_8, window_bounds = array<i64: 1, 1, 32>}, {transform_indices = @transform_9, window_bounds = array<i64: 1, 1, 32>}, {transform_indices = @transform_10, window_bounds = array<i64: 1, 1, 32>}, {transform_indices = @transform_11, window_bounds = array<i64: 1, 32, 64>}, {transform_indices = @transform_12, window_bounds = array<i64: 1, 1, 64>}, {transform_indices = @transform_13, window_bounds = array<i64: 1, 64, 32>}, {transform_indices = @transform_14, window_bounds = array<i64: 1, 1, 32>}, {transform_indices = @transform_15, window_bounds = array<i64: 1, 1, 32>}, {transform_indices = @transform_16, window_bounds = array<i64: 1, 1, 32>}, {transform_indices = @transform_17, window_bounds = array<i64: 1, 16, 32>}]} {
    %c0_i32 = arith.constant 0 : i32
    %0 = arith.cmpi eq, %arg1, %c0_i32 : i32
    %1 = arith.extui %0 : i1 to i32
    %c0_i32_0 = arith.constant 0 : i32
    %2 = arith.cmpi ne, %1, %c0_i32_0 : i32
    scf.if %2 {
      %c0_86 = arith.constant 0 : index
      %c0_87 = arith.constant 0 : index
      %c0_88 = arith.constant 0 : index
      %188 = vector.load %arg2[%c0_86, %c0_87, %c0_88] : memref<1x16x32xf32, #tpu.memory_space<vmem>>, vector<1x16x32xf32>
      %189 = vector.shape_cast %188 : vector<1x16x32xf32> to vector<16x32xf32>
      %c0_89 = arith.constant 0 : index
      %c0_90 = arith.constant 0 : index
      %c0_91 = arith.constant 0 : index
      %190 = vector.load %arg19[%c0_89, %c0_90, %c0_91] : memref<1x16x32xf32, #tpu.memory_space<vmem>>, vector<1x16x32xf32>
      %191 = vector.shape_cast %190 : vector<1x16x32xf32> to vector<16x32xf32>
      %192 = vector.shape_cast %189 : vector<16x32xf32> to vector<1x16x32xf32>
      tpu.vector_store %arg19[%c0_89, %c0_90, %c0_91], %192 {strides = array<i32>} : memref<1x16x32xf32, #tpu.memory_space<vmem>>, vector<1x16x32xf32>,
    } else {
    }
    %c0 = arith.constant 0 : index
    %c0_1 = arith.constant 0 : index
    %c0_2 = arith.constant 0 : index
    %3 = vector.load %arg19[%c0, %c0_1, %c0_2] : memref<1x16x32xf32, #tpu.memory_space<vmem>>, vector<1x16x32xf32>
    %4 = vector.shape_cast %3 : vector<1x16x32xf32> to vector<16x32xf32>
    %5 = arith.truncf %4 : vector<16x32xf32> to vector<16x32xbf16>
    %6 = arith.truncf %4 : vector<16x32xf32> to vector<16x32xbf16>
    %c0_3 = arith.constant 0 : index
    %c0_4 = arith.constant 0 : index
    %c0_5 = arith.constant 0 : index
    %7 = vector.load %arg3[%c0_3, %c0_4, %c0_5] : memref<1x32x32xbf16, #tpu.memory_space<vmem>>, vector<1x32x32xbf16>
    %8 = vector.shape_cast %7 : vector<1x32x32xbf16> to vector<32x32xbf16>
    %cst = arith.constant dense<0.000000e+00> : vector<16x32xf32>
    %9 = tpu.matmul %5, %8, %cst {dimension_numbers = #tpu.dot_dimension_numbers<[1], [0], [0], [1], [0, 0, 1, 1], [], []>} : vector<16x32xbf16>, vector<32x32xbf16>, vector<16x32xf32> -> vector<16x32xf32>
    %c0_6 = arith.constant 0 : index
    %c0_7 = arith.constant 0 : index
    %c0_8 = arith.constant 0 : index
    %10 = vector.load %arg4[%c0_6, %c0_7, %c0_8] : memref<1x1x32xf32, #tpu.memory_space<vmem>>, vector<1x1x32xf32>
    %11 = vector.shape_cast %10 : vector<1x1x32xf32> to vector<1x32xf32>
    %12 = vector.broadcast %11 : vector<1x32xf32> to vector<16x32xf32>
    %13 = arith.addf %9, %12 : vector<16x32xf32>
    %c0_9 = arith.constant 0 : index
    %c0_10 = arith.constant 0 : index
    %c0_11 = arith.constant 0 : index
    %14 = vector.load %arg5[%c0_9, %c0_10, %c0_11] : memref<1x32x32xbf16, #tpu.memory_space<vmem>>, vector<1x32x32xbf16>
    %15 = vector.shape_cast %14 : vector<1x32x32xbf16> to vector<32x32xbf16>
    %cst_12 = arith.constant dense<0.000000e+00> : vector<16x32xf32>
    %16 = tpu.matmul %6, %15, %cst_12 {dimension_numbers = #tpu.dot_dimension_numbers<[1], [0], [0], [1], [0, 0, 1, 1], [], []>} : vector<16x32xbf16>, vector<32x32xbf16>, vector<16x32xf32> -> vector<16x32xf32>
    %c0_13 = arith.constant 0 : index
    %c0_14 = arith.constant 0 : index
    %c0_15 = arith.constant 0 : index
    %17 = vector.load %arg6[%c0_13, %c0_14, %c0_15] : memref<1x1x32xf32, #tpu.memory_space<vmem>>, vector<1x1x32xf32>
    %18 = vector.shape_cast %17 : vector<1x1x32xf32> to vector<1x32xf32>
    %19 = vector.broadcast %18 : vector<1x32xf32> to vector<16x32xf32>
    %20 = arith.addf %16, %19 : vector<16x32xf32>
    %c0_16 = arith.constant 0 : index
    %c0_17 = arith.constant 0 : index
    %c0_18 = arith.constant 0 : index
    %21 = vector.load %arg7[%c0_16, %c0_17, %c0_18] : memref<1x32x32xbf16, #tpu.memory_space<vmem>>, vector<1x32x32xbf16>
    %22 = vector.shape_cast %21 : vector<1x32x32xbf16> to vector<32x32xbf16>
    %cst_19 = arith.constant dense<0.000000e+00> : vector<16x32xf32>
    %23 = tpu.matmul %6, %22, %cst_19 {dimension_numbers = #tpu.dot_dimension_numbers<[1], [0], [0], [1], [0, 0, 1, 1], [], []>} : vector<16x32xbf16>, vector<32x32xbf16>, vector<16x32xf32> -> vector<16x32xf32>
    %c0_20 = arith.constant 0 : index
    %c0_21 = arith.constant 0 : index
    %c0_22 = arith.constant 0 : index
    %24 = vector.load %arg8[%c0_20, %c0_21, %c0_22] : memref<1x1x32xf32, #tpu.memory_space<vmem>>, vector<1x1x32xf32>
    %25 = vector.shape_cast %24 : vector<1x1x32xf32> to vector<1x32xf32>
    %26 = vector.broadcast %25 : vector<1x32xf32> to vector<16x32xf32>
    %27 = arith.addf %23, %26 : vector<16x32xf32>
    %28 = vector.extract_strided_slice %13 {offsets = [0, 0], sizes = [16, 8], strides = [1, 1]} : vector<16x32xf32> to vector<16x8xf32>
    %29 = arith.truncf %28 : vector<16x8xf32> to vector<16x8xbf16>
    %30 = vector.extract_strided_slice %20 {offsets = [0, 0], sizes = [16, 8], strides = [1, 1]} : vector<16x32xf32> to vector<16x8xf32>
    %31 = arith.truncf %30 : vector<16x8xf32> to vector<16x8xbf16>
    %32 = vector.extract_strided_slice %27 {offsets = [0, 0], sizes = [16, 8], strides = [1, 1]} : vector<16x32xf32> to vector<16x8xf32>
    %33 = arith.truncf %32 : vector<16x8xf32> to vector<16x8xbf16>
    %cst_23 = arith.constant dense<0.000000e+00> : vector<16x16xf32>
    %34 = tpu.matmul %29, %31, %cst_23 {dimension_numbers = #tpu.dot_dimension_numbers<[1], [1], [0], [0], [0, 0, 1, 0], [], []>} : vector<16x8xbf16>, vector<16x8xbf16>, vector<16x16xf32> -> vector<16x16xf32>
    %cst_24 = arith.constant dense<0xFF800000> : vector<16xf32>
    %35 = vector.multi_reduction <maximumf>, %34, %cst_24 [1] : vector<16x16xf32> to vector<16xf32>
    %36 = vector.shape_cast %35 : vector<16xf32> to vector<16x1xf32>
    %37 = vector.broadcast %36 : vector<16x1xf32> to vector<16x16xf32>
    %38 = arith.subf %34, %37 : vector<16x16xf32>
    %39 = math.exp %38 : vector<16x16xf32>
    %cst_25 = arith.constant dense<0.000000e+00> : vector<16xf32>
    %40 = vector.multi_reduction <add>, %39, %cst_25 [1] : vector<16x16xf32> to vector<16xf32>
    %41 = vector.shape_cast %40 : vector<16xf32> to vector<16x1xf32>
    %42 = arith.truncf %39 : vector<16x16xf32> to vector<16x16xbf16>
    %cst_26 = arith.constant dense<0.000000e+00> : vector<16x8xf32>
    %43 = tpu.matmul %42, %33, %cst_26 {dimension_numbers = #tpu.dot_dimension_numbers<[1], [0], [0], [1], [0, 0, 1, 1], [], []>} : vector<16x16xbf16>, vector<16x8xbf16>, vector<16x8xf32> -> vector<16x8xf32>
    %44 = tpu.reciprocal %41 {approx = true} : vector<16x1xf32> -> vector<16x1xf32>
    %45 = vector.broadcast %44 : vector<16x1xf32> to vector<16x8xf32>
    %46 = arith.mulf %43, %45 : vector<16x8xf32>
    %47 = vector.extract_strided_slice %13 {offsets = [0, 8], sizes = [16, 8], strides = [1, 1]} : vector<16x32xf32> to vector<16x8xf32>
    %48 = arith.truncf %47 : vector<16x8xf32> to vector<16x8xbf16>
    %49 = vector.extract_strided_slice %20 {offsets = [0, 8], sizes = [16, 8], strides = [1, 1]} : vector<16x32xf32> to vector<16x8xf32>
    %50 = arith.truncf %49 : vector<16x8xf32> to vector<16x8xbf16>
    %51 = vector.extract_strided_slice %27 {offsets = [0, 8], sizes = [16, 8], strides = [1, 1]} : vector<16x32xf32> to vector<16x8xf32>
    %52 = arith.truncf %51 : vector<16x8xf32> to vector<16x8xbf16>
    %cst_27 = arith.constant dense<0.000000e+00> : vector<16x16xf32>
    %53 = tpu.matmul %48, %50, %cst_27 {dimension_numbers = #tpu.dot_dimension_numbers<[1], [1], [0], [0], [0, 0, 1, 0], [], []>} : vector<16x8xbf16>, vector<16x8xbf16>, vector<16x16xf32> -> vector<16x16xf32>
    %cst_28 = arith.constant dense<0xFF800000> : vector<16xf32>
    %54 = vector.multi_reduction <maximumf>, %53, %cst_28 [1] : vector<16x16xf32> to vector<16xf32>
    %55 = vector.shape_cast %54 : vector<16xf32> to vector<16x1xf32>
    %56 = vector.broadcast %55 : vector<16x1xf32> to vector<16x16xf32>
    %57 = arith.subf %53, %56 : vector<16x16xf32>
    %58 = math.exp %57 : vector<16x16xf32>
    %cst_29 = arith.constant dense<0.000000e+00> : vector<16xf32>
    %59 = vector.multi_reduction <add>, %58, %cst_29 [1] : vector<16x16xf32> to vector<16xf32>
    %60 = vector.shape_cast %59 : vector<16xf32> to vector<16x1xf32>
    %61 = arith.truncf %58 : vector<16x16xf32> to vector<16x16xbf16>
    %cst_30 = arith.constant dense<0.000000e+00> : vector<16x8xf32>
    %62 = tpu.matmul %61, %52, %cst_30 {dimension_numbers = #tpu.dot_dimension_numbers<[1], [0], [0], [1], [0, 0, 1, 1], [], []>} : vector<16x16xbf16>, vector<16x8xbf16>, vector<16x8xf32> -> vector<16x8xf32>
    %63 = tpu.reciprocal %60 {approx = true} : vector<16x1xf32> -> vector<16x1xf32>
    %64 = vector.broadcast %63 : vector<16x1xf32> to vector<16x8xf32>
    %65 = arith.mulf %62, %64 : vector<16x8xf32>
    %66 = vector.extract_strided_slice %13 {offsets = [0, 16], sizes = [16, 8], strides = [1, 1]} : vector<16x32xf32> to vector<16x8xf32>
    %67 = arith.truncf %66 : vector<16x8xf32> to vector<16x8xbf16>
    %68 = vector.extract_strided_slice %20 {offsets = [0, 16], sizes = [16, 8], strides = [1, 1]} : vector<16x32xf32> to vector<16x8xf32>
    %69 = arith.truncf %68 : vector<16x8xf32> to vector<16x8xbf16>
    %70 = vector.extract_strided_slice %27 {offsets = [0, 16], sizes = [16, 8], strides = [1, 1]} : vector<16x32xf32> to vector<16x8xf32>
    %71 = arith.truncf %70 : vector<16x8xf32> to vector<16x8xbf16>
    %cst_31 = arith.constant dense<0.000000e+00> : vector<16x16xf32>
    %72 = tpu.matmul %67, %69, %cst_31 {dimension_numbers = #tpu.dot_dimension_numbers<[1], [1], [0], [0], [0, 0, 1, 0], [], []>} : vector<16x8xbf16>, vector<16x8xbf16>, vector<16x16xf32> -> vector<16x16xf32>
    %cst_32 = arith.constant dense<0xFF800000> : vector<16xf32>
    %73 = vector.multi_reduction <maximumf>, %72, %cst_32 [1] : vector<16x16xf32> to vector<16xf32>
    %74 = vector.shape_cast %73 : vector<16xf32> to vector<16x1xf32>
    %75 = vector.broadcast %74 : vector<16x1xf32> to vector<16x16xf32>
    %76 = arith.subf %72, %75 : vector<16x16xf32>
    %77 = math.exp %76 : vector<16x16xf32>
    %cst_33 = arith.constant dense<0.000000e+00> : vector<16xf32>
    %78 = vector.multi_reduction <add>, %77, %cst_33 [1] : vector<16x16xf32> to vector<16xf32>
    %79 = vector.shape_cast %78 : vector<16xf32> to vector<16x1xf32>
    %80 = arith.truncf %77 : vector<16x16xf32> to vector<16x16xbf16>
    %cst_34 = arith.constant dense<0.000000e+00> : vector<16x8xf32>
    %81 = tpu.matmul %80, %71, %cst_34 {dimension_numbers = #tpu.dot_dimension_numbers<[1], [0], [0], [1], [0, 0, 1, 1], [], []>} : vector<16x16xbf16>, vector<16x8xbf16>, vector<16x8xf32> -> vector<16x8xf32>
    %82 = tpu.reciprocal %79 {approx = true} : vector<16x1xf32> -> vector<16x1xf32>
    %83 = vector.broadcast %82 : vector<16x1xf32> to vector<16x8xf32>
    %84 = arith.mulf %81, %83 : vector<16x8xf32>
    %85 = vector.extract_strided_slice %13 {offsets = [0, 24], sizes = [16, 8], strides = [1, 1]} : vector<16x32xf32> to vector<16x8xf32>
    %86 = arith.truncf %85 : vector<16x8xf32> to vector<16x8xbf16>
    %87 = vector.extract_strided_slice %20 {offsets = [0, 24], sizes = [16, 8], strides = [1, 1]} : vector<16x32xf32> to vector<16x8xf32>
    %88 = arith.truncf %87 : vector<16x8xf32> to vector<16x8xbf16>
    %89 = vector.extract_strided_slice %27 {offsets = [0, 24], sizes = [16, 8], strides = [1, 1]} : vector<16x32xf32> to vector<16x8xf32>
    %90 = arith.truncf %89 : vector<16x8xf32> to vector<16x8xbf16>
    %cst_35 = arith.constant dense<0.000000e+00> : vector<16x16xf32>
    %91 = tpu.matmul %86, %88, %cst_35 {dimension_numbers = #tpu.dot_dimension_numbers<[1], [1], [0], [0], [0, 0, 1, 0], [], []>} : vector<16x8xbf16>, vector<16x8xbf16>, vector<16x16xf32> -> vector<16x16xf32>
    %cst_36 = arith.constant dense<0xFF800000> : vector<16xf32>
    %92 = vector.multi_reduction <maximumf>, %91, %cst_36 [1] : vector<16x16xf32> to vector<16xf32>
    %93 = vector.shape_cast %92 : vector<16xf32> to vector<16x1xf32>
    %94 = vector.broadcast %93 : vector<16x1xf32> to vector<16x16xf32>
    %95 = arith.subf %91, %94 : vector<16x16xf32>
    %96 = math.exp %95 : vector<16x16xf32>
    %cst_37 = arith.constant dense<0.000000e+00> : vector<16xf32>
    %97 = vector.multi_reduction <add>, %96, %cst_37 [1] : vector<16x16xf32> to vector<16xf32>
    %98 = vector.shape_cast %97 : vector<16xf32> to vector<16x1xf32>
    %99 = arith.truncf %96 : vector<16x16xf32> to vector<16x16xbf16>
    %cst_38 = arith.constant dense<0.000000e+00> : vector<16x8xf32>
    %100 = tpu.matmul %99, %90, %cst_38 {dimension_numbers = #tpu.dot_dimension_numbers<[1], [0], [0], [1], [0, 0, 1, 1], [], []>} : vector<16x16xbf16>, vector<16x8xbf16>, vector<16x8xf32> -> vector<16x8xf32>
    %101 = tpu.reciprocal %98 {approx = true} : vector<16x1xf32> -> vector<16x1xf32>
    %102 = vector.broadcast %101 : vector<16x1xf32> to vector<16x8xf32>
    %103 = arith.mulf %100, %102 : vector<16x8xf32>
    %104 = tpu.concatenate %46, %65, %84, %103 in 1 : vector<16x8xf32>, vector<16x8xf32>, vector<16x8xf32>, vector<16x8xf32> -> vector<16x32xf32>
    %105 = arith.truncf %104 : vector<16x32xf32> to vector<16x32xbf16>
    %c0_39 = arith.constant 0 : index
    %c0_40 = arith.constant 0 : index
    %c0_41 = arith.constant 0 : index
    %106 = vector.load %arg9[%c0_39, %c0_40, %c0_41] : memref<1x32x32xbf16, #tpu.memory_space<vmem>>, vector<1x32x32xbf16>
    %107 = vector.shape_cast %106 : vector<1x32x32xbf16> to vector<32x32xbf16>
    %cst_42 = arith.constant dense<0.000000e+00> : vector<16x32xf32>
    %108 = tpu.matmul %105, %107, %cst_42 {dimension_numbers = #tpu.dot_dimension_numbers<[1], [0], [0], [1], [0, 0, 1, 1], [], []>} : vector<16x32xbf16>, vector<32x32xbf16>, vector<16x32xf32> -> vector<16x32xf32>
    %c0_43 = arith.constant 0 : index
    %c0_44 = arith.constant 0 : index
    %c0_45 = arith.constant 0 : index
    %109 = vector.load %arg10[%c0_43, %c0_44, %c0_45] : memref<1x1x32xf32, #tpu.memory_space<vmem>>, vector<1x1x32xf32>
    %110 = vector.shape_cast %109 : vector<1x1x32xf32> to vector<1x32xf32>
    %111 = vector.broadcast %110 : vector<1x32xf32> to vector<16x32xf32>
    %112 = arith.addf %108, %111 : vector<16x32xf32>
    %113 = arith.addf %4, %112 : vector<16x32xf32>
    %c0_46 = arith.constant 0 : index
    %c0_47 = arith.constant 0 : index
    %c0_48 = arith.constant 0 : index
    %114 = vector.load %arg11[%c0_46, %c0_47, %c0_48] : memref<1x1x32xf32, #tpu.memory_space<vmem>>, vector<1x1x32xf32>
    %115 = vector.shape_cast %114 : vector<1x1x32xf32> to vector<1x32xf32>
    %c0_49 = arith.constant 0 : index
    %c0_50 = arith.constant 0 : index
    %c0_51 = arith.constant 0 : index
    %116 = vector.load %arg12[%c0_49, %c0_50, %c0_51] : memref<1x1x32xf32, #tpu.memory_space<vmem>>, vector<1x1x32xf32>
    %117 = vector.shape_cast %116 : vector<1x1x32xf32> to vector<1x32xf32>
    %cst_52 = arith.constant dense<0.000000e+00> : vector<16xf32>
    %118 = vector.multi_reduction <add>, %113, %cst_52 [1] : vector<16x32xf32> to vector<16xf32>
    %119 = vector.shape_cast %118 : vector<16xf32> to vector<16x1xf32>
    %cst_53 = arith.constant 3.200000e+01 : f32
    %120 = vector.broadcast %cst_53 : f32 to vector<16x1xf32>
    %121 = arith.divf %119, %120 : vector<16x1xf32>
    %122 = vector.broadcast %121 : vector<16x1xf32> to vector<16x32xf32>
    %123 = arith.subf %113, %122 : vector<16x32xf32>
    %124 = arith.mulf %123, %123 : vector<16x32xf32>
    %cst_54 = arith.constant dense<0.000000e+00> : vector<16xf32>
    %125 = vector.multi_reduction <add>, %124, %cst_54 [1] : vector<16x32xf32> to vector<16xf32>
    %126 = vector.shape_cast %125 : vector<16xf32> to vector<16x1xf32>
    %cst_55 = arith.constant 3.200000e+01 : f32
    %127 = vector.broadcast %cst_55 : f32 to vector<16x1xf32>
    %128 = arith.divf %126, %127 : vector<16x1xf32>
    %129 = vector.broadcast %121 : vector<16x1xf32> to vector<16x32xf32>
    %130 = arith.subf %113, %129 : vector<16x32xf32>
    %cst_56 = arith.constant 9.99999974E-6 : f32
    %131 = vector.broadcast %cst_56 : f32 to vector<16x1xf32>
    %132 = arith.addf %128, %131 : vector<16x1xf32>
    %133 = math.rsqrt %132 : vector<16x1xf32>
    %134 = vector.broadcast %133 : vector<16x1xf32> to vector<16x32xf32>
    %135 = arith.mulf %130, %134 : vector<16x32xf32>
    %136 = vector.broadcast %115 : vector<1x32xf32> to vector<16x32xf32>
    %137 = arith.mulf %135, %136 : vector<16x32xf32>
    %138 = vector.broadcast %117 : vector<1x32xf32> to vector<16x32xf32>
    %139 = arith.addf %137, %138 : vector<16x32xf32>
    %140 = arith.truncf %139 : vector<16x32xf32> to vector<16x32xbf16>
    %c0_57 = arith.constant 0 : index
    %c0_58 = arith.constant 0 : index
    %c0_59 = arith.constant 0 : index
    %141 = vector.load %arg13[%c0_57, %c0_58, %c0_59] : memref<1x32x64xbf16, #tpu.memory_space<vmem>>, vector<1x32x64xbf16>
    %142 = vector.shape_cast %141 : vector<1x32x64xbf16> to vector<32x64xbf16>
    %cst_60 = arith.constant dense<0.000000e+00> : vector<16x64xf32>
    %143 = tpu.matmul %140, %142, %cst_60 {dimension_numbers = #tpu.dot_dimension_numbers<[1], [0], [0], [1], [0, 0, 1, 1], [], []>} : vector<16x32xbf16>, vector<32x64xbf16>, vector<16x64xf32> -> vector<16x64xf32>
    %c0_61 = arith.constant 0 : index
    %c0_62 = arith.constant 0 : index
    %c0_63 = arith.constant 0 : index
    %144 = vector.load %arg14[%c0_61, %c0_62, %c0_63] : memref<1x1x64xf32, #tpu.memory_space<vmem>>, vector<1x1x64xf32>
    %145 = vector.shape_cast %144 : vector<1x1x64xf32> to vector<1x64xf32>
    %146 = vector.broadcast %145 : vector<1x64xf32> to vector<16x64xf32>
    %147 = arith.addf %143, %146 : vector<16x64xf32>
    %cst_64 = arith.constant 0.000000e+00 : f32
    %148 = vector.broadcast %cst_64 : f32 to vector<16x64xf32>
    %149 = arith.maximumf %147, %148 : vector<16x64xf32>
    %150 = arith.truncf %149 : vector<16x64xf32> to vector<16x64xbf16>
    %c0_65 = arith.constant 0 : index
    %c0_66 = arith.constant 0 : index
    %c0_67 = arith.constant 0 : index
    %151 = vector.load %arg15[%c0_65, %c0_66, %c0_67] : memref<1x64x32xbf16, #tpu.memory_space<vmem>>, vector<1x64x32xbf16>
    %152 = vector.shape_cast %151 : vector<1x64x32xbf16> to vector<64x32xbf16>
    %cst_68 = arith.constant dense<0.000000e+00> : vector<16x32xf32>
    %153 = tpu.matmul %150, %152, %cst_68 {dimension_numbers = #tpu.dot_dimension_numbers<[1], [0], [0], [1], [0, 0, 1, 1], [], []>} : vector<16x64xbf16>, vector<64x32xbf16>, vector<16x32xf32> -> vector<16x32xf32>
    %c0_69 = arith.constant 0 : index
    %c0_70 = arith.constant 0 : index
    %c0_71 = arith.constant 0 : index
    %154 = vector.load %arg16[%c0_69, %c0_70, %c0_71] : memref<1x1x32xf32, #tpu.memory_space<vmem>>, vector<1x1x32xf32>
    %155 = vector.shape_cast %154 : vector<1x1x32xf32> to vector<1x32xf32>
    %156 = vector.broadcast %155 : vector<1x32xf32> to vector<16x32xf32>
    %157 = arith.addf %153, %156 : vector<16x32xf32>
    %158 = arith.addf %139, %157 : vector<16x32xf32>
    %c0_72 = arith.constant 0 : index
    %c0_73 = arith.constant 0 : index
    %c0_74 = arith.constant 0 : index
    %159 = vector.load %arg17[%c0_72, %c0_73, %c0_74] : memref<1x1x32xf32, #tpu.memory_space<vmem>>, vector<1x1x32xf32>
    %160 = vector.shape_cast %159 : vector<1x1x32xf32> to vector<1x32xf32>
    %c0_75 = arith.constant 0 : index
    %c0_76 = arith.constant 0 : index
    %c0_77 = arith.constant 0 : index
    %161 = vector.load %arg18[%c0_75, %c0_76, %c0_77] : memref<1x1x32xf32, #tpu.memory_space<vmem>>, vector<1x1x32xf32>
    %162 = vector.shape_cast %161 : vector<1x1x32xf32> to vector<1x32xf32>
    %cst_78 = arith.constant dense<0.000000e+00> : vector<16xf32>
    %163 = vector.multi_reduction <add>, %158, %cst_78 [1] : vector<16x32xf32> to vector<16xf32>
    %164 = vector.shape_cast %163 : vector<16xf32> to vector<16x1xf32>
    %cst_79 = arith.constant 3.200000e+01 : f32
    %165 = vector.broadcast %cst_79 : f32 to vector<16x1xf32>
    %166 = arith.divf %164, %165 : vector<16x1xf32>
    %167 = vector.broadcast %166 : vector<16x1xf32> to vector<16x32xf32>
    %168 = arith.subf %158, %167 : vector<16x32xf32>
    %169 = arith.mulf %168, %168 : vector<16x32xf32>
    %cst_80 = arith.constant dense<0.000000e+00> : vector<16xf32>
    %170 = vector.multi_reduction <add>, %169, %cst_80 [1] : vector<16x32xf32> to vector<16xf32>
    %171 = vector.shape_cast %170 : vector<16xf32> to vector<16x1xf32>
    %cst_81 = arith.constant 3.200000e+01 : f32
    %172 = vector.broadcast %cst_81 : f32 to vector<16x1xf32>
    %173 = arith.divf %171, %172 : vector<16x1xf32>
    %174 = vector.broadcast %166 : vector<16x1xf32> to vector<16x32xf32>
    %175 = arith.subf %158, %174 : vector<16x32xf32>
    %cst_82 = arith.constant 9.99999974E-6 : f32
    %176 = vector.broadcast %cst_82 : f32 to vector<16x1xf32>
    %177 = arith.addf %173, %176 : vector<16x1xf32>
    %178 = math.rsqrt %177 : vector<16x1xf32>
    %179 = vector.broadcast %178 : vector<16x1xf32> to vector<16x32xf32>
    %180 = arith.mulf %175, %179 : vector<16x32xf32>
    %181 = vector.broadcast %160 : vector<1x32xf32> to vector<16x32xf32>
    %182 = arith.mulf %180, %181 : vector<16x32xf32>
    %183 = vector.broadcast %162 : vector<1x32xf32> to vector<16x32xf32>
    %184 = arith.addf %182, %183 : vector<16x32xf32>
    %c0_83 = arith.constant 0 : index
    %c0_84 = arith.constant 0 : index
    %c0_85 = arith.constant 0 : index
    %185 = vector.load %arg19[%c0_83, %c0_84, %c0_85] : memref<1x16x32xf32, #tpu.memory_space<vmem>>, vector<1x16x32xf32>
    %186 = vector.shape_cast %185 : vector<1x16x32xf32> to vector<16x32xf32>
    %187 = vector.shape_cast %184 : vector<16x32xf32> to vector<1x16x32xf32>
    tpu.vector_store %arg19[%c0_83, %c0_84, %c0_85], %187 {strides = array<i32>} : memref<1x16x32xf32, #tpu.memory_space<vmem>>, vector<1x16x32xf32>,
    return
  }
  func.func @transform_0(%arg0: i32, %arg1: i32) -> (i32, i32, i32) {
    %c0_i32 = arith.constant 0 : i32
    %c0_i32_0 = arith.constant 0 : i32
    %c0_i32_1 = arith.constant 0 : i32
    return %arg0, %c0_i32, %c0_i32_0 : i32, i32, i32
  }
  func.func @transform_1(%arg0: i32, %arg1: i32) -> (i32, i32, i32) {
    %c0_i32 = arith.constant 0 : i32
    %c0_i32_0 = arith.constant 0 : i32
    %c0_i32_1 = arith.constant 0 : i32
    return %arg1, %c0_i32, %c0_i32_0 : i32, i32, i32
  }
  func.func @transform_2(%arg0: i32, %arg1: i32) -> (i32, i32, i32) {
    %c0_i32 = arith.constant 0 : i32
    %c0_i32_0 = arith.constant 0 : i32
    %c0_i32_1 = arith.constant 0 : i32
    return %arg1, %c0_i32, %c0_i32_0 : i32, i32, i32
  }
  func.func @transform_3(%arg0: i32, %arg1: i32) -> (i32, i32, i32) {
    %c0_i32 = arith.constant 0 : i32
    %c0_i32_0 = arith.constant 0 : i32
    %c0_i32_1 = arith.constant 0 : i32
    return %arg1, %c0_i32, %c0_i32_0 : i32, i32, i32
  }
  func.func @transform_4(%arg0: i32, %arg1: i32) -> (i32, i32, i32) {
    %c0_i32 = arith.constant 0 : i32
    %c0_i32_0 = arith.constant 0 : i32
    %c0_i32_1 = arith.constant 0 : i32
    return %arg1, %c0_i32, %c0_i32_0 : i32, i32, i32
  }
  func.func @transform_5(%arg0: i32, %arg1: i32) -> (i32, i32, i32) {
    %c0_i32 = arith.constant 0 : i32
    %c0_i32_0 = arith.constant 0 : i32
    %c0_i32_1 = arith.constant 0 : i32
    return %arg1, %c0_i32, %c0_i32_0 : i32, i32, i32
  }
  func.func @transform_6(%arg0: i32, %arg1: i32) -> (i32, i32, i32) {
    %c0_i32 = arith.constant 0 : i32
    %c0_i32_0 = arith.constant 0 : i32
    %c0_i32_1 = arith.constant 0 : i32
    return %arg1, %c0_i32, %c0_i32_0 : i32, i32, i32
  }
  func.func @transform_7(%arg0: i32, %arg1: i32) -> (i32, i32, i32) {
    %c0_i32 = arith.constant 0 : i32
    %c0_i32_0 = arith.constant 0 : i32
    %c0_i32_1 = arith.constant 0 : i32
    return %arg1, %c0_i32, %c0_i32_0 : i32, i32, i32
  }
  func.func @transform_8(%arg0: i32, %arg1: i32) -> (i32, i32, i32) {
    %c0_i32 = arith.constant 0 : i32
    %c0_i32_0 = arith.constant 0 : i32
    %c0_i32_1 = arith.constant 0 : i32
    return %arg1, %c0_i32, %c0_i32_0 : i32, i32, i32
  }
  func.func @transform_9(%arg0: i32, %arg1: i32) -> (i32, i32, i32) {
    %c0_i32 = arith.constant 0 : i32
    %c0_i32_0 = arith.constant 0 : i32
    %c0_i32_1 = arith.constant 0 : i32
    return %arg1, %c0_i32, %c0_i32_0 : i32, i32, i32
  }
  func.func @transform_10(%arg0: i32, %arg1: i32) -> (i32, i32, i32) {
    %c0_i32 = arith.constant 0 : i32
    %c0_i32_0 = arith.constant 0 : i32
    %c0_i32_1 = arith.constant 0 : i32
    return %arg1, %c0_i32, %c0_i32_0 : i32, i32, i32
  }
  func.func @transform_11(%arg0: i32, %arg1: i32) -> (i32, i32, i32) {
    %c0_i32 = arith.constant 0 : i32
    %c0_i32_0 = arith.constant 0 : i32
    %c0_i32_1 = arith.constant 0 : i32
    return %arg1, %c0_i32, %c0_i32_0 : i32, i32, i32
  }
  func.func @transform_12(%arg0: i32, %arg1: i32) -> (i32, i32, i32) {
    %c0_i32 = arith.constant 0 : i32
    %c0_i32_0 = arith.constant 0 : i32
    %c0_i32_1 = arith.constant 0 : i32
    return %arg1, %c0_i32, %c0_i32_0 : i32, i32, i32
  }
  func.func @transform_13(%arg0: i32, %arg1: i32) -> (i32, i32, i32) {
    %c0_i32 = arith.constant 0 : i32
    %c0_i32_0 = arith.constant 0 : i32
    %c0_i32_1 = arith.constant 0 : i32
    return %arg1, %c0_i32, %c0_i32_0 : i32, i32, i32
  }
  func.func @transform_14(%arg0: i32, %arg1: i32) -> (i32, i32, i32) {
    %c0_i32 = arith.constant 0 : i32
    %c0_i32_0 = arith.constant 0 : i32
    %c0_i32_1 = arith.constant 0 : i32
    return %arg1, %c0_i32, %c0_i32_0 : i32, i32, i32
  }
  func.func @transform_15(%arg0: i32, %arg1: i32) -> (i32, i32, i32) {
    %c0_i32 = arith.constant 0 : i32
    %c0_i32_0 = arith.constant 0 : i32
    %c0_i32_1 = arith.constant 0 : i32
    return %arg1, %c0_i32, %c0_i32_0 : i32, i32, i32
  }
  func.func @transform_16(%arg0: i32, %arg1: i32) -> (i32, i32, i32) {
    %c0_i32 = arith.constant 0 : i32
    %c0_i32_0 = arith.constant 0 : i32
    %c0_i32_1 = arith.constant 0 : i32
    return %arg1, %c0_i32, %c0_i32_0 : i32, i32, i32
  }
  func.func @transform_17(%arg0: i32, %arg1: i32) -> (i32, i32, i32) {
    %c0_i32 = arith.constant 0 : i32
    %c0_i32_0 = arith.constant 0 : i32
    %c0_i32_1 = arith.constant 0 : i32
    return %arg0, %c0_i32, %c0_i32_0 : i32, i32, i32
  }
}

module attributes {stable_mosaic.version = 11 : i64} {
  func.func @_decoder_stack_kernel(%arg0: i32, %arg1: i32, %arg2: memref<1x16x32xf32, #tpu.memory_space<vmem>>, %arg3: memref<1x16x32xf32, #tpu.memory_space<vmem>>, %arg4: memref<1x32x32xbf16, #tpu.memory_space<vmem>>, %arg5: memref<1x1x32xf32, #tpu.memory_space<vmem>>, %arg6: memref<1x32x32xbf16, #tpu.memory_space<vmem>>, %arg7: memref<1x1x32xf32, #tpu.memory_space<vmem>>, %arg8: memref<1x32x32xbf16, #tpu.memory_space<vmem>>, %arg9: memref<1x1x32xf32, #tpu.memory_space<vmem>>, %arg10: memref<1x32x32xbf16, #tpu.memory_space<vmem>>, %arg11: memref<1x1x32xf32, #tpu.memory_space<vmem>>, %arg12: memref<1x1x32xf32, #tpu.memory_space<vmem>>, %arg13: memref<1x1x32xf32, #tpu.memory_space<vmem>>, %arg14: memref<1x32x32xbf16, #tpu.memory_space<vmem>>, %arg15: memref<1x1x32xf32, #tpu.memory_space<vmem>>, %arg16: memref<1x32x32xbf16, #tpu.memory_space<vmem>>, %arg17: memref<1x1x32xf32, #tpu.memory_space<vmem>>, %arg18: memref<1x32x32xbf16, #tpu.memory_space<vmem>>, %arg19: memref<1x1x32xf32, #tpu.memory_space<vmem>>, %arg20: memref<1x32x32xbf16, #tpu.memory_space<vmem>>, %arg21: memref<1x1x32xf32, #tpu.memory_space<vmem>>, %arg22: memref<1x1x32xf32, #tpu.memory_space<vmem>>, %arg23: memref<1x1x32xf32, #tpu.memory_space<vmem>>, %arg24: memref<1x32x64xbf16, #tpu.memory_space<vmem>>, %arg25: memref<1x1x64xf32, #tpu.memory_space<vmem>>, %arg26: memref<1x64x32xbf16, #tpu.memory_space<vmem>>, %arg27: memref<1x1x32xf32, #tpu.memory_space<vmem>>, %arg28: memref<1x1x32xf32, #tpu.memory_space<vmem>>, %arg29: memref<1x1x32xf32, #tpu.memory_space<vmem>>, %arg30: memref<1x16x32xf32, #tpu.memory_space<vmem>>) attributes {dimension_semantics = [#tpu.dimension_semantics<parallel>, #tpu.dimension_semantics<arbitrary>], iteration_bounds = array<i64: 2, 2>, scalar_prefetch = 0 : i64, scratch_operands = 0 : i64, tpu.core_type = #tpu.core_type<tc>, window_params = [{transform_indices = @transform_0, window_bounds = array<i64: 1, 16, 32>}, {transform_indices = @transform_1, window_bounds = array<i64: 1, 16, 32>}, {transform_indices = @transform_2, window_bounds = array<i64: 1, 32, 32>}, {transform_indices = @transform_3, window_bounds = array<i64: 1, 1, 32>}, {transform_indices = @transform_4, window_bounds = array<i64: 1, 32, 32>}, {transform_indices = @transform_5, window_bounds = array<i64: 1, 1, 32>}, {transform_indices = @transform_6, window_bounds = array<i64: 1, 32, 32>}, {transform_indices = @transform_7, window_bounds = array<i64: 1, 1, 32>}, {transform_indices = @transform_8, window_bounds = array<i64: 1, 32, 32>}, {transform_indices = @transform_9, window_bounds = array<i64: 1, 1, 32>}, {transform_indices = @transform_10, window_bounds = array<i64: 1, 1, 32>}, {transform_indices = @transform_11, window_bounds = array<i64: 1, 1, 32>}, {transform_indices = @transform_12, window_bounds = array<i64: 1, 32, 32>}, {transform_indices = @transform_13, window_bounds = array<i64: 1, 1, 32>}, {transform_indices = @transform_14, window_bounds = array<i64: 1, 32, 32>}, {transform_indices = @transform_15, window_bounds = array<i64: 1, 1, 32>}, {transform_indices = @transform_16, window_bounds = array<i64: 1, 32, 32>}, {transform_indices = @transform_17, window_bounds = array<i64: 1, 1, 32>}, {transform_indices = @transform_18, window_bounds = array<i64: 1, 32, 32>}, {transform_indices = @transform_19, window_bounds = array<i64: 1, 1, 32>}, {transform_indices = @transform_20, window_bounds = array<i64: 1, 1, 32>}, {transform_indices = @transform_21, window_bounds = array<i64: 1, 1, 32>}, {transform_indices = @transform_22, window_bounds = array<i64: 1, 32, 64>}, {transform_indices = @transform_23, window_bounds = array<i64: 1, 1, 64>}, {transform_indices = @transform_24, window_bounds = array<i64: 1, 64, 32>}, {transform_indices = @transform_25, window_bounds = array<i64: 1, 1, 32>}, {transform_indices = @transform_26, window_bounds = array<i64: 1, 1, 32>}, {transform_indices = @transform_27, window_bounds = array<i64: 1, 1, 32>}, {transform_indices = @transform_28, window_bounds = array<i64: 1, 16, 32>}]} {
    %c0_i32 = arith.constant 0 : i32
    %0 = arith.cmpi eq, %arg1, %c0_i32 : i32
    %1 = arith.extui %0 : i1 to i32
    %c0_i32_0 = arith.constant 0 : i32
    %2 = arith.cmpi ne, %1, %c0_i32_0 : i32
    scf.if %2 {
      %c0_144 = arith.constant 0 : index
      %c0_145 = arith.constant 0 : index
      %c0_146 = arith.constant 0 : index
      %325 = vector.load %arg2[%c0_144, %c0_145, %c0_146] : memref<1x16x32xf32, #tpu.memory_space<vmem>>, vector<1x16x32xf32>
      %326 = vector.shape_cast %325 : vector<1x16x32xf32> to vector<16x32xf32>
      %c0_147 = arith.constant 0 : index
      %c0_148 = arith.constant 0 : index
      %c0_149 = arith.constant 0 : index
      %327 = vector.load %arg30[%c0_147, %c0_148, %c0_149] : memref<1x16x32xf32, #tpu.memory_space<vmem>>, vector<1x16x32xf32>
      %328 = vector.shape_cast %327 : vector<1x16x32xf32> to vector<16x32xf32>
      %329 = vector.shape_cast %326 : vector<16x32xf32> to vector<1x16x32xf32>
      tpu.vector_store %arg30[%c0_147, %c0_148, %c0_149], %329 {strides = array<i32>} : memref<1x16x32xf32, #tpu.memory_space<vmem>>, vector<1x16x32xf32>,
    } else {
    }
    %c0 = arith.constant 0 : index
    %c0_1 = arith.constant 0 : index
    %c0_2 = arith.constant 0 : index
    %3 = vector.load %arg30[%c0, %c0_1, %c0_2] : memref<1x16x32xf32, #tpu.memory_space<vmem>>, vector<1x16x32xf32>
    %4 = vector.shape_cast %3 : vector<1x16x32xf32> to vector<16x32xf32>
    %c0_3 = arith.constant 0 : index
    %c0_4 = arith.constant 0 : index
    %c0_5 = arith.constant 0 : index
    %5 = vector.load %arg3[%c0_3, %c0_4, %c0_5] : memref<1x16x32xf32, #tpu.memory_space<vmem>>, vector<1x16x32xf32>
    %6 = vector.shape_cast %5 : vector<1x16x32xf32> to vector<16x32xf32>
    %7 = arith.truncf %4 : vector<16x32xf32> to vector<16x32xbf16>
    %8 = arith.truncf %4 : vector<16x32xf32> to vector<16x32xbf16>
    %c0_6 = arith.constant 0 : index
    %c0_7 = arith.constant 0 : index
    %c0_8 = arith.constant 0 : index
    %9 = vector.load %arg4[%c0_6, %c0_7, %c0_8] : memref<1x32x32xbf16, #tpu.memory_space<vmem>>, vector<1x32x32xbf16>
    %10 = vector.shape_cast %9 : vector<1x32x32xbf16> to vector<32x32xbf16>
    %cst = arith.constant dense<0.000000e+00> : vector<16x32xf32>
    %11 = tpu.matmul %7, %10, %cst {dimension_numbers = #tpu.dot_dimension_numbers<[1], [0], [0], [1], [0, 0, 1, 1], [], []>} : vector<16x32xbf16>, vector<32x32xbf16>, vector<16x32xf32> -> vector<16x32xf32>
    %c0_9 = arith.constant 0 : index
    %c0_10 = arith.constant 0 : index
    %c0_11 = arith.constant 0 : index
    %12 = vector.load %arg5[%c0_9, %c0_10, %c0_11] : memref<1x1x32xf32, #tpu.memory_space<vmem>>, vector<1x1x32xf32>
    %13 = vector.shape_cast %12 : vector<1x1x32xf32> to vector<1x32xf32>
    %14 = vector.broadcast %13 : vector<1x32xf32> to vector<16x32xf32>
    %15 = arith.addf %11, %14 : vector<16x32xf32>
    %c0_12 = arith.constant 0 : index
    %c0_13 = arith.constant 0 : index
    %c0_14 = arith.constant 0 : index
    %16 = vector.load %arg6[%c0_12, %c0_13, %c0_14] : memref<1x32x32xbf16, #tpu.memory_space<vmem>>, vector<1x32x32xbf16>
    %17 = vector.shape_cast %16 : vector<1x32x32xbf16> to vector<32x32xbf16>
    %cst_15 = arith.constant dense<0.000000e+00> : vector<16x32xf32>
    %18 = tpu.matmul %8, %17, %cst_15 {dimension_numbers = #tpu.dot_dimension_numbers<[1], [0], [0], [1], [0, 0, 1, 1], [], []>} : vector<16x32xbf16>, vector<32x32xbf16>, vector<16x32xf32> -> vector<16x32xf32>
    %c0_16 = arith.constant 0 : index
    %c0_17 = arith.constant 0 : index
    %c0_18 = arith.constant 0 : index
    %19 = vector.load %arg7[%c0_16, %c0_17, %c0_18] : memref<1x1x32xf32, #tpu.memory_space<vmem>>, vector<1x1x32xf32>
    %20 = vector.shape_cast %19 : vector<1x1x32xf32> to vector<1x32xf32>
    %21 = vector.broadcast %20 : vector<1x32xf32> to vector<16x32xf32>
    %22 = arith.addf %18, %21 : vector<16x32xf32>
    %c0_19 = arith.constant 0 : index
    %c0_20 = arith.constant 0 : index
    %c0_21 = arith.constant 0 : index
    %23 = vector.load %arg8[%c0_19, %c0_20, %c0_21] : memref<1x32x32xbf16, #tpu.memory_space<vmem>>, vector<1x32x32xbf16>
    %24 = vector.shape_cast %23 : vector<1x32x32xbf16> to vector<32x32xbf16>
    %cst_22 = arith.constant dense<0.000000e+00> : vector<16x32xf32>
    %25 = tpu.matmul %8, %24, %cst_22 {dimension_numbers = #tpu.dot_dimension_numbers<[1], [0], [0], [1], [0, 0, 1, 1], [], []>} : vector<16x32xbf16>, vector<32x32xbf16>, vector<16x32xf32> -> vector<16x32xf32>
    %c0_23 = arith.constant 0 : index
    %c0_24 = arith.constant 0 : index
    %c0_25 = arith.constant 0 : index
    %26 = vector.load %arg9[%c0_23, %c0_24, %c0_25] : memref<1x1x32xf32, #tpu.memory_space<vmem>>, vector<1x1x32xf32>
    %27 = vector.shape_cast %26 : vector<1x1x32xf32> to vector<1x32xf32>
    %28 = vector.broadcast %27 : vector<1x32xf32> to vector<16x32xf32>
    %29 = arith.addf %25, %28 : vector<16x32xf32>
    %30 = vector.extract_strided_slice %15 {offsets = [0, 0], sizes = [16, 8], strides = [1, 1]} : vector<16x32xf32> to vector<16x8xf32>
    %31 = arith.truncf %30 : vector<16x8xf32> to vector<16x8xbf16>
    %32 = vector.extract_strided_slice %22 {offsets = [0, 0], sizes = [16, 8], strides = [1, 1]} : vector<16x32xf32> to vector<16x8xf32>
    %33 = arith.truncf %32 : vector<16x8xf32> to vector<16x8xbf16>
    %34 = vector.extract_strided_slice %29 {offsets = [0, 0], sizes = [16, 8], strides = [1, 1]} : vector<16x32xf32> to vector<16x8xf32>
    %35 = arith.truncf %34 : vector<16x8xf32> to vector<16x8xbf16>
    %cst_26 = arith.constant dense<0.000000e+00> : vector<16x16xf32>
    %36 = tpu.matmul %31, %33, %cst_26 {dimension_numbers = #tpu.dot_dimension_numbers<[1], [1], [0], [0], [0, 0, 1, 0], [], []>} : vector<16x8xbf16>, vector<16x8xbf16>, vector<16x16xf32> -> vector<16x16xf32>
    %cst_27 = arith.constant dense<0xFF800000> : vector<16xf32>
    %37 = vector.multi_reduction <maximumf>, %36, %cst_27 [1] : vector<16x16xf32> to vector<16xf32>
    %38 = vector.shape_cast %37 : vector<16xf32> to vector<16x1xf32>
    %39 = vector.broadcast %38 : vector<16x1xf32> to vector<16x16xf32>
    %40 = arith.subf %36, %39 : vector<16x16xf32>
    %41 = math.exp %40 : vector<16x16xf32>
    %cst_28 = arith.constant dense<0.000000e+00> : vector<16xf32>
    %42 = vector.multi_reduction <add>, %41, %cst_28 [1] : vector<16x16xf32> to vector<16xf32>
    %43 = vector.shape_cast %42 : vector<16xf32> to vector<16x1xf32>
    %44 = arith.truncf %41 : vector<16x16xf32> to vector<16x16xbf16>
    %cst_29 = arith.constant dense<0.000000e+00> : vector<16x8xf32>
    %45 = tpu.matmul %44, %35, %cst_29 {dimension_numbers = #tpu.dot_dimension_numbers<[1], [0], [0], [1], [0, 0, 1, 1], [], []>} : vector<16x16xbf16>, vector<16x8xbf16>, vector<16x8xf32> -> vector<16x8xf32>
    %46 = tpu.reciprocal %43 {approx = true} : vector<16x1xf32> -> vector<16x1xf32>
    %47 = vector.broadcast %46 : vector<16x1xf32> to vector<16x8xf32>
    %48 = arith.mulf %45, %47 : vector<16x8xf32>
    %49 = vector.extract_strided_slice %15 {offsets = [0, 8], sizes = [16, 8], strides = [1, 1]} : vector<16x32xf32> to vector<16x8xf32>
    %50 = arith.truncf %49 : vector<16x8xf32> to vector<16x8xbf16>
    %51 = vector.extract_strided_slice %22 {offsets = [0, 8], sizes = [16, 8], strides = [1, 1]} : vector<16x32xf32> to vector<16x8xf32>
    %52 = arith.truncf %51 : vector<16x8xf32> to vector<16x8xbf16>
    %53 = vector.extract_strided_slice %29 {offsets = [0, 8], sizes = [16, 8], strides = [1, 1]} : vector<16x32xf32> to vector<16x8xf32>
    %54 = arith.truncf %53 : vector<16x8xf32> to vector<16x8xbf16>
    %cst_30 = arith.constant dense<0.000000e+00> : vector<16x16xf32>
    %55 = tpu.matmul %50, %52, %cst_30 {dimension_numbers = #tpu.dot_dimension_numbers<[1], [1], [0], [0], [0, 0, 1, 0], [], []>} : vector<16x8xbf16>, vector<16x8xbf16>, vector<16x16xf32> -> vector<16x16xf32>
    %cst_31 = arith.constant dense<0xFF800000> : vector<16xf32>
    %56 = vector.multi_reduction <maximumf>, %55, %cst_31 [1] : vector<16x16xf32> to vector<16xf32>
    %57 = vector.shape_cast %56 : vector<16xf32> to vector<16x1xf32>
    %58 = vector.broadcast %57 : vector<16x1xf32> to vector<16x16xf32>
    %59 = arith.subf %55, %58 : vector<16x16xf32>
    %60 = math.exp %59 : vector<16x16xf32>
    %cst_32 = arith.constant dense<0.000000e+00> : vector<16xf32>
    %61 = vector.multi_reduction <add>, %60, %cst_32 [1] : vector<16x16xf32> to vector<16xf32>
    %62 = vector.shape_cast %61 : vector<16xf32> to vector<16x1xf32>
    %63 = arith.truncf %60 : vector<16x16xf32> to vector<16x16xbf16>
    %cst_33 = arith.constant dense<0.000000e+00> : vector<16x8xf32>
    %64 = tpu.matmul %63, %54, %cst_33 {dimension_numbers = #tpu.dot_dimension_numbers<[1], [0], [0], [1], [0, 0, 1, 1], [], []>} : vector<16x16xbf16>, vector<16x8xbf16>, vector<16x8xf32> -> vector<16x8xf32>
    %65 = tpu.reciprocal %62 {approx = true} : vector<16x1xf32> -> vector<16x1xf32>
    %66 = vector.broadcast %65 : vector<16x1xf32> to vector<16x8xf32>
    %67 = arith.mulf %64, %66 : vector<16x8xf32>
    %68 = vector.extract_strided_slice %15 {offsets = [0, 16], sizes = [16, 8], strides = [1, 1]} : vector<16x32xf32> to vector<16x8xf32>
    %69 = arith.truncf %68 : vector<16x8xf32> to vector<16x8xbf16>
    %70 = vector.extract_strided_slice %22 {offsets = [0, 16], sizes = [16, 8], strides = [1, 1]} : vector<16x32xf32> to vector<16x8xf32>
    %71 = arith.truncf %70 : vector<16x8xf32> to vector<16x8xbf16>
    %72 = vector.extract_strided_slice %29 {offsets = [0, 16], sizes = [16, 8], strides = [1, 1]} : vector<16x32xf32> to vector<16x8xf32>
    %73 = arith.truncf %72 : vector<16x8xf32> to vector<16x8xbf16>
    %cst_34 = arith.constant dense<0.000000e+00> : vector<16x16xf32>
    %74 = tpu.matmul %69, %71, %cst_34 {dimension_numbers = #tpu.dot_dimension_numbers<[1], [1], [0], [0], [0, 0, 1, 0], [], []>} : vector<16x8xbf16>, vector<16x8xbf16>, vector<16x16xf32> -> vector<16x16xf32>
    %cst_35 = arith.constant dense<0xFF800000> : vector<16xf32>
    %75 = vector.multi_reduction <maximumf>, %74, %cst_35 [1] : vector<16x16xf32> to vector<16xf32>
    %76 = vector.shape_cast %75 : vector<16xf32> to vector<16x1xf32>
    %77 = vector.broadcast %76 : vector<16x1xf32> to vector<16x16xf32>
    %78 = arith.subf %74, %77 : vector<16x16xf32>
    %79 = math.exp %78 : vector<16x16xf32>
    %cst_36 = arith.constant dense<0.000000e+00> : vector<16xf32>
    %80 = vector.multi_reduction <add>, %79, %cst_36 [1] : vector<16x16xf32> to vector<16xf32>
    %81 = vector.shape_cast %80 : vector<16xf32> to vector<16x1xf32>
    %82 = arith.truncf %79 : vector<16x16xf32> to vector<16x16xbf16>
    %cst_37 = arith.constant dense<0.000000e+00> : vector<16x8xf32>
    %83 = tpu.matmul %82, %73, %cst_37 {dimension_numbers = #tpu.dot_dimension_numbers<[1], [0], [0], [1], [0, 0, 1, 1], [], []>} : vector<16x16xbf16>, vector<16x8xbf16>, vector<16x8xf32> -> vector<16x8xf32>
    %84 = tpu.reciprocal %81 {approx = true} : vector<16x1xf32> -> vector<16x1xf32>
    %85 = vector.broadcast %84 : vector<16x1xf32> to vector<16x8xf32>
    %86 = arith.mulf %83, %85 : vector<16x8xf32>
    %87 = vector.extract_strided_slice %15 {offsets = [0, 24], sizes = [16, 8], strides = [1, 1]} : vector<16x32xf32> to vector<16x8xf32>
    %88 = arith.truncf %87 : vector<16x8xf32> to vector<16x8xbf16>
    %89 = vector.extract_strided_slice %22 {offsets = [0, 24], sizes = [16, 8], strides = [1, 1]} : vector<16x32xf32> to vector<16x8xf32>
    %90 = arith.truncf %89 : vector<16x8xf32> to vector<16x8xbf16>
    %91 = vector.extract_strided_slice %29 {offsets = [0, 24], sizes = [16, 8], strides = [1, 1]} : vector<16x32xf32> to vector<16x8xf32>
    %92 = arith.truncf %91 : vector<16x8xf32> to vector<16x8xbf16>
    %cst_38 = arith.constant dense<0.000000e+00> : vector<16x16xf32>
    %93 = tpu.matmul %88, %90, %cst_38 {dimension_numbers = #tpu.dot_dimension_numbers<[1], [1], [0], [0], [0, 0, 1, 0], [], []>} : vector<16x8xbf16>, vector<16x8xbf16>, vector<16x16xf32> -> vector<16x16xf32>
    %cst_39 = arith.constant dense<0xFF800000> : vector<16xf32>
    %94 = vector.multi_reduction <maximumf>, %93, %cst_39 [1] : vector<16x16xf32> to vector<16xf32>
    %95 = vector.shape_cast %94 : vector<16xf32> to vector<16x1xf32>
    %96 = vector.broadcast %95 : vector<16x1xf32> to vector<16x16xf32>
    %97 = arith.subf %93, %96 : vector<16x16xf32>
    %98 = math.exp %97 : vector<16x16xf32>
    %cst_40 = arith.constant dense<0.000000e+00> : vector<16xf32>
    %99 = vector.multi_reduction <add>, %98, %cst_40 [1] : vector<16x16xf32> to vector<16xf32>
    %100 = vector.shape_cast %99 : vector<16xf32> to vector<16x1xf32>
    %101 = arith.truncf %98 : vector<16x16xf32> to vector<16x16xbf16>
    %cst_41 = arith.constant dense<0.000000e+00> : vector<16x8xf32>
    %102 = tpu.matmul %101, %92, %cst_41 {dimension_numbers = #tpu.dot_dimension_numbers<[1], [0], [0], [1], [0, 0, 1, 1], [], []>} : vector<16x16xbf16>, vector<16x8xbf16>, vector<16x8xf32> -> vector<16x8xf32>
    %103 = tpu.reciprocal %100 {approx = true} : vector<16x1xf32> -> vector<16x1xf32>
    %104 = vector.broadcast %103 : vector<16x1xf32> to vector<16x8xf32>
    %105 = arith.mulf %102, %104 : vector<16x8xf32>
    %106 = tpu.concatenate %48, %67, %86, %105 in 1 : vector<16x8xf32>, vector<16x8xf32>, vector<16x8xf32>, vector<16x8xf32> -> vector<16x32xf32>
    %107 = arith.truncf %106 : vector<16x32xf32> to vector<16x32xbf16>
    %c0_42 = arith.constant 0 : index
    %c0_43 = arith.constant 0 : index
    %c0_44 = arith.constant 0 : index
    %108 = vector.load %arg10[%c0_42, %c0_43, %c0_44] : memref<1x32x32xbf16, #tpu.memory_space<vmem>>, vector<1x32x32xbf16>
    %109 = vector.shape_cast %108 : vector<1x32x32xbf16> to vector<32x32xbf16>
    %cst_45 = arith.constant dense<0.000000e+00> : vector<16x32xf32>
    %110 = tpu.matmul %107, %109, %cst_45 {dimension_numbers = #tpu.dot_dimension_numbers<[1], [0], [0], [1], [0, 0, 1, 1], [], []>} : vector<16x32xbf16>, vector<32x32xbf16>, vector<16x32xf32> -> vector<16x32xf32>
    %c0_46 = arith.constant 0 : index
    %c0_47 = arith.constant 0 : index
    %c0_48 = arith.constant 0 : index
    %111 = vector.load %arg11[%c0_46, %c0_47, %c0_48] : memref<1x1x32xf32, #tpu.memory_space<vmem>>, vector<1x1x32xf32>
    %112 = vector.shape_cast %111 : vector<1x1x32xf32> to vector<1x32xf32>
    %113 = vector.broadcast %112 : vector<1x32xf32> to vector<16x32xf32>
    %114 = arith.addf %110, %113 : vector<16x32xf32>
    %115 = arith.addf %4, %114 : vector<16x32xf32>
    %c0_49 = arith.constant 0 : index
    %c0_50 = arith.constant 0 : index
    %c0_51 = arith.constant 0 : index
    %116 = vector.load %arg12[%c0_49, %c0_50, %c0_51] : memref<1x1x32xf32, #tpu.memory_space<vmem>>, vector<1x1x32xf32>
    %117 = vector.shape_cast %116 : vector<1x1x32xf32> to vector<1x32xf32>
    %c0_52 = arith.constant 0 : index
    %c0_53 = arith.constant 0 : index
    %c0_54 = arith.constant 0 : index
    %118 = vector.load %arg13[%c0_52, %c0_53, %c0_54] : memref<1x1x32xf32, #tpu.memory_space<vmem>>, vector<1x1x32xf32>
    %119 = vector.shape_cast %118 : vector<1x1x32xf32> to vector<1x32xf32>
    %cst_55 = arith.constant dense<0.000000e+00> : vector<16xf32>
    %120 = vector.multi_reduction <add>, %115, %cst_55 [1] : vector<16x32xf32> to vector<16xf32>
    %121 = vector.shape_cast %120 : vector<16xf32> to vector<16x1xf32>
    %cst_56 = arith.constant 3.200000e+01 : f32
    %122 = vector.broadcast %cst_56 : f32 to vector<16x1xf32>
    %123 = arith.divf %121, %122 : vector<16x1xf32>
    %124 = vector.broadcast %123 : vector<16x1xf32> to vector<16x32xf32>
    %125 = arith.subf %115, %124 : vector<16x32xf32>
    %126 = arith.mulf %125, %125 : vector<16x32xf32>
    %cst_57 = arith.constant dense<0.000000e+00> : vector<16xf32>
    %127 = vector.multi_reduction <add>, %126, %cst_57 [1] : vector<16x32xf32> to vector<16xf32>
    %128 = vector.shape_cast %127 : vector<16xf32> to vector<16x1xf32>
    %cst_58 = arith.constant 3.200000e+01 : f32
    %129 = vector.broadcast %cst_58 : f32 to vector<16x1xf32>
    %130 = arith.divf %128, %129 : vector<16x1xf32>
    %131 = vector.broadcast %123 : vector<16x1xf32> to vector<16x32xf32>
    %132 = arith.subf %115, %131 : vector<16x32xf32>
    %cst_59 = arith.constant 9.99999974E-6 : f32
    %133 = vector.broadcast %cst_59 : f32 to vector<16x1xf32>
    %134 = arith.addf %130, %133 : vector<16x1xf32>
    %135 = math.rsqrt %134 : vector<16x1xf32>
    %136 = vector.broadcast %135 : vector<16x1xf32> to vector<16x32xf32>
    %137 = arith.mulf %132, %136 : vector<16x32xf32>
    %138 = vector.broadcast %117 : vector<1x32xf32> to vector<16x32xf32>
    %139 = arith.mulf %137, %138 : vector<16x32xf32>
    %140 = vector.broadcast %119 : vector<1x32xf32> to vector<16x32xf32>
    %141 = arith.addf %139, %140 : vector<16x32xf32>
    %142 = arith.truncf %141 : vector<16x32xf32> to vector<16x32xbf16>
    %143 = arith.truncf %6 : vector<16x32xf32> to vector<16x32xbf16>
    %c0_60 = arith.constant 0 : index
    %c0_61 = arith.constant 0 : index
    %c0_62 = arith.constant 0 : index
    %144 = vector.load %arg14[%c0_60, %c0_61, %c0_62] : memref<1x32x32xbf16, #tpu.memory_space<vmem>>, vector<1x32x32xbf16>
    %145 = vector.shape_cast %144 : vector<1x32x32xbf16> to vector<32x32xbf16>
    %cst_63 = arith.constant dense<0.000000e+00> : vector<16x32xf32>
    %146 = tpu.matmul %142, %145, %cst_63 {dimension_numbers = #tpu.dot_dimension_numbers<[1], [0], [0], [1], [0, 0, 1, 1], [], []>} : vector<16x32xbf16>, vector<32x32xbf16>, vector<16x32xf32> -> vector<16x32xf32>
    %c0_64 = arith.constant 0 : index
    %c0_65 = arith.constant 0 : index
    %c0_66 = arith.constant 0 : index
    %147 = vector.load %arg15[%c0_64, %c0_65, %c0_66] : memref<1x1x32xf32, #tpu.memory_space<vmem>>, vector<1x1x32xf32>
    %148 = vector.shape_cast %147 : vector<1x1x32xf32> to vector<1x32xf32>
    %149 = vector.broadcast %148 : vector<1x32xf32> to vector<16x32xf32>
    %150 = arith.addf %146, %149 : vector<16x32xf32>
    %c0_67 = arith.constant 0 : index
    %c0_68 = arith.constant 0 : index
    %c0_69 = arith.constant 0 : index
    %151 = vector.load %arg16[%c0_67, %c0_68, %c0_69] : memref<1x32x32xbf16, #tpu.memory_space<vmem>>, vector<1x32x32xbf16>
    %152 = vector.shape_cast %151 : vector<1x32x32xbf16> to vector<32x32xbf16>
    %cst_70 = arith.constant dense<0.000000e+00> : vector<16x32xf32>
    %153 = tpu.matmul %143, %152, %cst_70 {dimension_numbers = #tpu.dot_dimension_numbers<[1], [0], [0], [1], [0, 0, 1, 1], [], []>} : vector<16x32xbf16>, vector<32x32xbf16>, vector<16x32xf32> -> vector<16x32xf32>
    %c0_71 = arith.constant 0 : index
    %c0_72 = arith.constant 0 : index
    %c0_73 = arith.constant 0 : index
    %154 = vector.load %arg17[%c0_71, %c0_72, %c0_73] : memref<1x1x32xf32, #tpu.memory_space<vmem>>, vector<1x1x32xf32>
    %155 = vector.shape_cast %154 : vector<1x1x32xf32> to vector<1x32xf32>
    %156 = vector.broadcast %155 : vector<1x32xf32> to vector<16x32xf32>
    %157 = arith.addf %153, %156 : vector<16x32xf32>
    %c0_74 = arith.constant 0 : index
    %c0_75 = arith.constant 0 : index
    %c0_76 = arith.constant 0 : index
    %158 = vector.load %arg18[%c0_74, %c0_75, %c0_76] : memref<1x32x32xbf16, #tpu.memory_space<vmem>>, vector<1x32x32xbf16>
    %159 = vector.shape_cast %158 : vector<1x32x32xbf16> to vector<32x32xbf16>
    %cst_77 = arith.constant dense<0.000000e+00> : vector<16x32xf32>
    %160 = tpu.matmul %143, %159, %cst_77 {dimension_numbers = #tpu.dot_dimension_numbers<[1], [0], [0], [1], [0, 0, 1, 1], [], []>} : vector<16x32xbf16>, vector<32x32xbf16>, vector<16x32xf32> -> vector<16x32xf32>
    %c0_78 = arith.constant 0 : index
    %c0_79 = arith.constant 0 : index
    %c0_80 = arith.constant 0 : index
    %161 = vector.load %arg19[%c0_78, %c0_79, %c0_80] : memref<1x1x32xf32, #tpu.memory_space<vmem>>, vector<1x1x32xf32>
    %162 = vector.shape_cast %161 : vector<1x1x32xf32> to vector<1x32xf32>
    %163 = vector.broadcast %162 : vector<1x32xf32> to vector<16x32xf32>
    %164 = arith.addf %160, %163 : vector<16x32xf32>
    %165 = vector.extract_strided_slice %150 {offsets = [0, 0], sizes = [16, 8], strides = [1, 1]} : vector<16x32xf32> to vector<16x8xf32>
    %166 = arith.truncf %165 : vector<16x8xf32> to vector<16x8xbf16>
    %167 = vector.extract_strided_slice %157 {offsets = [0, 0], sizes = [16, 8], strides = [1, 1]} : vector<16x32xf32> to vector<16x8xf32>
    %168 = arith.truncf %167 : vector<16x8xf32> to vector<16x8xbf16>
    %169 = vector.extract_strided_slice %164 {offsets = [0, 0], sizes = [16, 8], strides = [1, 1]} : vector<16x32xf32> to vector<16x8xf32>
    %170 = arith.truncf %169 : vector<16x8xf32> to vector<16x8xbf16>
    %cst_81 = arith.constant dense<0.000000e+00> : vector<16x16xf32>
    %171 = tpu.matmul %166, %168, %cst_81 {dimension_numbers = #tpu.dot_dimension_numbers<[1], [1], [0], [0], [0, 0, 1, 0], [], []>} : vector<16x8xbf16>, vector<16x8xbf16>, vector<16x16xf32> -> vector<16x16xf32>
    %cst_82 = arith.constant dense<0xFF800000> : vector<16xf32>
    %172 = vector.multi_reduction <maximumf>, %171, %cst_82 [1] : vector<16x16xf32> to vector<16xf32>
    %173 = vector.shape_cast %172 : vector<16xf32> to vector<16x1xf32>
    %174 = vector.broadcast %173 : vector<16x1xf32> to vector<16x16xf32>
    %175 = arith.subf %171, %174 : vector<16x16xf32>
    %176 = math.exp %175 : vector<16x16xf32>
    %cst_83 = arith.constant dense<0.000000e+00> : vector<16xf32>
    %177 = vector.multi_reduction <add>, %176, %cst_83 [1] : vector<16x16xf32> to vector<16xf32>
    %178 = vector.shape_cast %177 : vector<16xf32> to vector<16x1xf32>
    %179 = arith.truncf %176 : vector<16x16xf32> to vector<16x16xbf16>
    %cst_84 = arith.constant dense<0.000000e+00> : vector<16x8xf32>
    %180 = tpu.matmul %179, %170, %cst_84 {dimension_numbers = #tpu.dot_dimension_numbers<[1], [0], [0], [1], [0, 0, 1, 1], [], []>} : vector<16x16xbf16>, vector<16x8xbf16>, vector<16x8xf32> -> vector<16x8xf32>
    %181 = tpu.reciprocal %178 {approx = true} : vector<16x1xf32> -> vector<16x1xf32>
    %182 = vector.broadcast %181 : vector<16x1xf32> to vector<16x8xf32>
    %183 = arith.mulf %180, %182 : vector<16x8xf32>
    %184 = vector.extract_strided_slice %150 {offsets = [0, 8], sizes = [16, 8], strides = [1, 1]} : vector<16x32xf32> to vector<16x8xf32>
    %185 = arith.truncf %184 : vector<16x8xf32> to vector<16x8xbf16>
    %186 = vector.extract_strided_slice %157 {offsets = [0, 8], sizes = [16, 8], strides = [1, 1]} : vector<16x32xf32> to vector<16x8xf32>
    %187 = arith.truncf %186 : vector<16x8xf32> to vector<16x8xbf16>
    %188 = vector.extract_strided_slice %164 {offsets = [0, 8], sizes = [16, 8], strides = [1, 1]} : vector<16x32xf32> to vector<16x8xf32>
    %189 = arith.truncf %188 : vector<16x8xf32> to vector<16x8xbf16>
    %cst_85 = arith.constant dense<0.000000e+00> : vector<16x16xf32>
    %190 = tpu.matmul %185, %187, %cst_85 {dimension_numbers = #tpu.dot_dimension_numbers<[1], [1], [0], [0], [0, 0, 1, 0], [], []>} : vector<16x8xbf16>, vector<16x8xbf16>, vector<16x16xf32> -> vector<16x16xf32>
    %cst_86 = arith.constant dense<0xFF800000> : vector<16xf32>
    %191 = vector.multi_reduction <maximumf>, %190, %cst_86 [1] : vector<16x16xf32> to vector<16xf32>
    %192 = vector.shape_cast %191 : vector<16xf32> to vector<16x1xf32>
    %193 = vector.broadcast %192 : vector<16x1xf32> to vector<16x16xf32>
    %194 = arith.subf %190, %193 : vector<16x16xf32>
    %195 = math.exp %194 : vector<16x16xf32>
    %cst_87 = arith.constant dense<0.000000e+00> : vector<16xf32>
    %196 = vector.multi_reduction <add>, %195, %cst_87 [1] : vector<16x16xf32> to vector<16xf32>
    %197 = vector.shape_cast %196 : vector<16xf32> to vector<16x1xf32>
    %198 = arith.truncf %195 : vector<16x16xf32> to vector<16x16xbf16>
    %cst_88 = arith.constant dense<0.000000e+00> : vector<16x8xf32>
    %199 = tpu.matmul %198, %189, %cst_88 {dimension_numbers = #tpu.dot_dimension_numbers<[1], [0], [0], [1], [0, 0, 1, 1], [], []>} : vector<16x16xbf16>, vector<16x8xbf16>, vector<16x8xf32> -> vector<16x8xf32>
    %200 = tpu.reciprocal %197 {approx = true} : vector<16x1xf32> -> vector<16x1xf32>
    %201 = vector.broadcast %200 : vector<16x1xf32> to vector<16x8xf32>
    %202 = arith.mulf %199, %201 : vector<16x8xf32>
    %203 = vector.extract_strided_slice %150 {offsets = [0, 16], sizes = [16, 8], strides = [1, 1]} : vector<16x32xf32> to vector<16x8xf32>
    %204 = arith.truncf %203 : vector<16x8xf32> to vector<16x8xbf16>
    %205 = vector.extract_strided_slice %157 {offsets = [0, 16], sizes = [16, 8], strides = [1, 1]} : vector<16x32xf32> to vector<16x8xf32>
    %206 = arith.truncf %205 : vector<16x8xf32> to vector<16x8xbf16>
    %207 = vector.extract_strided_slice %164 {offsets = [0, 16], sizes = [16, 8], strides = [1, 1]} : vector<16x32xf32> to vector<16x8xf32>
    %208 = arith.truncf %207 : vector<16x8xf32> to vector<16x8xbf16>
    %cst_89 = arith.constant dense<0.000000e+00> : vector<16x16xf32>
    %209 = tpu.matmul %204, %206, %cst_89 {dimension_numbers = #tpu.dot_dimension_numbers<[1], [1], [0], [0], [0, 0, 1, 0], [], []>} : vector<16x8xbf16>, vector<16x8xbf16>, vector<16x16xf32> -> vector<16x16xf32>
    %cst_90 = arith.constant dense<0xFF800000> : vector<16xf32>
    %210 = vector.multi_reduction <maximumf>, %209, %cst_90 [1] : vector<16x16xf32> to vector<16xf32>
    %211 = vector.shape_cast %210 : vector<16xf32> to vector<16x1xf32>
    %212 = vector.broadcast %211 : vector<16x1xf32> to vector<16x16xf32>
    %213 = arith.subf %209, %212 : vector<16x16xf32>
    %214 = math.exp %213 : vector<16x16xf32>
    %cst_91 = arith.constant dense<0.000000e+00> : vector<16xf32>
    %215 = vector.multi_reduction <add>, %214, %cst_91 [1] : vector<16x16xf32> to vector<16xf32>
    %216 = vector.shape_cast %215 : vector<16xf32> to vector<16x1xf32>
    %217 = arith.truncf %214 : vector<16x16xf32> to vector<16x16xbf16>
    %cst_92 = arith.constant dense<0.000000e+00> : vector<16x8xf32>
    %218 = tpu.matmul %217, %208, %cst_92 {dimension_numbers = #tpu.dot_dimension_numbers<[1], [0], [0], [1], [0, 0, 1, 1], [], []>} : vector<16x16xbf16>, vector<16x8xbf16>, vector<16x8xf32> -> vector<16x8xf32>
    %219 = tpu.reciprocal %216 {approx = true} : vector<16x1xf32> -> vector<16x1xf32>
    %220 = vector.broadcast %219 : vector<16x1xf32> to vector<16x8xf32>
    %221 = arith.mulf %218, %220 : vector<16x8xf32>
    %222 = vector.extract_strided_slice %150 {offsets = [0, 24], sizes = [16, 8], strides = [1, 1]} : vector<16x32xf32> to vector<16x8xf32>
    %223 = arith.truncf %222 : vector<16x8xf32> to vector<16x8xbf16>
    %224 = vector.extract_strided_slice %157 {offsets = [0, 24], sizes = [16, 8], strides = [1, 1]} : vector<16x32xf32> to vector<16x8xf32>
    %225 = arith.truncf %224 : vector<16x8xf32> to vector<16x8xbf16>
    %226 = vector.extract_strided_slice %164 {offsets = [0, 24], sizes = [16, 8], strides = [1, 1]} : vector<16x32xf32> to vector<16x8xf32>
    %227 = arith.truncf %226 : vector<16x8xf32> to vector<16x8xbf16>
    %cst_93 = arith.constant dense<0.000000e+00> : vector<16x16xf32>
    %228 = tpu.matmul %223, %225, %cst_93 {dimension_numbers = #tpu.dot_dimension_numbers<[1], [1], [0], [0], [0, 0, 1, 0], [], []>} : vector<16x8xbf16>, vector<16x8xbf16>, vector<16x16xf32> -> vector<16x16xf32>
    %cst_94 = arith.constant dense<0xFF800000> : vector<16xf32>
    %229 = vector.multi_reduction <maximumf>, %228, %cst_94 [1] : vector<16x16xf32> to vector<16xf32>
    %230 = vector.shape_cast %229 : vector<16xf32> to vector<16x1xf32>
    %231 = vector.broadcast %230 : vector<16x1xf32> to vector<16x16xf32>
    %232 = arith.subf %228, %231 : vector<16x16xf32>
    %233 = math.exp %232 : vector<16x16xf32>
    %cst_95 = arith.constant dense<0.000000e+00> : vector<16xf32>
    %234 = vector.multi_reduction <add>, %233, %cst_95 [1] : vector<16x16xf32> to vector<16xf32>
    %235 = vector.shape_cast %234 : vector<16xf32> to vector<16x1xf32>
    %236 = arith.truncf %233 : vector<16x16xf32> to vector<16x16xbf16>
    %cst_96 = arith.constant dense<0.000000e+00> : vector<16x8xf32>
    %237 = tpu.matmul %236, %227, %cst_96 {dimension_numbers = #tpu.dot_dimension_numbers<[1], [0], [0], [1], [0, 0, 1, 1], [], []>} : vector<16x16xbf16>, vector<16x8xbf16>, vector<16x8xf32> -> vector<16x8xf32>
    %238 = tpu.reciprocal %235 {approx = true} : vector<16x1xf32> -> vector<16x1xf32>
    %239 = vector.broadcast %238 : vector<16x1xf32> to vector<16x8xf32>
    %240 = arith.mulf %237, %239 : vector<16x8xf32>
    %241 = tpu.concatenate %183, %202, %221, %240 in 1 : vector<16x8xf32>, vector<16x8xf32>, vector<16x8xf32>, vector<16x8xf32> -> vector<16x32xf32>
    %242 = arith.truncf %241 : vector<16x32xf32> to vector<16x32xbf16>
    %c0_97 = arith.constant 0 : index
    %c0_98 = arith.constant 0 : index
    %c0_99 = arith.constant 0 : index
    %243 = vector.load %arg20[%c0_97, %c0_98, %c0_99] : memref<1x32x32xbf16, #tpu.memory_space<vmem>>, vector<1x32x32xbf16>
    %244 = vector.shape_cast %243 : vector<1x32x32xbf16> to vector<32x32xbf16>
    %cst_100 = arith.constant dense<0.000000e+00> : vector<16x32xf32>
    %245 = tpu.matmul %242, %244, %cst_100 {dimension_numbers = #tpu.dot_dimension_numbers<[1], [0], [0], [1], [0, 0, 1, 1], [], []>} : vector<16x32xbf16>, vector<32x32xbf16>, vector<16x32xf32> -> vector<16x32xf32>
    %c0_101 = arith.constant 0 : index
    %c0_102 = arith.constant 0 : index
    %c0_103 = arith.constant 0 : index
    %246 = vector.load %arg21[%c0_101, %c0_102, %c0_103] : memref<1x1x32xf32, #tpu.memory_space<vmem>>, vector<1x1x32xf32>
    %247 = vector.shape_cast %246 : vector<1x1x32xf32> to vector<1x32xf32>
    %248 = vector.broadcast %247 : vector<1x32xf32> to vector<16x32xf32>
    %249 = arith.addf %245, %248 : vector<16x32xf32>
    %250 = arith.addf %141, %249 : vector<16x32xf32>
    %c0_104 = arith.constant 0 : index
    %c0_105 = arith.constant 0 : index
    %c0_106 = arith.constant 0 : index
    %251 = vector.load %arg22[%c0_104, %c0_105, %c0_106] : memref<1x1x32xf32, #tpu.memory_space<vmem>>, vector<1x1x32xf32>
    %252 = vector.shape_cast %251 : vector<1x1x32xf32> to vector<1x32xf32>
    %c0_107 = arith.constant 0 : index
    %c0_108 = arith.constant 0 : index
    %c0_109 = arith.constant 0 : index
    %253 = vector.load %arg23[%c0_107, %c0_108, %c0_109] : memref<1x1x32xf32, #tpu.memory_space<vmem>>, vector<1x1x32xf32>
    %254 = vector.shape_cast %253 : vector<1x1x32xf32> to vector<1x32xf32>
    %cst_110 = arith.constant dense<0.000000e+00> : vector<16xf32>
    %255 = vector.multi_reduction <add>, %250, %cst_110 [1] : vector<16x32xf32> to vector<16xf32>
    %256 = vector.shape_cast %255 : vector<16xf32> to vector<16x1xf32>
    %cst_111 = arith.constant 3.200000e+01 : f32
    %257 = vector.broadcast %cst_111 : f32 to vector<16x1xf32>
    %258 = arith.divf %256, %257 : vector<16x1xf32>
    %259 = vector.broadcast %258 : vector<16x1xf32> to vector<16x32xf32>
    %260 = arith.subf %250, %259 : vector<16x32xf32>
    %261 = arith.mulf %260, %260 : vector<16x32xf32>
    %cst_112 = arith.constant dense<0.000000e+00> : vector<16xf32>
    %262 = vector.multi_reduction <add>, %261, %cst_112 [1] : vector<16x32xf32> to vector<16xf32>
    %263 = vector.shape_cast %262 : vector<16xf32> to vector<16x1xf32>
    %cst_113 = arith.constant 3.200000e+01 : f32
    %264 = vector.broadcast %cst_113 : f32 to vector<16x1xf32>
    %265 = arith.divf %263, %264 : vector<16x1xf32>
    %266 = vector.broadcast %258 : vector<16x1xf32> to vector<16x32xf32>
    %267 = arith.subf %250, %266 : vector<16x32xf32>
    %cst_114 = arith.constant 9.99999974E-6 : f32
    %268 = vector.broadcast %cst_114 : f32 to vector<16x1xf32>
    %269 = arith.addf %265, %268 : vector<16x1xf32>
    %270 = math.rsqrt %269 : vector<16x1xf32>
    %271 = vector.broadcast %270 : vector<16x1xf32> to vector<16x32xf32>
    %272 = arith.mulf %267, %271 : vector<16x32xf32>
    %273 = vector.broadcast %252 : vector<1x32xf32> to vector<16x32xf32>
    %274 = arith.mulf %272, %273 : vector<16x32xf32>
    %275 = vector.broadcast %254 : vector<1x32xf32> to vector<16x32xf32>
    %276 = arith.addf %274, %275 : vector<16x32xf32>
    %277 = arith.truncf %276 : vector<16x32xf32> to vector<16x32xbf16>
    %c0_115 = arith.constant 0 : index
    %c0_116 = arith.constant 0 : index
    %c0_117 = arith.constant 0 : index
    %278 = vector.load %arg24[%c0_115, %c0_116, %c0_117] : memref<1x32x64xbf16, #tpu.memory_space<vmem>>, vector<1x32x64xbf16>
    %279 = vector.shape_cast %278 : vector<1x32x64xbf16> to vector<32x64xbf16>
    %cst_118 = arith.constant dense<0.000000e+00> : vector<16x64xf32>
    %280 = tpu.matmul %277, %279, %cst_118 {dimension_numbers = #tpu.dot_dimension_numbers<[1], [0], [0], [1], [0, 0, 1, 1], [], []>} : vector<16x32xbf16>, vector<32x64xbf16>, vector<16x64xf32> -> vector<16x64xf32>
    %c0_119 = arith.constant 0 : index
    %c0_120 = arith.constant 0 : index
    %c0_121 = arith.constant 0 : index
    %281 = vector.load %arg25[%c0_119, %c0_120, %c0_121] : memref<1x1x64xf32, #tpu.memory_space<vmem>>, vector<1x1x64xf32>
    %282 = vector.shape_cast %281 : vector<1x1x64xf32> to vector<1x64xf32>
    %283 = vector.broadcast %282 : vector<1x64xf32> to vector<16x64xf32>
    %284 = arith.addf %280, %283 : vector<16x64xf32>
    %cst_122 = arith.constant 0.000000e+00 : f32
    %285 = vector.broadcast %cst_122 : f32 to vector<16x64xf32>
    %286 = arith.maximumf %284, %285 : vector<16x64xf32>
    %287 = arith.truncf %286 : vector<16x64xf32> to vector<16x64xbf16>
    %c0_123 = arith.constant 0 : index
    %c0_124 = arith.constant 0 : index
    %c0_125 = arith.constant 0 : index
    %288 = vector.load %arg26[%c0_123, %c0_124, %c0_125] : memref<1x64x32xbf16, #tpu.memory_space<vmem>>, vector<1x64x32xbf16>
    %289 = vector.shape_cast %288 : vector<1x64x32xbf16> to vector<64x32xbf16>
    %cst_126 = arith.constant dense<0.000000e+00> : vector<16x32xf32>
    %290 = tpu.matmul %287, %289, %cst_126 {dimension_numbers = #tpu.dot_dimension_numbers<[1], [0], [0], [1], [0, 0, 1, 1], [], []>} : vector<16x64xbf16>, vector<64x32xbf16>, vector<16x32xf32> -> vector<16x32xf32>
    %c0_127 = arith.constant 0 : index
    %c0_128 = arith.constant 0 : index
    %c0_129 = arith.constant 0 : index
    %291 = vector.load %arg27[%c0_127, %c0_128, %c0_129] : memref<1x1x32xf32, #tpu.memory_space<vmem>>, vector<1x1x32xf32>
    %292 = vector.shape_cast %291 : vector<1x1x32xf32> to vector<1x32xf32>
    %293 = vector.broadcast %292 : vector<1x32xf32> to vector<16x32xf32>
    %294 = arith.addf %290, %293 : vector<16x32xf32>
    %295 = arith.addf %276, %294 : vector<16x32xf32>
    %c0_130 = arith.constant 0 : index
    %c0_131 = arith.constant 0 : index
    %c0_132 = arith.constant 0 : index
    %296 = vector.load %arg28[%c0_130, %c0_131, %c0_132] : memref<1x1x32xf32, #tpu.memory_space<vmem>>, vector<1x1x32xf32>
    %297 = vector.shape_cast %296 : vector<1x1x32xf32> to vector<1x32xf32>
    %c0_133 = arith.constant 0 : index
    %c0_134 = arith.constant 0 : index
    %c0_135 = arith.constant 0 : index
    %298 = vector.load %arg29[%c0_133, %c0_134, %c0_135] : memref<1x1x32xf32, #tpu.memory_space<vmem>>, vector<1x1x32xf32>
    %299 = vector.shape_cast %298 : vector<1x1x32xf32> to vector<1x32xf32>
    %cst_136 = arith.constant dense<0.000000e+00> : vector<16xf32>
    %300 = vector.multi_reduction <add>, %295, %cst_136 [1] : vector<16x32xf32> to vector<16xf32>
    %301 = vector.shape_cast %300 : vector<16xf32> to vector<16x1xf32>
    %cst_137 = arith.constant 3.200000e+01 : f32
    %302 = vector.broadcast %cst_137 : f32 to vector<16x1xf32>
    %303 = arith.divf %301, %302 : vector<16x1xf32>
    %304 = vector.broadcast %303 : vector<16x1xf32> to vector<16x32xf32>
    %305 = arith.subf %295, %304 : vector<16x32xf32>
    %306 = arith.mulf %305, %305 : vector<16x32xf32>
    %cst_138 = arith.constant dense<0.000000e+00> : vector<16xf32>
    %307 = vector.multi_reduction <add>, %306, %cst_138 [1] : vector<16x32xf32> to vector<16xf32>
    %308 = vector.shape_cast %307 : vector<16xf32> to vector<16x1xf32>
    %cst_139 = arith.constant 3.200000e+01 : f32
    %309 = vector.broadcast %cst_139 : f32 to vector<16x1xf32>
    %310 = arith.divf %308, %309 : vector<16x1xf32>
    %311 = vector.broadcast %303 : vector<16x1xf32> to vector<16x32xf32>
    %312 = arith.subf %295, %311 : vector<16x32xf32>
    %cst_140 = arith.constant 9.99999974E-6 : f32
    %313 = vector.broadcast %cst_140 : f32 to vector<16x1xf32>
    %314 = arith.addf %310, %313 : vector<16x1xf32>
    %315 = math.rsqrt %314 : vector<16x1xf32>
    %316 = vector.broadcast %315 : vector<16x1xf32> to vector<16x32xf32>
    %317 = arith.mulf %312, %316 : vector<16x32xf32>
    %318 = vector.broadcast %297 : vector<1x32xf32> to vector<16x32xf32>
    %319 = arith.mulf %317, %318 : vector<16x32xf32>
    %320 = vector.broadcast %299 : vector<1x32xf32> to vector<16x32xf32>
    %321 = arith.addf %319, %320 : vector<16x32xf32>
    %c0_141 = arith.constant 0 : index
    %c0_142 = arith.constant 0 : index
    %c0_143 = arith.constant 0 : index
    %322 = vector.load %arg30[%c0_141, %c0_142, %c0_143] : memref<1x16x32xf32, #tpu.memory_space<vmem>>, vector<1x16x32xf32>
    %323 = vector.shape_cast %322 : vector<1x16x32xf32> to vector<16x32xf32>
    %324 = vector.shape_cast %321 : vector<16x32xf32> to vector<1x16x32xf32>
    tpu.vector_store %arg30[%c0_141, %c0_142, %c0_143], %324 {strides = array<i32>} : memref<1x16x32xf32, #tpu.memory_space<vmem>>, vector<1x16x32xf32>,
    return
  }
  func.func @transform_0(%arg0: i32, %arg1: i32) -> (i32, i32, i32) {
    %c0_i32 = arith.constant 0 : i32
    %c0_i32_0 = arith.constant 0 : i32
    %c0_i32_1 = arith.constant 0 : i32
    return %arg0, %c0_i32, %c0_i32_0 : i32, i32, i32
  }
  func.func @transform_1(%arg0: i32, %arg1: i32) -> (i32, i32, i32) {
    %c0_i32 = arith.constant 0 : i32
    %c0_i32_0 = arith.constant 0 : i32
    %c0_i32_1 = arith.constant 0 : i32
    return %arg0, %c0_i32, %c0_i32_0 : i32, i32, i32
  }
  func.func @transform_2(%arg0: i32, %arg1: i32) -> (i32, i32, i32) {
    %c0_i32 = arith.constant 0 : i32
    %c0_i32_0 = arith.constant 0 : i32
    %c0_i32_1 = arith.constant 0 : i32
    return %arg1, %c0_i32, %c0_i32_0 : i32, i32, i32
  }
  func.func @transform_3(%arg0: i32, %arg1: i32) -> (i32, i32, i32) {
    %c0_i32 = arith.constant 0 : i32
    %c0_i32_0 = arith.constant 0 : i32
    %c0_i32_1 = arith.constant 0 : i32
    return %arg1, %c0_i32, %c0_i32_0 : i32, i32, i32
  }
  func.func @transform_4(%arg0: i32, %arg1: i32) -> (i32, i32, i32) {
    %c0_i32 = arith.constant 0 : i32
    %c0_i32_0 = arith.constant 0 : i32
    %c0_i32_1 = arith.constant 0 : i32
    return %arg1, %c0_i32, %c0_i32_0 : i32, i32, i32
  }
  func.func @transform_5(%arg0: i32, %arg1: i32) -> (i32, i32, i32) {
    %c0_i32 = arith.constant 0 : i32
    %c0_i32_0 = arith.constant 0 : i32
    %c0_i32_1 = arith.constant 0 : i32
    return %arg1, %c0_i32, %c0_i32_0 : i32, i32, i32
  }
  func.func @transform_6(%arg0: i32, %arg1: i32) -> (i32, i32, i32) {
    %c0_i32 = arith.constant 0 : i32
    %c0_i32_0 = arith.constant 0 : i32
    %c0_i32_1 = arith.constant 0 : i32
    return %arg1, %c0_i32, %c0_i32_0 : i32, i32, i32
  }
  func.func @transform_7(%arg0: i32, %arg1: i32) -> (i32, i32, i32) {
    %c0_i32 = arith.constant 0 : i32
    %c0_i32_0 = arith.constant 0 : i32
    %c0_i32_1 = arith.constant 0 : i32
    return %arg1, %c0_i32, %c0_i32_0 : i32, i32, i32
  }
  func.func @transform_8(%arg0: i32, %arg1: i32) -> (i32, i32, i32) {
    %c0_i32 = arith.constant 0 : i32
    %c0_i32_0 = arith.constant 0 : i32
    %c0_i32_1 = arith.constant 0 : i32
    return %arg1, %c0_i32, %c0_i32_0 : i32, i32, i32
  }
  func.func @transform_9(%arg0: i32, %arg1: i32) -> (i32, i32, i32) {
    %c0_i32 = arith.constant 0 : i32
    %c0_i32_0 = arith.constant 0 : i32
    %c0_i32_1 = arith.constant 0 : i32
    return %arg1, %c0_i32, %c0_i32_0 : i32, i32, i32
  }
  func.func @transform_10(%arg0: i32, %arg1: i32) -> (i32, i32, i32) {
    %c0_i32 = arith.constant 0 : i32
    %c0_i32_0 = arith.constant 0 : i32
    %c0_i32_1 = arith.constant 0 : i32
    return %arg1, %c0_i32, %c0_i32_0 : i32, i32, i32
  }
  func.func @transform_11(%arg0: i32, %arg1: i32) -> (i32, i32, i32) {
    %c0_i32 = arith.constant 0 : i32
    %c0_i32_0 = arith.constant 0 : i32
    %c0_i32_1 = arith.constant 0 : i32
    return %arg1, %c0_i32, %c0_i32_0 : i32, i32, i32
  }
  func.func @transform_12(%arg0: i32, %arg1: i32) -> (i32, i32, i32) {
    %c0_i32 = arith.constant 0 : i32
    %c0_i32_0 = arith.constant 0 : i32
    %c0_i32_1 = arith.constant 0 : i32
    return %arg1, %c0_i32, %c0_i32_0 : i32, i32, i32
  }
  func.func @transform_13(%arg0: i32, %arg1: i32) -> (i32, i32, i32) {
    %c0_i32 = arith.constant 0 : i32
    %c0_i32_0 = arith.constant 0 : i32
    %c0_i32_1 = arith.constant 0 : i32
    return %arg1, %c0_i32, %c0_i32_0 : i32, i32, i32
  }
  func.func @transform_14(%arg0: i32, %arg1: i32) -> (i32, i32, i32) {
    %c0_i32 = arith.constant 0 : i32
    %c0_i32_0 = arith.constant 0 : i32
    %c0_i32_1 = arith.constant 0 : i32
    return %arg1, %c0_i32, %c0_i32_0 : i32, i32, i32
  }
  func.func @transform_15(%arg0: i32, %arg1: i32) -> (i32, i32, i32) {
    %c0_i32 = arith.constant 0 : i32
    %c0_i32_0 = arith.constant 0 : i32
    %c0_i32_1 = arith.constant 0 : i32
    return %arg1, %c0_i32, %c0_i32_0 : i32, i32, i32
  }
  func.func @transform_16(%arg0: i32, %arg1: i32) -> (i32, i32, i32) {
    %c0_i32 = arith.constant 0 : i32
    %c0_i32_0 = arith.constant 0 : i32
    %c0_i32_1 = arith.constant 0 : i32
    return %arg1, %c0_i32, %c0_i32_0 : i32, i32, i32
  }
  func.func @transform_17(%arg0: i32, %arg1: i32) -> (i32, i32, i32) {
    %c0_i32 = arith.constant 0 : i32
    %c0_i32_0 = arith.constant 0 : i32
    %c0_i32_1 = arith.constant 0 : i32
    return %arg1, %c0_i32, %c0_i32_0 : i32, i32, i32
  }
  func.func @transform_18(%arg0: i32, %arg1: i32) -> (i32, i32, i32) {
    %c0_i32 = arith.constant 0 : i32
    %c0_i32_0 = arith.constant 0 : i32
    %c0_i32_1 = arith.constant 0 : i32
    return %arg1, %c0_i32, %c0_i32_0 : i32, i32, i32
  }
  func.func @transform_19(%arg0: i32, %arg1: i32) -> (i32, i32, i32) {
    %c0_i32 = arith.constant 0 : i32
    %c0_i32_0 = arith.constant 0 : i32
    %c0_i32_1 = arith.constant 0 : i32
    return %arg1, %c0_i32, %c0_i32_0 : i32, i32, i32
  }
  func.func @transform_20(%arg0: i32, %arg1: i32) -> (i32, i32, i32) {
    %c0_i32 = arith.constant 0 : i32
    %c0_i32_0 = arith.constant 0 : i32
    %c0_i32_1 = arith.constant 0 : i32
    return %arg1, %c0_i32, %c0_i32_0 : i32, i32, i32
  }
  func.func @transform_21(%arg0: i32, %arg1: i32) -> (i32, i32, i32) {
    %c0_i32 = arith.constant 0 : i32
    %c0_i32_0 = arith.constant 0 : i32
    %c0_i32_1 = arith.constant 0 : i32
    return %arg1, %c0_i32, %c0_i32_0 : i32, i32, i32
  }
  func.func @transform_22(%arg0: i32, %arg1: i32) -> (i32, i32, i32) {
    %c0_i32 = arith.constant 0 : i32
    %c0_i32_0 = arith.constant 0 : i32
    %c0_i32_1 = arith.constant 0 : i32
    return %arg1, %c0_i32, %c0_i32_0 : i32, i32, i32
  }
  func.func @transform_23(%arg0: i32, %arg1: i32) -> (i32, i32, i32) {
    %c0_i32 = arith.constant 0 : i32
    %c0_i32_0 = arith.constant 0 : i32
    %c0_i32_1 = arith.constant 0 : i32
    return %arg1, %c0_i32, %c0_i32_0 : i32, i32, i32
  }
  func.func @transform_24(%arg0: i32, %arg1: i32) -> (i32, i32, i32) {
    %c0_i32 = arith.constant 0 : i32
    %c0_i32_0 = arith.constant 0 : i32
    %c0_i32_1 = arith.constant 0 : i32
    return %arg1, %c0_i32, %c0_i32_0 : i32, i32, i32
  }
  func.func @transform_25(%arg0: i32, %arg1: i32) -> (i32, i32, i32) {
    %c0_i32 = arith.constant 0 : i32
    %c0_i32_0 = arith.constant 0 : i32
    %c0_i32_1 = arith.constant 0 : i32
    return %arg1, %c0_i32, %c0_i32_0 : i32, i32, i32
  }
  func.func @transform_26(%arg0: i32, %arg1: i32) -> (i32, i32, i32) {
    %c0_i32 = arith.constant 0 : i32
    %c0_i32_0 = arith.constant 0 : i32
    %c0_i32_1 = arith.constant 0 : i32
    return %arg1, %c0_i32, %c0_i32_0 : i32, i32, i32
  }
  func.func @transform_27(%arg0: i32, %arg1: i32) -> (i32, i32, i32) {
    %c0_i32 = arith.constant 0 : i32
    %c0_i32_0 = arith.constant 0 : i32
    %c0_i32_1 = arith.constant 0 : i32
    return %arg1, %c0_i32, %c0_i32_0 : i32, i32, i32
  }
  func.func @transform_28(%arg0: i32, %arg1: i32) -> (i32, i32, i32) {
    %c0_i32 = arith.constant 0 : i32
    %c0_i32_0 = arith.constant 0 : i32
    %c0_i32_1 = arith.constant 0 : i32
    return %arg0, %c0_i32, %c0_i32_0 : i32, i32, i32
  }
}

module attributes {stable_mosaic.version = 11 : i64} {
  func.func @_linear_kernel(%arg0: i32, %arg1: i32, %arg2: memref<32x32xf32, #tpu.memory_space<vmem>>, %arg3: memref<32x128xbf16, #tpu.memory_space<vmem>>, %arg4: memref<1x128xf32, #tpu.memory_space<vmem>>, %arg5: memref<32x128xf32, #tpu.memory_space<vmem>>) attributes {dimension_semantics = [#tpu.dimension_semantics<parallel>, #tpu.dimension_semantics<parallel>], iteration_bounds = array<i64: 1, 1>, scalar_prefetch = 0 : i64, scratch_operands = 0 : i64, tpu.core_type = #tpu.core_type<tc>, window_params = [{transform_indices = @transform_0, window_bounds = array<i64: 32, 32>}, {transform_indices = @transform_1, window_bounds = array<i64: 32, 128>}, {transform_indices = @transform_2, window_bounds = array<i64: 1, 128>}, {transform_indices = @transform_3, window_bounds = array<i64: 32, 128>}]} {
    %c0 = arith.constant 0 : index
    %c0_0 = arith.constant 0 : index
    %0 = vector.load %arg2[%c0, %c0_0] : memref<32x32xf32, #tpu.memory_space<vmem>>, vector<32x32xf32>
    %1 = arith.truncf %0 : vector<32x32xf32> to vector<32x32xbf16>
    %c0_1 = arith.constant 0 : index
    %c0_2 = arith.constant 0 : index
    %2 = vector.load %arg3[%c0_1, %c0_2] : memref<32x128xbf16, #tpu.memory_space<vmem>>, vector<32x128xbf16>
    %cst = arith.constant dense<0.000000e+00> : vector<32x128xf32>
    %3 = tpu.matmul %1, %2, %cst {dimension_numbers = #tpu.dot_dimension_numbers<[1], [0], [0], [1], [0, 0, 1, 1], [], []>} : vector<32x32xbf16>, vector<32x128xbf16>, vector<32x128xf32> -> vector<32x128xf32>
    %c0_3 = arith.constant 0 : index
    %c0_4 = arith.constant 0 : index
    %4 = vector.load %arg4[%c0_3, %c0_4] : memref<1x128xf32, #tpu.memory_space<vmem>>, vector<1x128xf32>
    %5 = vector.broadcast %4 : vector<1x128xf32> to vector<32x128xf32>
    %6 = arith.addf %3, %5 : vector<32x128xf32>
    %c0_5 = arith.constant 0 : index
    %c0_6 = arith.constant 0 : index
    %7 = vector.load %arg5[%c0_5, %c0_6] : memref<32x128xf32, #tpu.memory_space<vmem>>, vector<32x128xf32>
    tpu.vector_store %arg5[%c0_5, %c0_6], %6 {strides = array<i32>} : memref<32x128xf32, #tpu.memory_space<vmem>>, vector<32x128xf32>,
    return
  }
  func.func @transform_0(%arg0: i32, %arg1: i32) -> (i32, i32) {
    %c0_i32 = arith.constant 0 : i32
    %c0_i32_0 = arith.constant 0 : i32
    return %arg0, %c0_i32 : i32, i32
  }
  func.func @transform_1(%arg0: i32, %arg1: i32) -> (i32, i32) {
    %c0_i32 = arith.constant 0 : i32
    %c0_i32_0 = arith.constant 0 : i32
    return %c0_i32, %arg1 : i32, i32
  }
  func.func @transform_2(%arg0: i32, %arg1: i32) -> (i32, i32) {
    %c0_i32 = arith.constant 0 : i32
    %c0_i32_0 = arith.constant 0 : i32
    return %c0_i32, %arg1 : i32, i32
  }
  func.func @transform_3(%arg0: i32, %arg1: i32) -> (i32, i32) {
    %c0_i32 = arith.constant 0 : i32
    return %arg0, %arg1 : i32, i32
  }
}

module attributes {stable_mosaic.version = 11 : i64} {
  func.func @_linear_kernel(%arg0: i32, %arg1: i32, %arg2: memref<32x32xf32, #tpu.memory_space<vmem>>, %arg3: memref<32x128xbf16, #tpu.memory_space<vmem>>, %arg4: memref<1x128xf32, #tpu.memory_space<vmem>>, %arg5: memref<32x128xf32, #tpu.memory_space<vmem>>) attributes {dimension_semantics = [#tpu.dimension_semantics<parallel>, #tpu.dimension_semantics<parallel>], iteration_bounds = array<i64: 1, 1>, scalar_prefetch = 0 : i64, scratch_operands = 0 : i64, tpu.core_type = #tpu.core_type<tc>, window_params = [{transform_indices = @transform_0, window_bounds = array<i64: 32, 32>}, {transform_indices = @transform_1, window_bounds = array<i64: 32, 128>}, {transform_indices = @transform_2, window_bounds = array<i64: 1, 128>}, {transform_indices = @transform_3, window_bounds = array<i64: 32, 128>}]} {
    %c0 = arith.constant 0 : index
    %c0_0 = arith.constant 0 : index
    %0 = vector.load %arg2[%c0, %c0_0] : memref<32x32xf32, #tpu.memory_space<vmem>>, vector<32x32xf32>
    %1 = arith.truncf %0 : vector<32x32xf32> to vector<32x32xbf16>
    %c0_1 = arith.constant 0 : index
    %c0_2 = arith.constant 0 : index
    %2 = vector.load %arg3[%c0_1, %c0_2] : memref<32x128xbf16, #tpu.memory_space<vmem>>, vector<32x128xbf16>
    %cst = arith.constant dense<0.000000e+00> : vector<32x128xf32>
    %3 = tpu.matmul %1, %2, %cst {dimension_numbers = #tpu.dot_dimension_numbers<[1], [0], [0], [1], [0, 0, 1, 1], [], []>} : vector<32x32xbf16>, vector<32x128xbf16>, vector<32x128xf32> -> vector<32x128xf32>
    %c0_3 = arith.constant 0 : index
    %c0_4 = arith.constant 0 : index
    %4 = vector.load %arg4[%c0_3, %c0_4] : memref<1x128xf32, #tpu.memory_space<vmem>>, vector<1x128xf32>
    %5 = vector.broadcast %4 : vector<1x128xf32> to vector<32x128xf32>
    %6 = arith.addf %3, %5 : vector<32x128xf32>
    %c0_5 = arith.constant 0 : index
    %c0_6 = arith.constant 0 : index
    %7 = vector.load %arg5[%c0_5, %c0_6] : memref<32x128xf32, #tpu.memory_space<vmem>>, vector<32x128xf32>
    tpu.vector_store %arg5[%c0_5, %c0_6], %6 {strides = array<i32>} : memref<32x128xf32, #tpu.memory_space<vmem>>, vector<32x128xf32>,
    return
  }
  func.func @transform_0(%arg0: i32, %arg1: i32) -> (i32, i32) {
    %c0_i32 = arith.constant 0 : i32
    %c0_i32_0 = arith.constant 0 : i32
    return %arg0, %c0_i32 : i32, i32
  }
  func.func @transform_1(%arg0: i32, %arg1: i32) -> (i32, i32) {
    %c0_i32 = arith.constant 0 : i32
    %c0_i32_0 = arith.constant 0 : i32
    return %c0_i32, %arg1 : i32, i32
  }
  func.func @transform_2(%arg0: i32, %arg1: i32) -> (i32, i32) {
    %c0_i32 = arith.constant 0 : i32
    %c0_i32_0 = arith.constant 0 : i32
    return %c0_i32, %arg1 : i32, i32
  }
  func.func @transform_3(%arg0: i32, %arg1: i32) -> (i32, i32) {
    %c0_i32 = arith.constant 0 : i32
    return %arg0, %arg1 : i32, i32
  }
}

</mosaic_0001>

<bundles_post_ra>
// kernel: kuzushiji_transformer_forward.7
= control target key start
LH: loop header
LB: loop body
LE: loop exit
PB: predicated region body
PF: predicated region fallthrough
CT: control target
= control target key end

     0   :  { %s181_s0 = inlined_call_operand.vmem [shape: f32[32,32], index: 0, kind: input, shape index: {}]   ;;  %s182_s1 = inlined_call_operand.vmem [shape: bf16[32,128], index: 1, kind: input, shape index: {}]   ;;  %s183_s2 = inlined_call_operand.vmem [shape: f32[1,128], index: 2, kind: input, shape index: {}]   ;;  %s184_s3 = inlined_call_operand.hbm [shape: f32[32,128], index: 3, kind: output, shape index: {}]  }
   0x1   :  { %v101_v0 = vld [vmem:[%s182_s1 + $0x8] sm:$0xff]  ;;  %v100_v1 = vld [vmem:[%s182_s1] sm:$0xff]  ;;  %v18_v4 = vld [vmem:[%s181_s0 + $0x10] sm:$0xff] }
   0x2   :  { %v16_v2 = vld [vmem:[%s181_s0] sm:$0xff]  ;;  %v17_v3 = vld [vmem:[%s181_s0 + $0x8] sm:$0xff]  ;;  %55 = vmatpush.bf16.msra.mxu0 %v101_v0  ;;  %102 = vmatpush.bf16.msra.mxu1 %v101_v0  ;;  %v19_v5 = vld [vmem:[%s181_s0 + $0x18] sm:$0xff] }
   0x3   :  { %8 = vsyncpa [#allocation3], 0  ;;  %v20_v6 = vpack.c.bf16 %v17_v3, %v16_v2  ;;  %v21_v7 = vpack.c.bf16 %v19_v5, %v18_v4  ;;  %vm42_vm0 = vcmask 261120   ;;  %v107_v8 = vld [vmem:[%s183_s2] ss:$0 sm:$0xff]  ;;  %s134_s25 = smov [#allocation2]  }
   0x4   :  { %s76_s0 = sshll.u32 %s134_s25, 4  ;;  %s78_s28 = sshll.u32 %s184_s3, 4  ;;  %s77_s0 = int_to_ptr.vmem [resolvable:$true] %s76_s0  ;;  %s79_s28 = int_to_ptr.hbm [resolvable:$true] %s78_s28 }
   0x5   :  { %s135_s2 = smov 128   ;;  %s136_s29 = smov 8  }
   0x6   :  { %56 = vmatpush.bf16.msra.mxu0 %v100_v1  ;;  %103 = vmatpush.bf16.msra.mxu1 %v100_v1 }
   0x9   :  { %98 = vmatmul.msk.bf16.vlgmr.msra.gmra.mxu0 %vm42_vm0, %v20_v6  ;;  %99 = vmatmul.msk.bf16.vlgmr.msra.gmra.mxu1 %vm42_vm0, %v21_v7 }
  0x86   :  { %v58_v9 = vpop.f32.mrf.mxu0  ;;  %v63_v10 = vpop.f32.mrf.mxu1 }
  0x87   :  { %v59_v11 = vadd.f32 %v107_v8, %v58_v9  ;;  %v64_v12 = vadd.f32 %v107_v8, %v63_v10 }
  0x89   :  { %68 = vst [vmem:[#allocation2] sm:$0xff] %v59_v11 }
  0x8a   :  { %70 = vst [vmem:[#allocation2 + $0x10] sm:$0xff] %v64_v12 }
  0x8e   :  { %v60_v13 = vpop.f32.mrf.mxu0  ;;  %v65_v14 = vpop.f32.mrf.mxu1 }
  0x8f   :  { %v61_v15 = vadd.f32 %v107_v8, %v60_v13  ;;  %v66_v16 = vadd.f32 %v107_v8, %v65_v14 }
  0x91   :  { %69 = vst [vmem:[#allocation2 + $0x8] sm:$0xff] %v61_v15 }
  0x92   :  { %71 = vst [vmem:[#allocation2 + $0x18] sm:$0xff] %v66_v16 }
  0x93   :  { %84 = dma.vmem_to_hbm [thread:$0]  %s77_s0, 512, %s79_s28, [#allocation3], %s135_s2, %s135_s2, %s136_s29  }
  0x94   :  { %132 = dma.done.wait [#allocation3], 512  }
  0x95   :  { %133 = vsyncadd [#allocation3], 4294966784 }
  0x96   :  { %89 = vsyncpa [#allocation3], 1 }

// kernel: kuzushiji_transformer_forward.5
= control target key start
LH: loop header
LB: loop body
LE: loop exit
PB: predicated region body
PF: predicated region fallthrough
CT: control target
= control target key end

     0   :  { %vm41_vm0 = vcmask 261120   ;;  %s143_s1 = inlined_call_operand.vmem [shape: bf16[32,128], index: 1, kind: input, shape index: {}]   ;;  %s144_s0 = inlined_call_operand.vmem [shape: f32[32,32], index: 0, kind: input, shape index: {}]   ;;  %s145_s2 = inlined_call_operand.vmem [shape: f32[1,128], index: 2, kind: input, shape index: {}]   ;;  %s146_s3 = inlined_call_operand.vmem [shape: f32[32,128], index: 3, kind: output, shape index: {}]  }
   0x1   :  { %v86_v0 = vld [vmem:[%s143_s1 + $0x8] sm:$0xff]  ;;  %v85_v1 = vld [vmem:[%s143_s1] sm:$0xff]  ;;  %v17_v4 = vld [vmem:[%s144_s0 + $0x10] sm:$0xff] }
   0x2   :  { %v15_v2 = vld [vmem:[%s144_s0] sm:$0xff]  ;;  %v16_v3 = vld [vmem:[%s144_s0 + $0x8] sm:$0xff]  ;;  %54 = vmatpush.bf16.msra.mxu0 %v86_v0  ;;  %87 = vmatpush.bf16.msra.mxu1 %v86_v0  ;;  %v18_v5 = vld [vmem:[%s144_s0 + $0x18] sm:$0xff] }
   0x3   :  { %v19_v6 = vpack.c.bf16 %v16_v3, %v15_v2  ;;  %v20_v7 = vpack.c.bf16 %v18_v5, %v17_v4  ;;  %v89_v8 = vld [vmem:[%s145_s2] ss:$0 sm:$0xff] }
   0x6   :  { %55 = vmatpush.bf16.msra.mxu0 %v85_v1  ;;  %88 = vmatpush.bf16.msra.mxu1 %v85_v1 }
   0x9   :  { %83 = vmatmul.msk.bf16.vlgmr.msra.gmra.mxu0 %vm41_vm0, %v19_v6  ;;  %84 = vmatmul.msk.bf16.vlgmr.msra.gmra.mxu1 %vm41_vm0, %v20_v7 }
  0x86   :  { %v57_v9 = vpop.f32.mrf.mxu0  ;;  %v62_v10 = vpop.f32.mrf.mxu1 }
  0x87   :  { %v58_v11 = vadd.f32 %v89_v8, %v57_v9  ;;  %v63_v12 = vadd.f32 %v89_v8, %v62_v10 }
  0x89   :  { %67 = vst [vmem:[%s146_s3] sm:$0xff] %v58_v11 }
  0x8a   :  { %69 = vst [vmem:[%s146_s3 + $0x10] sm:$0xff] %v63_v12 }
  0x8e   :  { %v59_v13 = vpop.f32.mrf.mxu0  ;;  %v64_v14 = vpop.f32.mrf.mxu1 }
  0x8f   :  { %v60_v15 = vadd.f32 %v89_v8, %v59_v13  ;;  %v65_v16 = vadd.f32 %v89_v8, %v64_v14 }
  0x91   :  { %68 = vst [vmem:[%s146_s3 + $0x8] sm:$0xff] %v60_v15 }
  0x92   :  { %70 = vst [vmem:[%s146_s3 + $0x18] sm:$0xff] %v65_v16 }

// kernel: squeeze.1
= control target key start
LH: loop header
LB: loop body
LE: loop exit
PB: predicated region body
PF: predicated region fallthrough
CT: control target
= control target key end

     0   :  { %s80_s0 = inlined_call_operand.vmem [shape: f32[32], index: 0, kind: input, shape index: {}]   ;;  %s81_s1 = inlined_call_operand.hbm [shape: f32[2,16], index: 1, kind: output, shape index: {}]  }
   0x1   :  { %v5_v0 = vld [vmem:[%s80_s0] sm:$0x1] }
   0x2   :  { %2 = vsyncpa [#allocation1], 0  ;;  %6 = vst [vmem:[#allocation3] sm:$0x1] %v5_v0  ;;  %vm8_vm0 = vcmask 130048   ;;  %s62_s0 = smov 112  }
   0x3   :  { %s63_s8 = smov [#allocation0]   ;;  %s27_s1 = sshll.u32 %s81_s1, 4  ;;  %s28_s1 = int_to_ptr.hbm [resolvable:$true] %s27_s1 }
   0x4   :  { %s25_s9 = sshll.u32 %s63_s8, 4  ;;  %s26_s9 = int_to_ptr.vmem [resolvable:$true] %s25_s9 }
   0x9   :  { %v10_v1 = vld [vmem:[#allocation3] sm:$0x1]  }
   0xa   :  { %v7_v2 = vld [vmem:[#allocation3] sm:$0x1]   ;;  %11 = vrot.lane.b32.xlu0 %v10_v1, %s62_s0 }
   0xb   :  { %9 = vst.msk [vmem:[#allocation2] sm:$0x1] %vm8_vm0, %v7_v2  }
  0x7c   :  { %v12_v3 = vpop.permute.xlu0 %11  }
  0x7d   :  { %15 = vst.msk [vmem:[#allocation2 + $0x1] sm:$0x1] %vm8_vm0, %v12_v3  }
  0x84   :  { %v18_v4 = vld [vmem:[#allocation2] sm:$0x3] }
  0x85   :  { %21 = vst [vmem:[#allocation0] sm:$0x3] %v18_v4 }
  0x86   :  { %30 = dma.vmem_to_hbm [thread:$0]  %s26_s9, 32, %s28_s1, [#allocation1]  }
  0x87   :  { %60 = dma.done.wait [#allocation1], 32  }
  0x88   :  { %61 = vsyncadd [#allocation1], 4294967264 }
  0x89   :  { %33 = vsyncpa [#allocation1], 1 }

// kernel: kuzushiji_transformer_forward.4
= control target key start
LH: loop header
LB: loop body
LE: loop exit
PB: predicated region body
PF: predicated region fallthrough
CT: control target
= control target key end

     0   :  { %s2093_s24 = smov 0   ;;  %s2095_s25 = smov 0   ;;  %s2358_s0 = inlined_call_operand.vmem [shape: f32[2,16,32], index: 0, kind: input, shape index: {}]   ;;  %s2359_s1 = inlined_call_operand.vmem [shape: bf16[2,32,32], index: 1, kind: input, shape index: {}]   ;;  %s2360_s2 = inlined_call_operand.vmem [shape: f32[2,1,32], index: 2, kind: input, shape index: {}]   ;;  %s2361_s3 = inlined_call_operand.vmem [shape: bf16[2,32,32], index: 3, kind: input, shape index: {}]   ;;  %s2362_s4 = inlined_call_operand.vmem [shape: f32[2,1,32], index: 4, kind: input, shape index: {}]   ;;  %s2363_s5 = inlined_call_operand.vmem [shape: bf16[2,32,32], index: 5, kind: input, shape index: {}]   ;;  %s2364_s6 = inlined_call_operand.vmem [shape: f32[2,1,32], index: 6, kind: input, shape index: {}]   ;;  %s2365_s7 = inlined_call_operand.vmem [shape: bf16[2,32,32], index: 7, kind: input, shape index: {}]   ;;  %s2366_s8 = inlined_call_operand.vmem [shape: f32[2,1,32], index: 8, kind: input, shape index: {}]   ;;  %s2367_s9 = inlined_call_operand.vmem [shape: f32[2,1,32], index: 9, kind: input, shape index: {}]   ;;  %s2368_s10 = inlined_call_operand.vmem [shape: f32[2,1,32], index: 10, kind: input, shape index: {}]   ;;  %s2369_s11 = inlined_call_operand.vmem [shape: bf16[2,32,64], index: 11, kind: input, shape index: {}]   ;;  %s2370_s12 = inlined_call_operand.vmem [shape: f32[2,1,64], index: 12, kind: input, shape index: {}]   ;;  %s2371_s13 = inlined_call_operand.vmem [shape: bf16[2,64,32], index: 13, kind: input, shape index: {}]   ;;  %s2372_s14 = inlined_call_operand.vmem [shape: f32[2,1,32], index: 14, kind: input, shape index: {}]   ;;  %s2373_s15 = inlined_call_operand.vmem [shape: f32[2,1,32], index: 15, kind: input, shape index: {}]   ;;  %s2374_s16 = inlined_call_operand.vmem [shape: f32[2,1,32], index: 16, kind: input, shape index: {}]   ;;  %s2375_s17 = inlined_call_operand.vmem [shape: f32[2,16,32], index: 17, kind: output, shape index: {}]  }
   0x1   :  { %2380 = sst [smem:[#allocation8_spill]] %s2358_s0  ;;  %s2097_s26 = smov 0  }
   0x2   :  { %2381 = sst [smem:[#allocation9_spill]] %s2359_s1  ;;  %s2099_s27 = smov 0  }
   0x3   :  { %2382 = sst [smem:[#allocation10_spill]] %s2361_s3  ;;  %s2101_s28 = smov 0  }
   0x4   :  { %2383 = sst [smem:[#allocation11_spill]] %s2362_s4 }
   0x5   :  { %2384 = sst [smem:[#allocation12_spill]] %s2363_s5 }
   0x6   :  { %2385 = sst [smem:[#allocation13_spill]] %s2365_s7 }
   0x7   :  { %2386 = sst [smem:[#allocation14_spill]] %s2366_s8 }
   0x8   :  { %2387 = sst [smem:[#allocation15_spill]] %s2367_s9 }
   0x9   :  { %2388 = sst [smem:[#allocation16_spill]] %s2368_s10 }
   0xa   :  { %2389 = sst [smem:[#allocation17_spill]] %s2369_s11 }
   0xb   :  { %2390 = sst [smem:[#allocation18_spill]] %s2370_s12 }
   0xc   :  { %2391 = sst [smem:[#allocation19_spill]] %s2371_s13 }
   0xd   :  { %2392 = sst [smem:[#allocation20_spill]] %s2372_s14 }
   0xe   :  { %2393 = sst [smem:[#allocation21_spill]] %s2373_s15 }
   0xf   :  { %2394 = sst [smem:[#allocation22_spill]] %s2374_s16 }
  0x10   :  { %2395 = sst [smem:[#allocation23_spill]] %s2375_s17 }
  0x11 LB: > { %2396 = sst [smem:[#allocation2_spill]] %s1978_s24  ;;  %s36_s29 = sadd.s32 1, %s1986_s26  ;;  %s1994_s28 = sphi %s2101_s28, %s27_s28   ;;  %s1990_s27 = sphi %s2099_s27, %s2438_s27   ;;  %s1986_s26 = sphi %s2097_s26, %s2437_s26   ;;  %s1982_s25 = sphi %s2095_s25, %s2436_s25   ;;  %s1978_s24 = sphi %s2093_s24, %s2435_s24  }
  0x12   : > { %2397 = sst [smem:[#allocation3_spill]] %s1986_s26  ;;  %s39_s0 = sadd.s32 1, %s1990_s27 }
  0x13   : > { %2398 = sst [smem:[#allocation4_spill]] %s1990_s27  ;;  %p37_p0 = scmp.ge.s32.totalorder %s36_s29, 2 }
  0x14   : > { %2399 = sst [smem:[#allocation5_spill]] %s1994_s28  ;;  %p1730_p1 = scmp.ge.s32.totalorder %s1994_s28, 1 }
  0x15   : > { %p639_p2 = scmp.lt.s32.totalorder %s1994_s28, 5  ;;  %s2440_s29 = smov (%p37_p0, %s36_s29), 0 }
  0x16   : > { %2400 = sst [smem:[#allocation6_spill]] %s2440_s29  ;;  %s2442_s0 = smov (!%p37_p0, %s39_s0), %s1990_s27 }
  0x17   : > { %p640_p3 = pnand %p1730_p1, %p639_p2  ;;  %p41_p4 = scmp.ge.s32.totalorder %s2442_s0, 2 }
  0x18   : > { %p751_p5 = scmp.lt.s32.totalorder (!%p640_p3), %s1982_s25, 1  ;;  %p756_p6 = scmp.lt.s32.totalorder (!%p640_p3), %s1978_s24, 1 }
  0x19   : > { %s2444_s0 = smov (%p41_p4, %s2442_s0), 0  ;;  %643 = sbr.rel (%p640_p3) target bundleno = 1844 (0x734), region = 88 }
  0x1a   : > { %2401 = sst [smem:[#allocation7_spill]] %s2444_s0 }
  0x1b   : > { %s2402_s20 = sld [smem:[#allocation8_spill]] (!%p640_p3) }
  0x1c   : > { %s2403_s29 = sld [smem:[#allocation9_spill]] (!%p640_p3) }
  0x1d   : > { %s2404_s3 = sld [smem:[#allocation10_spill]] (!%p640_p3) }
  0x1e   : > { %s2446_s25 = smov (!%p751_p5, %s1982_s25), 1  ;;  %s2406_s5 = sld [smem:[#allocation12_spill]] }
  0x1f   : > { %s2127_s30 = scalar_select %p756_p6, %s1978_s24, 1 }
  0x20   : > { %s1820_s18 = sshll.u32 %s2446_s25, 4  ;;  %s2407_s7 = sld [smem:[#allocation13_spill]] }
  0x21   : > { %s755_s21 = scalar_lea.vmem %s2402_s20, %s1820_s18  ;;  %s1821_s22 = sshll.u32 %s2127_s30, 4 }
  0x22   : > { %s760_s27 = scalar_lea.vmem %s2403_s29, %s1821_s22  ;;  %s2411_s11 = sld [smem:[#allocation17_spill]] }
  0x23   : > { %s768_s25 = scalar_lea.vmem %s2404_s3, %s1821_s22  ;;  %s2413_s3 = sld [smem:[#allocation20_spill]] }
  0x24   : > { %s2150_s14 = scalar_lea.vmem %s2406_s5, %s1821_s22  ;;  %s2414_s19 = sld [smem:[#allocation19_spill]] }
  0x25   : > { %s2415_s5 = sld [smem:[#allocation21_spill]] }
  0x26   : > { %s2159_s24 = scalar_lea.vmem %s2407_s7, %s1821_s22  ;;  %s1826_s7 = sshll.u32 %s2127_s30, 5 }
  0x27   : > { %s2417_s23 = sld [smem:[#allocation23_spill]] }
  0x28   : > { %s2176_s29 = scalar_lea.vmem %s2411_s11, %s1821_s22  ;;  %s2416_s11 = sld [smem:[#allocation22_spill]] }
  0x29   : > { %s809_s8 = scalar_lea.vmem %s2413_s3, %s2127_s30  ;;  %s2418_s16 = sld [smem:[#allocation2_spill]] }
  0x2a   : > { %s2190_s9 = scalar_lea.vmem %s2414_s19, %s1826_s7 }
  0x2b   : > { %s812_s4 = scalar_lea.vmem %s2415_s5, %s2127_s30 }
  0x2d   : > { %s2203_s12 = scalar_lea.vmem %s2417_s23, %s1820_s18 }
  0x2e   : > { %s815_s10 = scalar_lea.vmem %s2416_s11, %s2127_s30 }
  0x2f   : > { %p1747_p7 = scmp.ne.s32.totalorder %s2418_s16, 0 }
  0x31   : > { %825 = sbr.rel (%p1747_p7) target bundleno = 57 (0x39), region = 92 }
  0x36   : > { %v826_v0 = vld [vmem:[%s755_s21] sm:$0xff]  ;;  %vm828_vm0 = vcmask 261120   ;;  %v827_v1 = vld [vmem:[%s755_s21 + $0x8] sm:$0xff] }
  0x37   : > { %829 = vst.msk [vmem:[%s2203_s12] sm:$0xff] %vm828_vm0, %v826_v0 }
  0x38   : > { %830 = vst.msk [vmem:[%s2203_s12 + $0x8] sm:$0xff] %vm828_vm0, %v827_v1 }
  0x39 PF: > { %v1829_v2 = vld [vmem:[%s760_s27 + $0x8] sm:$0xff]  ;;  %v1828_v4 = vld [vmem:[%s760_s27] sm:$0xff]  ;;  %vm854_vm1 = vcmask 261120   ;;  %s2419_s7 = scalar_lea.vmem %s2360_s2, %s2127_s30  ;;  %s2420_s18 = sld [smem:[#allocation11_spill]]  ;;  %vm943_vm2 = vcmask 64512   ;;  %vm964_vm3 = vcmask 130048  }
  0x3a   : > { %v1831_v3 = vld [vmem:[%s768_s25 + $0x8] sm:$0xff]  ;;  %v1830_v5 = vld [vmem:[%s768_s25] sm:$0xff]  ;;  %864 = vmatpush.bf16.msra.mxu0 %v1829_v2  ;;  %s1997_s25 = smov 120   ;;  %s1998_s19 = smov 104   ;;  %vm1237_vm4 = vcmask 195584   ;;  %vm1420_vm12 = vcmask 523264  }
  0x3b   : > { %898 = vmatpush.bf16.msra.mxu1 %v1831_v3  ;;  %v1833_v9 = vld [vmem:[%s2150_s14 + $0x8] sm:$0xff]  ;;  %v1832_v10 = vld [vmem:[%s2150_s14] sm:$0xff]  ;;  %s1996_s14 = smov 112   ;;  %s2422_s13 = scalar_lea.vmem %s2364_s6, %s2127_s30 }
  0x3c   : > { %932 = vmatpush.bf16.msra.mxu2 %v1833_v9  ;;  %v1904_v13 = vld [vmem:[%s2419_s7] ss:$0 sm:$0xff]  ;;  %s1999_s15 = smov 8   ;;  %s2000_s1 = smov 16  }
  0x3d   : > { %v1906_v30 = vld [vmem:[%s2422_s13] ss:$0 sm:$0xff]  ;;  %s2001_s20 = smov 24   ;;  %s2423_s0 = sld [smem:[#allocation14_spill]] }
  0x3e   : > { %v2209_v6 = vld [vmem:[%s2203_s12] sm:$0xff]  ;;  %865 = vmatpush.bf16.msra.mxu0 %v1828_v4  ;;  %s2425_s16 = sld [smem:[#allocation15_spill]] }
  0x3f   : > { %v2212_v7 = vld [vmem:[%s2203_s12 + $0x8] sm:$0xff]  ;;  %899 = vmatpush.bf16.msra.mxu1 %v1830_v5  ;;  %s2421_s21 = scalar_lea.vmem %s2420_s18, %s2127_s30  ;;  %s2427_s11 = sld [smem:[#allocation16_spill]] }
  0x40   : > { %v833_v8 = vpack.c.bf16 %v2212_v7, %v2209_v6  ;;  %933 = vmatpush.bf16.msra.mxu2 %v1832_v10  ;;  %v1905_v14 = vld [vmem:[%s2421_s21] ss:$0 sm:$0xff] }
  0x42   : > { %1756 = vmatmul.msk.bf16.vlgmr.msra.gmra.mxu0 %vm854_vm1, %v833_v8  ;;  %1765 = vmatmul.msk.bf16.vlgmr.msra.gmra.mxu1 %vm854_vm1, %v833_v8 }
  0x43   : > { %1774 = vmatmul.msk.bf16.vlgmr.msra.gmra.mxu2 %vm854_vm1, %v833_v8  ;;  %s2424_s26 = scalar_lea.vmem %s2423_s0, %s2127_s30 }
  0x44   : > { %s2426_s3 = scalar_lea.vmem %s2425_s16, %s2127_s30 }
  0x45   : > { %s2428_s27 = scalar_lea.vmem %s2427_s11, %s2127_s30 }
  0xbf   : > { %v867_v11 = vpop.f32.mrf.mxu0  ;;  %v901_v12 = vpop.f32.mrf.mxu1 }
  0xc0   : > { %v868_v15 = vadd.f32 %v1904_v13, %v867_v11  ;;  %v902_v18 = vadd.f32 %v1905_v14, %v901_v12 }
  0xc6   : > { %v935_v28 = vpop.f32.mrf.mxu2 }
  0xc7   : > { %v869_v16 = vpop.f32.mrf.mxu0  ;;  %v903_v17 = vpop.f32.mrf.mxu1  ;;  %v936_v34 = vadd.f32 %v1906_v30, %v935_v28 }
  0xc8   : > { %v870_v19 = vadd.f32 %v1904_v13, %v869_v16  ;;  %v904_v20 = vadd.f32 %v1905_v14, %v903_v17 }
  0xca   : > { %v940_v21 = vpack.c.bf16 %v870_v19, %v868_v15  ;;  %v941_v22 = vpack.c.bf16 %v904_v20, %v902_v18 }
  0xcc   : > { %1077 = vrot.lane.b32.xlu1 %v941_v22, %s1996_s14  ;;  %1009 = vrot.lane.b32.xlu0 %v941_v22, %s1997_s25  ;;  %v948_v23 = vsel %vm943_vm2, %v941_v22, 0 }
  0xcd   : > { %1075 = vrot.lane.b32.xlu2 %v940_v21, %s1996_s14  ;;  %957 = vmatpush.bf16.xpose.msra.mxu3 %v948_v23 }
  0xce   : > { %v937_v35 = vpop.f32.mrf.mxu2 }
  0xcf   : > { %v938_v36 = vadd.f32 %v1906_v30, %v937_v35 }
  0xd1   : > { %v942_v37 = vpack.c.bf16 %v938_v36, %v936_v34 }
  0xd3   : > { %994 = vmatpush.bf16.msrb.mxu0 %v942_v37 }
  0xd4   : > { %1144 = vrot.lane.b32.xlu1 %v941_v22, %s1998_s19  ;;  %1006 = vrot.lane.b32.xlu0 %v940_v21, %s1997_s25 }
  0xd5   : > { %1142 = vrot.lane.b32.xlu2 %v940_v21, %s1998_s19  ;;  %1775 = vmatmul.msk.bf16.vlgmr.msra.gmra.mxu3 %vm943_vm2, %v940_v21 }
  0xdc   : > { %1051 = vrot.lane.b32.xlu0 %v942_v37, %s1997_s25 }
 0x127   : > { %v1076_v29 = vpop.permute.xlu2 %1075 }
 0x12f   : > { %v1143_v38 = vpop.permute.xlu2 %1142 }
 0x13e   : > { %v1078_v24 = vpop.permute.xlu1 %1077  ;;  %v1010_v25 = vpop.permute.xlu0 %1009 }
 0x13f   : > { %v1015_v26 = vsel %vm943_vm2, %v1010_v25, 0  ;;  %v1083_v27 = vsel %vm943_vm2, %v1078_v24, 0 }
 0x140   : > { %1024 = vmatpush.bf16.xpose.msrb.mxu1 %v1015_v26  ;;  %1092 = vmatpush.bf16.xpose.msrb.mxu3 %v1083_v27 }
 0x146   : > { %v1145_v31 = vpop.permute.xlu1 %1144  ;;  %v1007_v32 = vpop.permute.xlu0 %1006 }
 0x147   : > { %v1150_v33 = vsel %vm943_vm2, %v1145_v31, 0  ;;  %1777 = vmatmul.msk.bf16.vlgmr.msrb.gmra.mxu1 %vm943_vm2, %v1007_v32  ;;  %1779 = vmatmul.msk.bf16.vlgmr.msrb.gmra.mxu3 %vm943_vm2, %v1076_v29 }
 0x148   : > { %1159 = vmatpush.bf16.xpose.msra.mxu1 %v1150_v33 }
 0x14e   : > { %v1052_v54 = vpop.permute.xlu0 %1051 }
 0x14f   : > { %1064 = vmatpush.bf16.msrb.mxu2 %v1052_v54 }
 0x157   : > { %1781 = vmatmul.msk.bf16.vlgmr.msra.gmra.mxu1 %vm943_vm2, %v1143_v38 }
 0x158   : > { %v959_v39 = vpop.f32.mrf.mxu3 }
 0x159   : > { %v965_v40 = vsel %vm964_vm3, %v959_v39, -inf }
 0x15a   : > { %966 = vmax.xlane.f32.xlu2 %v965_v40 }
 0x160   : > { %v961_v41 = vpop.f32.mrf.mxu3 }
 0x161   : > { %v968_v42 = vsel %vm964_vm3, %v961_v41, -inf }
 0x162   : > { %969 = vmax.xlane.f32.xlu2 %v968_v42 }
 0x1c4   : > { %v1026_v43 = vpop.f32.mrf.mxu1 }
 0x1c5   : > { %v1031_v44 = vsel %vm964_vm3, %v1026_v43, -inf }
 0x1c6   : > { %1032 = vmax.xlane.f32.xlu0 %v1031_v44 }
 0x1ca   : > { %v1094_v45 = vpop.f32.mrf.mxu3 }
 0x1cb   : > { %v1099_v46 = vsel %vm964_vm3, %v1094_v45, -inf }
 0x1cc   : > { %v1028_v47 = vpop.f32.mrf.mxu1  ;;  %1100 = vmax.xlane.f32.xlu1 %v1099_v46 }
 0x1cd   : > { %v967_v48 = vpop.xlane.xlu2 %966  ;;  %v1034_v50 = vsel %vm964_vm3, %v1028_v47, -inf }
 0x1ce   : > { %v971_v49 = vsub.f32 %v959_v39, %v967_v48 }
 0x1d0   : > { %v973_v52 = vmul.f32 1.442695, %v971_v49 }
 0x1d2   : > { %1914 = vpow2.f32 %v973_v52  ;;  %v1096_v63 = vpop.f32.mrf.mxu3 }
 0x1d3   : > { %v1102_v0 = vsel %vm964_vm3, %v1096_v63, -inf }
 0x1d4   : > { %v1161_v51 = vpop.f32.mrf.mxu1  ;;  %1035 = vmax.xlane.f32.xlu1 %v1034_v50 }
 0x1d5   : > { %v970_v53 = vpop.xlane.xlu2 %969  ;;  %v1166_v57 = vsel %vm964_vm3, %v1161_v51, -inf }
 0x1d6   : > { %v972_v55 = vsub.f32 %v961_v41, %v970_v53 }
 0x1d8   : > { %v975_v56 = vmul.f32 1.442695, %v972_v55  ;;  %v1915_v60 = vpop.eup %1914 }
 0x1da   : > { %1916 = vpow2.f32 %v975_v56  ;;  %1118 = vrot.lane.b32.xlu0 %v942_v37, %s1996_s14  ;;  %s2429_s14 = sld [smem:[#allocation18_spill]] }
 0x1dc   : > { %v1163_v58 = vpop.f32.mrf.mxu1  ;;  %1167 = vmax.xlane.f32.xlu1 %v1166_v57 }
 0x1dd   : > { %v1169_v59 = vsel %vm964_vm3, %v1163_v58, -inf }
 0x1de   : > { %1170 = vmax.xlane.f32.xlu2 %v1169_v59 }
 0x1e0   : > { %v1917_v61 = vpop.eup %1916  ;;  %s2430_s25 = scalar_lea.vmem %s2429_s14, %s2127_s30 }
 0x1e1   : > { %v983_v62 = vpack.c.bf16 %v1917_v61, %v1915_v60  ;;  %v980_v39 = vsel %vm964_vm3, %v1917_v61, 0.0 }
 0x1e3   : > { %1776 = vmatmul.msk.bf16.vlgmr.msrb.gmra.mxu0 %vm964_vm3, %v983_v62 }
 0x1e6   : > { %1103 = vmax.xlane.f32.xlu2 %v1102_v0 }
 0x1f5   : > { %1185 = vrot.lane.b32.xlu1 %v942_v37, %s1998_s19  ;;  %v977_v37 = vsel %vm964_vm3, %v1915_v60, 0.0 }
 0x239   : > { %v1033_v1 = vpop.xlane.xlu0 %1032 }
 0x23a   : > { %v1037_v2 = vsub.f32 %v1026_v43, %v1033_v1 }
 0x23c   : > { %v1039_v3 = vmul.f32 1.442695, %v1037_v2 }
 0x23e   : > { %1918 = vpow2.f32 %v1039_v3 }
 0x23f   : > { %v1101_v4 = vpop.xlane.xlu1 %1100 }
 0x240   : > { %v1105_v5 = vsub.f32 %v1094_v45, %v1101_v4 }
 0x242   : > { %v1107_v8 = vmul.f32 1.442695, %v1105_v5 }
 0x244   : > { %v1919_v9 = vpop.eup %1918  ;;  %1920 = vpow2.f32 %v1107_v8  ;;  %v1835_v8 = vld [vmem:[%s2159_s24 + $0x8] sm:$0xff] }
 0x245   : > { %v1043_v10 = vsel %vm964_vm3, %v1919_v9, 0.0  ;;  %1270 = vmatpush.bf16.msra.mxu3 %v1835_v8 }
 0x246   : > { %1044 = vadd.xlane.f32.xlu2 %v1043_v10 }
 0x247   : > { %v1036_v11 = vpop.xlane.xlu1 %1035 }
 0x248   : > { %v1038_v12 = vsub.f32 %v1028_v47, %v1036_v11 }
 0x24a   : > { %v1921_v13 = vpop.eup %1920  ;;  %v1041_v14 = vmul.f32 1.442695, %v1038_v12 }
 0x24b   : > { %v1111_v16 = vsel %vm964_vm3, %v1921_v13, 0.0 }
 0x24c   : > { %1922 = vpow2.f32 %v1041_v14  ;;  %v1119_v15 = vpop.permute.xlu0 %1118 }
 0x24d   : > { %1131 = vmatpush.bf16.msra.mxu0 %v1119_v15 }
 0x24e   : > { %1112 = vadd.xlane.f32.xlu2 %v1111_v16 }
 0x24f   : > { %v1168_v17 = vpop.xlane.xlu1 %1167 }
 0x250   : > { %v1172_v18 = vsub.f32 %v1161_v51, %v1168_v17 }
 0x251   : > { %v1171_v19 = vpop.xlane.xlu2 %1170 }
 0x252   : > { %v1923_v20 = vpop.eup %1922  ;;  %v1174_v21 = vmul.f32 1.442695, %v1172_v18  ;;  %v1173_v24 = vsub.f32 %v1163_v58, %v1171_v19 }
 0x253   : > { %v1046_v22 = vsel %vm964_vm3, %v1923_v20, 0.0  ;;  %v1049_v23 = vpack.c.bf16 %v1923_v20, %v1919_v9  ;;  %v1834_v9 = vld [vmem:[%s2159_s24] sm:$0xff] }
 0x254   : > { %1924 = vpow2.f32 %v1174_v21  ;;  %1047 = vadd.xlane.f32.xlu0 %v1046_v22  ;;  %v1176_v29 = vmul.f32 1.442695, %v1173_v24  ;;  %1271 = vmatpush.bf16.msra.mxu3 %v1834_v9 }
 0x255   : > { %1778 = vmatmul.msk.bf16.vlgmr.msrb.gmra.mxu2 %vm964_vm3, %v1049_v23 }
 0x259   : > { %v1104_v25 = vpop.xlane.xlu2 %1103 }
 0x25a   : > { %v1925_v26 = vpop.eup %1924  ;;  %v1106_v27 = vsub.f32 %v1096_v63, %v1104_v25 }
 0x25b   : > { %v1178_v28 = vsel %vm964_vm3, %v1925_v26, 0.0 }
 0x25c   : > { %v1109_v30 = vmul.f32 1.442695, %v1106_v27  ;;  %1179 = vadd.xlane.f32.xlu1 %v1178_v28 }
 0x25e   : > { %1926 = vpow2.f32 %v1109_v30 }
 0x25f   : > { %1928 = vpow2.f32 %v1176_v29 }
 0x260   : > { %v996_v42 = vpop.f32.mrf.mxu0 }
 0x264   : > { %v1927_v31 = vpop.eup %1926 }
 0x265   : > { %v1117_v32 = vpack.c.bf16 %v1927_v31, %v1921_v13  ;;  %v1114_v33 = vsel %vm964_vm3, %v1927_v31, 0.0  ;;  %v1929_v34 = vpop.eup %1928  ;;  %v1907_v31 = vld [vmem:[%s2424_s26] ss:$0 sm:$0xff] }
 0x266   : > { %1115 = vadd.xlane.f32.xlu2 %v1114_v33  ;;  %v1184_v36 = vpack.c.bf16 %v1929_v34, %v1925_v26  ;;  %v1181_v38 = vsel %vm964_vm3, %v1929_v34, 0.0 }
 0x267   : > { %v1186_v35 = vpop.permute.xlu1 %1185  ;;  %1780 = vmatmul.msk.bf16.vlgmr.msra.gmra.mxu0 %vm964_vm3, %v1117_v32 }
 0x268   : > { %1198 = vmatpush.bf16.msra.mxu2 %v1186_v35  ;;  %v998_v46 = vpop.f32.mrf.mxu0 }
 0x26b   : > { %1782 = vmatmul.msk.bf16.vlgmr.msra.gmra.mxu2 %vm964_vm3, %v1184_v36 }
 0x26e   : > { %978 = vadd.xlane.f32.xlu2 %v977_v37 }
 0x276   : > { %1182 = vadd.xlane.f32.xlu2 %v1181_v38 }
 0x27e   : > { %981 = vadd.xlane.f32.xlu2 %v980_v39 }
 0x2b9   : > { %v1045_v40 = vpop.xlane.xlu2 %1044 }
 0x2ba   : > { %1930 = vrcp.f32 %v1045_v40  ;;  %v2002_v40 = vmov 32.0  }
 0x2c0   : > { %v1931_v47 = vpop.eup %1930 }
 0x2c1   : > { %v1113_v41 = vpop.xlane.xlu2 %1112 }
 0x2c7   : > { %v1048_v43 = vpop.xlane.xlu0 %1047 }
 0x2c8   : > { %1932 = vrcp.f32 %v1048_v43 }
 0x2c9   : > { %1934 = vrcp.f32 %v1113_v41 }
 0x2ce   : > { %v1933_v48 = vpop.eup %1932 }
 0x2cf   : > { %v1935_v55 = vpop.eup %1934  ;;  %v1180_v57 = vpop.xlane.xlu1 %1179 }
 0x2d8   : > { %v1066_v44 = vpop.f32.mrf.mxu2 }
 0x2d9   : > { %v1116_v45 = vpop.xlane.xlu2 %1115  ;;  %v1073_v50 = vmul.f32 %v1931_v47, %v1066_v44 }
 0x2da   : > { %1936 = vrcp.f32 %v1116_v45 }
 0x2db   : > { %1938 = vrcp.f32 %v1180_v57 }
 0x2e0   : > { %v1068_v49 = vpop.f32.mrf.mxu2  ;;  %v1937_v56 = vpop.eup %1936 }
 0x2e1   : > { %v1074_v51 = vmul.f32 %v1933_v48, %v1068_v49  ;;  %v979_v53 = vpop.xlane.xlu2 %978  ;;  %v1939_v0 = vpop.eup %1938 }
 0x2e3   : > { %v1889_v52 = vpack.i.bf16 %v1074_v51, %v1073_v50 }
 0x2e4   : > { %v1133_v54 = vpop.f32.mrf.mxu0 }
 0x2e5   : > { %1890 = vrot.lane.b32.xlu0 %v1889_v52, %s1999_s15  ;;  %v1140_v59 = vmul.f32 %v1935_v55, %v1133_v54  ;;  %v1837_v55 = vld [vmem:[%s2176_s29 + $0x8] sm:$0xff] }
 0x2e6   : > { %1373 = vmatpush.bf16.msrb.mxu0 %v1837_v55 }
 0x2e9   : > { %v1183_v60 = vpop.xlane.xlu2 %1182 }
 0x2ea   : > { %1940 = vrcp.f32 %v1183_v60 }
 0x2eb   : > { %1942 = vrcp.f32 %v979_v53 }
 0x2ec   : > { %v1135_v58 = vpop.f32.mrf.mxu0 }
 0x2ed   : > { %v1141_v61 = vmul.f32 %v1937_v56, %v1135_v58 }
 0x2ee   : > { %v1200_v62 = vpop.f32.mrf.mxu2 }
 0x2ef   : > { %v1894_v63 = vpack.i.bf16 %v1141_v61, %v1140_v59  ;;  %v1207_v3 = vmul.f32 %v1939_v0, %v1200_v62  ;;  %v1836_v59 = vld [vmem:[%s2176_s29] sm:$0xff] }
 0x2f0   : > { %v1941_v1 = vpop.eup %1940  ;;  %1374 = vmatpush.bf16.msrb.mxu0 %v1836_v59 }
 0x2f1   : > { %1895 = vrot.lane.b32.xlu2 %v1894_v63, %s2000_s1  ;;  %v982_v10 = vpop.xlane.xlu2 %981  ;;  %v1943_v12 = vpop.eup %1942 }
 0x2f2   : > { %1944 = vrcp.f32 %v982_v10  ;;  %v1003_v16 = vmul.f32 %v1943_v12, %v996_v42 }
 0x2f3   : > { %1946 = vrcp.f32 %v2002_v40 }
 0x2f6   : > { %v1202_v2 = vpop.f32.mrf.mxu2 }
 0x2f7   : > { %v1208_v4 = vmul.f32 %v1941_v1, %v1202_v2 }
 0x2f8   : > { %v1945_v13 = vpop.eup %1944 }
 0x2f9   : > { %v1899_v5 = vpack.i.bf16 %v1208_v4, %v1207_v3  ;;  %v1004_v17 = vmul.f32 %v1945_v13, %v998_v46  ;;  %v1947_v41 = vpop.eup %1946  ;;  %v1908_v13 = vld [vmem:[%s2426_s3] ss:$0 sm:$0xff] }
 0x2fa   : > { %v1289_v42 = vmul.f32 32.0, %v1947_v41  ;;  %vm1293_vm5 = vweird.f32 %v1947_v41 }
 0x2fb   : > { %1900 = vrot.lane.b32.xlu1 %v1899_v5, %s2001_s20 }
 0x2fc   : > { %v1290_v43 = vsub.f32 1.0, %v1289_v42 }
 0x2fe   : > { %v1291_v44 = vmul.f32 %v1947_v41, %v1290_v43 }
 0x300   : > { %v1292_v45 = vadd.f32 %v1947_v41, %v1291_v44 }
 0x34b   : > { %v1896_v18 = vpop.permute.xlu2 %1895 }
 0x34c   : > { %v1898_v21 = vunpack.i.h.bf16 %v1896_v18  ;;  %v1897_v22 = vunpack.i.l.bf16 %v1896_v18 }
 0x357   : > { %v1891_v11 = vpop.permute.xlu0 %1890 }
 0x358   : > { %v1893_v14 = vunpack.i.h.bf16 %v1891_v11  ;;  %v1892_v15 = vunpack.i.l.bf16 %v1891_v11 }
 0x35a   : > { %v1233_v19 = vsel %vm943_vm2, %v1003_v16, %v1892_v15  ;;  %v1234_v20 = vsel %vm943_vm2, %v1004_v17, %v1893_v14  ;;  %v1909_v17 = vld [vmem:[%s2428_s27] ss:$0 sm:$0xff] }
 0x35b   : > { %v1235_v26 = vsel %vm964_vm3, %v1233_v19, %v1897_v22  ;;  %v1236_v27 = vsel %vm964_vm3, %v1234_v20, %v1898_v21 }
 0x36d   : > { %v1901_v23 = vpop.permute.xlu1 %1900 }
 0x36e   : > { %v1903_v24 = vunpack.i.h.bf16 %v1901_v23  ;;  %v1902_v25 = vunpack.i.l.bf16 %v1901_v23 }
 0x370   : > { %v1238_v28 = vsel %vm1237_vm4, %v1235_v26, %v1902_v25  ;;  %v1239_v29 = vsel %vm1237_vm4, %v1236_v27, %v1903_v24  ;;  %v1841_v24 = vld [vmem:[%s2190_s9 + $0x18] sm:$0xff]  ;;  %v1840_v25 = vld [vmem:[%s2190_s9 + $0x10] sm:$0xff]  ;;  %v1839_v26 = vld [vmem:[%s2190_s9 + $0x8] sm:$0xff] }
 0x371   : > { %v1240_v30 = vpack.c.bf16 %v1239_v29, %v1238_v28  ;;  %1428 = vmatpush.bf16.msrb.mxu1 %v1841_v24  ;;  %v1838_v27 = vld [vmem:[%s2190_s9] sm:$0xff] }
 0x372   : > { %v1910_v29 = vld [vmem:[%s2430_s25] ss:$0 sm:$0xff] }
 0x373   : > { %1791 = vmatmul.msk.bf16.vlgmr.msra.gmra.mxu3 %vm854_vm1, %v1240_v30 }
 0x375   : > { %1429 = vmatpush.bf16.msrb.mxu1 %v1840_v25 }
 0x379   : > { %1430 = vmatpush.bf16.msrb.mxu1 %v1839_v26 }
 0x37d   : > { %1431 = vmatpush.bf16.msrb.mxu1 %v1838_v27 }
 0x3f6   : > { %v1273_v32 = vpop.f32.mrf.mxu3 }
 0x3f7   : > { %v1274_v33 = vadd.f32 %v1907_v31, %v1273_v32 }
 0x3f9   : > { %v1278_v34 = vadd.f32 %v1274_v33, %v2209_v6  ;;  %v2286_v6 = vsel %vm1293_vm5, %v1947_v41, %v1292_v45 }
 0x3fb   : > { %v1282_v35 = vsel %vm854_vm1, %v1278_v34, 0.0 }
 0x3fc   : > { %1283 = vadd.xlane.f32.xlu0 %v1282_v35 }
 0x3fe   : > { %v1275_v36 = vpop.f32.mrf.mxu3 }
 0x3ff   : > { %v1276_v37 = vadd.f32 %v1907_v31, %v1275_v36  ;;  %v1911_v36 = vld [vmem:[%s809_s8] ss:$0 sm:$0xff] }
 0x401   : > { %v1279_v38 = vadd.f32 %v1276_v37, %v2212_v7 }
 0x403   : > { %v1285_v39 = vsel %vm854_vm1, %v1279_v38, 0.0 }
 0x404   : > { %1286 = vadd.xlane.f32.xlu2 %v1285_v39 }
 0x46f   : > { %v1284_v46 = vpop.xlane.xlu0 %1283 }
 0x470   : > { %v1295_v47 = vmul.f32 %v2286_v6, %v1284_v46 }
 0x472   : > { %v1297_v48 = vsub.f32 %v1278_v34, %v1295_v47 }
 0x474   : > { %v1299_v7 = vmul.f32 %v1297_v48, %v1297_v48 }
 0x476   : > { %v1301_v49 = vsel %vm854_vm1, %v1299_v7, 0.0 }
 0x477   : > { %v1287_v50 = vpop.xlane.xlu2 %1286  ;;  %1302 = vadd.xlane.f32.xlu1 %v1301_v49 }
 0x478   : > { %v1296_v51 = vmul.f32 %v2286_v6, %v1287_v50 }
 0x47a   : > { %v1298_v52 = vsub.f32 %v1279_v38, %v1296_v51 }
 0x47c   : > { %v1300_v53 = vmul.f32 %v1298_v52, %v1298_v52 }
 0x47e   : > { %v1304_v54 = vsel %vm854_vm1, %v1300_v53, 0.0 }
 0x47f   : > { %1305 = vadd.xlane.f32.xlu0 %v1304_v54 }
 0x4ea   : > { %v1303_v56 = vpop.xlane.xlu1 %1302 }
 0x4eb   : > { %v1307_v57 = vmul.f32 %v1303_v56, %v2286_v6 }
 0x4ed   : > { %v1309_v58 = vadd.f32 1e-05, %v1307_v57 }
 0x4ef   : > { %1948 = vrsqrt.f32 %v1309_v58  ;;  %vm1317_vm7 = vweird.f32 %v1309_v58 }
 0x4f2   : > { %v1306_v60 = vpop.xlane.xlu0 %1305 }
 0x4f3   : > { %v1308_v61 = vmul.f32 %v1306_v60, %v2286_v6 }
 0x4f5   : > { %v1949_v62 = vpop.eup %1948  ;;  %v1310_v63 = vadd.f32 1e-05, %v1308_v61 }
 0x4f6   : > { %v1312_v0 = vmul.f32 %v1949_v62, %v1309_v58  ;;  %vm1318_vm6 = vweird.f32 %v1949_v62 }
 0x4f7   : > { %1950 = vrsqrt.f32 %v1310_v63  ;;  %vm1319_vm8 = vmor %vm1317_vm7, %vm1318_vm6  ;;  %vm1327_vm10 = vweird.f32 %v1310_v63 }
 0x4f8   : > { %v1313_v1 = vmul.f32 %v1949_v62, %v1312_v0 }
 0x4fa   : > { %v1314_v2 = vmul.f32 0.5, %v1313_v1 }
 0x4fc   : > { %v1315_v3 = vsub.f32 1.5, %v1314_v2 }
 0x4fd   : > { %v1951_v4 = vpop.eup %1950 }
 0x4fe   : > { %v1316_v5 = vmul.f32 %v1949_v62, %v1315_v3  ;;  %v1322_v8 = vmul.f32 %v1951_v4, %v1310_v63  ;;  %vm1328_vm9 = vweird.f32 %v1951_v4 }
 0x4ff   : > { %vm1329_vm11 = vmor %vm1327_vm10, %vm1328_vm9 }
 0x500   : > { %v1323_v9 = vmul.f32 %v1951_v4, %v1322_v8  ;;  %v1320_v10 = vsel %vm1319_vm8, %v1949_v62, %v1316_v5  ;;  %v1913_v8 = vld [vmem:[%s815_s10] ss:$0 sm:$0xff] }
 0x501   : > { %v1331_v14 = vmul.f32 %v1320_v10, %v1297_v48 }
 0x502   : > { %v1324_v11 = vmul.f32 0.5, %v1323_v9 }
 0x503   : > { %v1336_v18 = vmul.f32 %v1908_v13, %v1331_v14 }
 0x504   : > { %v1325_v12 = vsub.f32 1.5, %v1324_v11 }
 0x505   : > { %v1341_v21 = vadd.f32 %v1909_v17, %v1336_v18 }
 0x506   : > { %v1326_v15 = vmul.f32 %v1951_v4, %v1325_v12 }
 0x508   : > { %v1330_v16 = vsel %vm1329_vm11, %v1951_v4, %v1326_v15  ;;  %v1912_v4 = vld [vmem:[%s812_s4] ss:$0 sm:$0xff] }
 0x509   : > { %v1332_v19 = vmul.f32 %v1330_v16, %v1298_v52 }
 0x50b   : > { %v1337_v20 = vmul.f32 %v1908_v13, %v1332_v19 }
 0x50d   : > { %v1342_v22 = vadd.f32 %v1909_v17, %v1337_v20 }
 0x50f   : > { %v1343_v23 = vpack.c.bf16 %v1342_v22, %v1341_v21 }
 0x511   : > { %1800 = vmatmul.msk.bf16.vlgmr.msrb.gmra.mxu0 %vm854_vm1, %v1343_v23 }
 0x58e   : > { %v1376_v28 = vpop.f32.mrf.mxu0 }
 0x58f   : > { %v1377_v30 = vadd.f32 %v1910_v29, %v1376_v28 }
 0x591   : > { %v1381_v33 = vmax.f32 %v1377_v30, 0.0 }
 0x596   : > { %v1378_v31 = vpop.f32.mrf.mxu0 }
 0x597   : > { %v1379_v32 = vadd.f32 %v1910_v29, %v1378_v31 }
 0x599   : > { %v1382_v34 = vmax.f32 %v1379_v32, 0.0 }
 0x59b   : > { %v1383_v35 = vpack.c.bf16 %v1382_v34, %v1381_v33 }
 0x59d   : > { %1817 = vmatmul.msk.bf16.vlgmr.msrb.gmra.mxu1 %vm1420_vm12, %v1383_v35 }
 0x61a   : > { %v1433_v37 = vpop.f32.mrf.mxu1 }
 0x61b   : > { %v1434_v38 = vadd.f32 %v1911_v36, %v1433_v37 }
 0x61d   : > { %v1438_v39 = vadd.f32 %v1434_v38, %v1341_v21 }
 0x61f   : > { %v1442_v40 = vsel %vm854_vm1, %v1438_v39, 0.0 }
 0x620   : > { %1443 = vadd.xlane.f32.xlu2 %v1442_v40 }
 0x622   : > { %v1435_v41 = vpop.f32.mrf.mxu1 }
 0x623   : > { %v1436_v42 = vadd.f32 %v1911_v36, %v1435_v41 }
 0x625   : > { %v1439_v43 = vadd.f32 %v1436_v42, %v1342_v22 }
 0x627   : > { %v1445_v44 = vsel %vm854_vm1, %v1439_v43, 0.0 }
 0x628   : > { %1446 = vadd.xlane.f32.xlu0 %v1445_v44 }
 0x693   : > { %v1444_v45 = vpop.xlane.xlu2 %1443 }
 0x694   : > { %v1448_v46 = vmul.f32 %v1444_v45, %v2286_v6 }
 0x696   : > { %v1450_v47 = vsub.f32 %v1438_v39, %v1448_v46 }
 0x698   : > { %v1452_v48 = vmul.f32 %v1450_v47, %v1450_v47 }
 0x69a   : > { %v1454_v7 = vsel %vm854_vm1, %v1452_v48, 0.0 }
 0x69b   : > { %v1447_v49 = vpop.xlane.xlu0 %1446  ;;  %1455 = vadd.xlane.f32.xlu2 %v1454_v7 }
 0x69c   : > { %v1449_v50 = vmul.f32 %v1447_v49, %v2286_v6 }
 0x69e   : > { %v1451_v51 = vsub.f32 %v1439_v43, %v1449_v50 }
 0x6a0   : > { %v1453_v52 = vmul.f32 %v1451_v51, %v1451_v51 }
 0x6a2   : > { %v1457_v53 = vsel %vm854_vm1, %v1453_v52, 0.0 }
 0x6a3   : > { %1458 = vadd.xlane.f32.xlu0 %v1457_v53 }
 0x70e   : > { %v1456_v54 = vpop.xlane.xlu2 %1455 }
 0x70f   : > { %v1460_v55 = vmul.f32 %v1456_v54, %v2286_v6 }
 0x711   : > { %v1462_v56 = vadd.f32 1e-05, %v1460_v55 }
 0x713   : > { %1952 = vrsqrt.f32 %v1462_v56  ;;  %vm1470_vm14 = vweird.f32 %v1462_v56 }
 0x716   : > { %v1459_v57 = vpop.xlane.xlu0 %1458 }
 0x717   : > { %v1461_v58 = vmul.f32 %v1459_v57, %v2286_v6 }
 0x719   : > { %v1953_v59 = vpop.eup %1952  ;;  %v1463_v60 = vadd.f32 1e-05, %v1461_v58 }
 0x71a   : > { %v1465_v61 = vmul.f32 %v1953_v59, %v1462_v56  ;;  %vm1471_vm13 = vweird.f32 %v1953_v59 }
 0x71b   : > { %1954 = vrsqrt.f32 %v1463_v60  ;;  %vm1472_vm15 = vmor %vm1470_vm14, %vm1471_vm13  ;;  %vm1480_vm2 = vweird.f32 %v1463_v60 }
 0x71c   : > { %v1466_v62 = vmul.f32 %v1953_v59, %v1465_v61 }
 0x71e   : > { %v1467_v63 = vmul.f32 0.5, %v1466_v62 }
 0x720   : > { %v1468_v0 = vsub.f32 1.5, %v1467_v63 }
 0x721   : > { %v1955_v1 = vpop.eup %1954 }
 0x722   : > { %v1469_v2 = vmul.f32 %v1953_v59, %v1468_v0  ;;  %v1475_v3 = vmul.f32 %v1955_v1, %v1463_v60  ;;  %vm1481_vm0 = vweird.f32 %v1955_v1 }
 0x723   : > { %vm1482_vm3 = vmor %vm1480_vm2, %vm1481_vm0 }
 0x724   : > { %v1473_v6 = vsel %vm1472_vm15, %v1953_v59, %v1469_v2  ;;  %v1476_v5 = vmul.f32 %v1955_v1, %v1475_v3 }
 0x725   : > { %v1484_v9 = vmul.f32 %v1473_v6, %v1450_v47 }
 0x726   : > { %v1477_v10 = vmul.f32 0.5, %v1476_v5 }
 0x727   : > { %v1489_v11 = vmul.f32 %v1912_v4, %v1484_v9 }
 0x728   : > { %v1478_v12 = vsub.f32 1.5, %v1477_v10 }
 0x729   : > { %v1494_v13 = vadd.f32 %v1913_v8, %v1489_v11 }
 0x72a   : > { %v1479_v14 = vmul.f32 %v1955_v1, %v1478_v12 }
 0x72b   : > { %1496 = vst.msk [vmem:[%s2203_s12] sm:$0xff] %vm854_vm1, %v1494_v13 }
 0x72c   : > { %v1483_v15 = vsel %vm1482_vm3, %v1955_v1, %v1479_v14 }
 0x72d   : > { %v1485_v16 = vmul.f32 %v1483_v15, %v1451_v51 }
 0x72f   : > { %v1490_v17 = vmul.f32 %v1912_v4, %v1485_v16 }
 0x731   : > { %v1495_v18 = vadd.f32 %v1913_v8, %v1490_v17 }
 0x733   : > { %1497 = vst.msk [vmem:[%s2203_s12 + $0x8] sm:$0xff] %vm854_vm1, %v1495_v18 }
 0x734 PF: > { %s2434_s30 = sld [smem:[#allocation5_spill]] }
 0x735   : > { %s2435_s24 = sld [smem:[#allocation3_spill]] }
 0x736   : > { %s2436_s25 = sld [smem:[#allocation4_spill]] }
 0x737   : > { %s2437_s26 = sld [smem:[#allocation6_spill]] }
 0x738   : > { %s2438_s27 = sld [smem:[#allocation7_spill]] }
 0x73a   : > { %s27_s28 = sadd.s32 1, %s2434_s30  }
 0x73b   : > { %p24_p8 = scmp.ge.s32.totalorder %s27_s28, 6  }
 0x73d   :  { %26 = sbr.rel (!%p24_p8) target bundleno = 17 (0x11), region = 170 }

// kernel: kuzushiji_transformer_forward.6
= control target key start
LH: loop header
LB: loop body
LE: loop exit
PB: predicated region body
PF: predicated region fallthrough
CT: control target
= control target key end

     0   :  { %s3378_s30 = smov 0   ;;  %s3821_s0 = inlined_call_operand.vmem [shape: f32[2,16,32], index: 0, kind: input, shape index: {}]   ;;  %s3822_s1 = inlined_call_operand.vmem [shape: f32[2,16,32], index: 1, kind: input, shape index: {}]   ;;  %s3823_s2 = inlined_call_operand.vmem [shape: bf16[2,32,32], index: 2, kind: input, shape index: {}]   ;;  %s3824_s3 = inlined_call_operand.vmem [shape: f32[2,1,32], index: 3, kind: input, shape index: {}]   ;;  %s3825_s4 = inlined_call_operand.vmem [shape: bf16[2,32,32], index: 4, kind: input, shape index: {}]   ;;  %s3826_s5 = inlined_call_operand.vmem [shape: f32[2,1,32], index: 5, kind: input, shape index: {}]   ;;  %s3827_s6 = inlined_call_operand.vmem [shape: bf16[2,32,32], index: 6, kind: input, shape index: {}]   ;;  %s3828_s7 = inlined_call_operand.vmem [shape: f32[2,1,32], index: 7, kind: input, shape index: {}]   ;;  %s3829_s8 = inlined_call_operand.vmem [shape: bf16[2,32,32], index: 8, kind: input, shape index: {}]   ;;  %s3830_s9 = inlined_call_operand.vmem [shape: f32[2,1,32], index: 9, kind: input, shape index: {}]   ;;  %s3831_s10 = inlined_call_operand.vmem [shape: f32[2,1,32], index: 10, kind: input, shape index: {}]   ;;  %s3832_s11 = inlined_call_operand.vmem [shape: f32[2,1,32], index: 11, kind: input, shape index: {}]   ;;  %s3833_s12 = inlined_call_operand.vmem [shape: bf16[2,32,32], index: 12, kind: input, shape index: {}]   ;;  %s3834_s13 = inlined_call_operand.vmem [shape: f32[2,1,32], index: 13, kind: input, shape index: {}]   ;;  %s3835_s14 = inlined_call_operand.vmem [shape: bf16[2,32,32], index: 14, kind: input, shape index: {}]   ;;  %s3836_s15 = inlined_call_operand.vmem [shape: f32[2,1,32], index: 15, kind: input, shape index: {}]   ;;  %s3837_s16 = inlined_call_operand.vmem [shape: bf16[2,32,32], index: 16, kind: input, shape index: {}]   ;;  %s3838_s17 = inlined_call_operand.vmem [shape: f32[2,1,32], index: 17, kind: input, shape index: {}]   ;;  %s3839_s18 = inlined_call_operand.vmem [shape: bf16[2,32,32], index: 18, kind: input, shape index: {}]   ;;  %s3840_s19 = inlined_call_operand.vmem [shape: f32[2,1,32], index: 19, kind: input, shape index: {}]   ;;  %s3841_s20 = inlined_call_operand.vmem [shape: f32[2,1,32], index: 20, kind: input, shape index: {}]   ;;  %s3842_s21 = inlined_call_operand.vmem [shape: f32[2,1,32], index: 21, kind: input, shape index: {}]   ;;  %s3843_s22 = inlined_call_operand.vmem [shape: bf16[2,32,64], index: 22, kind: input, shape index: {}]   ;;  %s3844_s23 = inlined_call_operand.vmem [shape: f32[2,1,64], index: 23, kind: input, shape index: {}]   ;;  %s3845_s24 = inlined_call_operand.vmem [shape: bf16[2,64,32], index: 24, kind: input, shape index: {}]   ;;  %s3846_s25 = inlined_call_operand.vmem [shape: f32[2,1,32], index: 25, kind: input, shape index: {}]   ;;  %s3847_s26 = inlined_call_operand.vmem [shape: f32[2,1,32], index: 26, kind: input, shape index: {}]   ;;  %s3848_s27 = inlined_call_operand.vmem [shape: f32[2,1,32], index: 27, kind: input, shape index: {}]   ;;  %s3849_s28 = inlined_call_operand.vmem [shape: f32[2,16,32], index: 28, kind: output, shape index: {}]  }
   0x1   :  { %3860 = sst [smem:[#allocation14_spill]] %s3821_s0 }
   0x2   :  { %3861 = sst [smem:[#allocation15_spill]] %s3822_s1 }
   0x3   :  { %3862 = sst [smem:[#allocation16_spill]] %s3823_s2 }
   0x4   :  { %3863 = sst [smem:[#allocation17_spill]] %s3824_s3  ;;  %s3380_s3 = smov 0  }
   0x5   :  { %3864 = sst [smem:[#allocation18_spill]] %s3825_s4 }
   0x6   :  { %3865 = sst [smem:[#allocation19_spill]] %s3826_s5  ;;  %s3374_s5 = smov 0  }
   0x7   :  { %3866 = sst [smem:[#allocation20_spill]] %s3827_s6 }
   0x8   :  { %3867 = sst [smem:[#allocation21_spill]] %s3828_s7 }
   0x9   :  { %3868 = sst [smem:[#allocation22_spill]] %s3829_s8  ;;  %s3372_s8 = smov 0  }
   0xa   :  { %3869 = sst [smem:[#allocation23_spill]] %s3830_s9  ;;  %s3376_s9 = smov 0  }
   0xb   :  { %3870 = sst [smem:[#allocation24_spill]] %s3831_s10 }
   0xc   :  { %3871 = sst [smem:[#allocation25_spill]] %s3832_s11 }
   0xd   :  { %3872 = sst [smem:[#allocation26_spill]] %s3833_s12 }
   0xe   :  { %3873 = sst [smem:[#allocation27_spill]] %s3835_s14 }
   0xf   :  { %3874 = sst [smem:[#allocation28_spill]] %s3837_s16 }
  0x10   :  { %3875 = sst [smem:[#allocation29_spill]] %s3839_s18 }
  0x11   :  { %3876 = sst [smem:[#allocation30_spill]] %s3840_s19 }
  0x12   :  { %3877 = sst [smem:[#allocation31_spill]] %s3841_s20 }
  0x13   :  { %3878 = sst [smem:[#allocation32_spill]] %s3842_s21 }
  0x14   :  { %3879 = sst [smem:[#allocation33_spill]] %s3843_s22 }
  0x15   :  { %3880 = sst [smem:[#allocation34_spill]] %s3844_s23 }
  0x16   :  { %3881 = sst [smem:[#allocation35_spill]] %s3845_s24 }
  0x17   :  { %3882 = sst [smem:[#allocation36_spill]] %s3846_s25 }
  0x18   :  { %3883 = sst [smem:[#allocation37_spill]] %s3847_s26 }
  0x19   :  { %3884 = sst [smem:[#allocation38_spill]] %s3848_s27 }
  0x1a   :  { %3885 = sst [smem:[#allocation39_spill]] %s3849_s28 }
  0x1b LB: > { %3886 = sst [smem:[#allocation2_spill]] %s3202_s8  ;;  %s47_s6 = sadd.s32 1, %s3210_s9  ;;  %s3218_s3 = sphi %s3380_s3, %s38_s3   ;;  %s3214_s30 = sphi %s3378_s30, %s3961_s30   ;;  %s3210_s9 = sphi %s3376_s9, %s3960_s9   ;;  %s3206_s5 = sphi %s3374_s5, %s3959_s5   ;;  %s3202_s8 = sphi %s3372_s8, %s3958_s8  }
  0x1c   : > { %3887 = sst [smem:[#allocation3_spill]] %s3210_s9  ;;  %s50_s10 = sadd.s32 1, %s3214_s30 }
  0x1d   : > { %3888 = sst [smem:[#allocation4_spill]] %s3214_s30  ;;  %p48_p0 = scmp.ge.s32.totalorder %s47_s6, 2 }
  0x1e   : > { %3889 = sst [smem:[#allocation5_spill]] %s3218_s3  ;;  %p2830_p1 = scmp.ge.s32.totalorder %s3218_s3, 1 }
  0x1f   : > { %p1012_p2 = scmp.lt.s32.totalorder %s3218_s3, 5  ;;  %s3963_s6 = smov (%p48_p0, %s47_s6), 0 }
  0x20   : > { %3890 = sst [smem:[#allocation6_spill]] %s3963_s6  ;;  %s3965_s10 = smov (!%p48_p0, %s50_s10), %s3214_s30 }
  0x21   : > { %p1013_p3 = pnand %p2830_p1, %p1012_p2  ;;  %p52_p4 = scmp.ge.s32.totalorder %s3965_s10, 2 }
  0x23   : > { %s3967_s10 = smov (%p52_p4, %s3965_s10), 0  ;;  %1016 = sbr.rel (%p1013_p3) target bundleno = 3097 (0xc19), region = 132 }
  0x24   : > { %3891 = sst [smem:[#allocation7_spill]] %s3967_s10 }
  0x28   : > { %p1189_p5 = scmp.lt.s32.totalorder %s3206_s5, 1  ;;  %p1199_p6 = scmp.lt.s32.totalorder %s3202_s8, 1 }
  0x29   : > { %s3892_s7 = sld [smem:[#allocation14_spill]] }
  0x2a   : > { %s3969_s5 = smov (!%p1189_p5, %s3206_s5), 1  ;;  %s3894_s10 = sld [smem:[#allocation15_spill]] }
  0x2b   : > { %s3406_s0 = scalar_select %p1199_p6, %s3202_s8, 1 }
  0x2c   : > { %s3408_s11 = sshll.u32 %s3969_s5, 4  ;;  %s3897_s26 = sld [smem:[#allocation16_spill]] }
  0x2d   : > { %s2976_s30 = sshll.u32 %s3406_s0, 4  ;;  %s3902_s3 = sld [smem:[#allocation20_spill]] }
  0x2e   : > { %s3905_s2 = sld [smem:[#allocation22_spill]] }
  0x2f   : > { %s3414_s12 = scalar_lea.vmem %s3892_s7, %s3408_s11  ;;  %s3899_s7 = sld [smem:[#allocation18_spill]] }
  0x30   : > { %3893 = sst [smem:[#allocation8_spill]] %s3414_s12  ;;  %s3420_s6 = scalar_lea.vmem %s3894_s10, %s3408_s11 }
  0x31   : > { %3895 = sst [smem:[#allocation9_spill]] %s3420_s6 }
  0x32   : > { %s3430_s25 = scalar_lea.vmem %s3897_s26, %s2976_s30  ;;  %s3910_s14 = sld [smem:[#allocation27_spill]] }
  0x33   : > { %3898 = sst [smem:[#allocation10_spill]] %s3430_s25  ;;  %s3444_s8 = scalar_lea.vmem %s3902_s3, %s2976_s30 }
  0x34   : > { %3903 = sst [smem:[#allocation12_spill]] %s3444_s8 }
  0x35   : > { %s3435_s12 = scalar_lea.vmem %s3899_s7, %s2976_s30  ;;  %s3453_s7 = scalar_lea.vmem %s3905_s2, %s2976_s30 }
  0x36   : > { %3900 = sst [smem:[#allocation11_spill]] %s3435_s12 }
  0x37   : > { %s3909_s25 = sld [smem:[#allocation26_spill]] }
  0x38   : > { %s3479_s6 = scalar_lea.vmem %s3910_s14, %s2976_s30  ;;  %s3911_s16 = sld [smem:[#allocation28_spill]] }
  0x39   : > { %s3912_s18 = sld [smem:[#allocation29_spill]] }
  0x3a   : > { %s3919_s3 = sld [smem:[#allocation35_spill]] }
  0x3b   : > { %s3920_s22 = sld [smem:[#allocation36_spill]] }
  0x3c   : > { %s3921_s21 = sld [smem:[#allocation37_spill]] }
  0x3d   : > { %s3470_s29 = scalar_lea.vmem %s3909_s25, %s2976_s30  ;;  %s3917_s25 = sld [smem:[#allocation33_spill]] }
  0x3e   : > { %s3488_s26 = scalar_lea.vmem %s3911_s16, %s2976_s30  ;;  %s3923_s2 = sld [smem:[#allocation39_spill]] }
  0x3f   : > { %s3497_s1 = scalar_lea.vmem %s3912_s18, %s2976_s30  ;;  %s3924_s27 = sld [smem:[#allocation2_spill]] }
  0x40   : > { %3913 = sst [smem:[#allocation13_spill]] %s3497_s1  ;;  %s2985_s1 = sshll.u32 %s3406_s0, 5 }
  0x41   : > { %s3524_s19 = scalar_lea.vmem %s3919_s3, %s2985_s1  ;;  %s1290_s24 = scalar_lea.vmem %s3920_s22, %s3406_s0 }
  0x42   : > { %s1293_s14 = scalar_lea.vmem %s3921_s21, %s3406_s0 }
  0x43   : > { %s3514_s5 = scalar_lea.vmem %s3917_s25, %s2976_s30  ;;  %s3922_s25 = sld [smem:[#allocation38_spill]] }
  0x44   : > { %s3542_s18 = scalar_lea.vmem %s3923_s2, %s3408_s11 }
  0x45   : > { %p2857_p7 = scmp.ne.s32.totalorder %s3924_s27, 0 }
  0x46   : > { %s3925_s3 = sld [smem:[#allocation8_spill]] (!%p2857_p7) }
  0x47   : > { %1306 = sbr.rel (%p2857_p7) target bundleno = 79 (0x4f), region = 136 }
  0x49   : > { %s1296_s20 = scalar_lea.vmem %s3922_s25, %s3406_s0 }
  0x4c   : > { %v1307_v0 = vld [vmem:[%s3925_s3] sm:$0xff]  ;;  %vm1309_vm0 = vcmask 261120   ;;  %v1308_v1 = vld [vmem:[%s3925_s3 + $0x8] sm:$0xff] }
  0x4d   : > { %1310 = vst.msk [vmem:[%s3542_s18] sm:$0xff] %vm1309_vm0, %v1307_v0 }
  0x4e   : > { %1311 = vst.msk [vmem:[%s3542_s18 + $0x8] sm:$0xff] %vm1309_vm0, %v1308_v1 }
  0x4f PF: > { %s3926_s21 = sld [smem:[#allocation10_spill]]  ;;  %vm1337_vm1 = vcmask 261120   ;;  %vm1426_vm2 = vcmask 64512   ;;  %s3220_s25 = smov 112   ;;  %vm1447_vm3 = vcmask 130048   ;;  %vm1720_vm4 = vcmask 195584  }
  0x50   : > { %s3927_s4 = sld [smem:[#allocation11_spill]]  ;;  %s3221_s12 = smov 120  }
  0x51   : > { %s3928_s11 = sld [smem:[#allocation12_spill]]  ;;  %s3222_s16 = smov 104  }
  0x52   : > { %s3929_s10 = sld [smem:[#allocation17_spill]]  ;;  %s3225_s22 = smov 24  }
  0x53   : > { %s3931_s30 = sld [smem:[#allocation19_spill]]  ;;  %s3942_s1 = scalar_lea.vmem %s3836_s15, %s3406_s0 }
  0x54   : > { %v3554_v6 = vld [vmem:[%s3542_s18] sm:$0xff]  ;;  %s3933_s3 = sld [smem:[#allocation21_spill]] }
  0x55   : > { %v2988_v2 = vld [vmem:[%s3926_s21 + $0x8] sm:$0xff]  ;;  %v2987_v4 = vld [vmem:[%s3926_s21] sm:$0xff]  ;;  %s3937_s8 = sld [smem:[#allocation9_spill]] }
  0x56   : > { %v2990_v3 = vld [vmem:[%s3927_s4 + $0x8] sm:$0xff]  ;;  %v2989_v5 = vld [vmem:[%s3927_s4] sm:$0xff]  ;;  %1347 = vmatpush.bf16.msra.mxu0 %v2988_v2  ;;  %s3223_s4 = smov 8   ;;  %s3938_s9 = sld [smem:[#allocation24_spill]] }
  0x57   : > { %1381 = vmatpush.bf16.msra.mxu1 %v2990_v3  ;;  %v3557_v7 = vld [vmem:[%s3542_s18 + $0x8] sm:$0xff]  ;;  %v2991_v10 = vld [vmem:[%s3928_s11] sm:$0xff]  ;;  %s3940_s27 = sld [smem:[#allocation25_spill]] }
  0x58   : > { %v1316_v8 = vpack.c.bf16 %v3557_v7, %v3554_v6  ;;  %v2992_v9 = vld [vmem:[%s3928_s11 + $0x8] sm:$0xff]  ;;  %s3930_s23 = scalar_lea.vmem %s3929_s10, %s3406_s0  ;;  %s3224_s11 = smov 16  }
  0x59   : > { %1415 = vmatpush.bf16.msra.mxu2 %v2992_v9  ;;  %v3086_v13 = vld [vmem:[%s3930_s23] ss:$0 sm:$0xff]  ;;  %s3932_s28 = scalar_lea.vmem %s3931_s30, %s3406_s0  ;;  %s3935_s10 = sld [smem:[#allocation23_spill]] }
  0x5a   : > { %1348 = vmatpush.bf16.msra.mxu0 %v2987_v4  ;;  %v3087_v14 = vld [vmem:[%s3932_s28] ss:$0 sm:$0xff]  ;;  %s3934_s21 = scalar_lea.vmem %s3933_s3, %s3406_s0 }
  0x5b   : > { %1382 = vmatpush.bf16.msra.mxu1 %v2989_v5  ;;  %v3088_v30 = vld [vmem:[%s3934_s21] ss:$0 sm:$0xff] }
  0x5c   : > { %s3939_s30 = scalar_lea.vmem %s3938_s9, %s3406_s0  ;;  %s3948_s9 = sld [smem:[#allocation31_spill]] }
  0x5d   : > { %2866 = vmatmul.msk.bf16.vlgmr.msra.gmra.mxu0 %vm1337_vm1, %v1316_v8  ;;  %1416 = vmatpush.bf16.msra.mxu2 %v2991_v10  ;;  %s3941_s3 = scalar_lea.vmem %s3940_s27, %s3406_s0  ;;  %s3950_s27 = sld [smem:[#allocation32_spill]] }
  0x5e   : > { %2875 = vmatmul.msk.bf16.vlgmr.msra.gmra.mxu1 %vm1337_vm1, %v1316_v8 }
  0x5f   : > { %s3936_s23 = scalar_lea.vmem %s3935_s10, %s3406_s0 }
  0x60   : > { %2884 = vmatmul.msk.bf16.vlgmr.msra.gmra.mxu2 %vm1337_vm1, %v1316_v8 }
  0xda   : > { %v1350_v11 = vpop.f32.mrf.mxu0 }
  0xdb   : > { %v1384_v12 = vpop.f32.mrf.mxu1  ;;  %v1351_v15 = vadd.f32 %v3086_v13, %v1350_v11 }
  0xdc   : > { %v1385_v18 = vadd.f32 %v3087_v14, %v1384_v12 }
  0xe2   : > { %v1352_v16 = vpop.f32.mrf.mxu0 }
  0xe3   : > { %v1386_v17 = vpop.f32.mrf.mxu1  ;;  %v1353_v19 = vadd.f32 %v3086_v13, %v1352_v16  ;;  %v1418_v28 = vpop.f32.mrf.mxu2 }
  0xe4   : > { %v1387_v20 = vadd.f32 %v3087_v14, %v1386_v17  ;;  %v1419_v34 = vadd.f32 %v3088_v30, %v1418_v28 }
  0xe5   : > { %v1423_v21 = vpack.c.bf16 %v1353_v19, %v1351_v15 }
  0xe6   : > { %v1424_v22 = vpack.c.bf16 %v1387_v20, %v1385_v18 }
  0xe7   : > { %1558 = vrot.lane.b32.xlu2 %v1423_v21, %s3220_s25 }
  0xe8   : > { %1560 = vrot.lane.b32.xlu1 %v1424_v22, %s3220_s25  ;;  %1492 = vrot.lane.b32.xlu0 %v1424_v22, %s3221_s12  ;;  %v1431_v23 = vsel %vm1426_vm2, %v1424_v22, 0 }
  0xe9   : > { %1440 = vmatpush.bf16.xpose.msra.mxu3 %v1431_v23 }
  0xeb   : > { %v1420_v35 = vpop.f32.mrf.mxu2 }
  0xec   : > { %v1421_v36 = vadd.f32 %v3088_v30, %v1420_v35 }
  0xee   : > { %v1425_v37 = vpack.c.bf16 %v1421_v36, %v1419_v34 }
  0xef   : > { %1625 = vrot.lane.b32.xlu2 %v1423_v21, %s3222_s16 }
  0xf0   : > { %1627 = vrot.lane.b32.xlu1 %v1424_v22, %s3222_s16  ;;  %1489 = vrot.lane.b32.xlu0 %v1423_v21, %s3221_s12 }
  0xf1   : > { %2885 = vmatmul.msk.bf16.vlgmr.msra.gmra.mxu3 %vm1426_vm2, %v1423_v21  ;;  %1477 = vmatpush.bf16.msrb.mxu0 %v1425_v37 }
  0xf8   : > { %1534 = vrot.lane.b32.xlu0 %v1425_v37, %s3221_s12 }
 0x141   : > { %v1559_v29 = vpop.permute.xlu2 %1558 }
 0x149   : > { %v1626_v38 = vpop.permute.xlu2 %1625 }
 0x15a   : > { %v1561_v24 = vpop.permute.xlu1 %1560  ;;  %v1493_v25 = vpop.permute.xlu0 %1492 }
 0x15b   : > { %v1498_v26 = vsel %vm1426_vm2, %v1493_v25, 0  ;;  %v1566_v27 = vsel %vm1426_vm2, %v1561_v24, 0 }
 0x15c   : > { %1507 = vmatpush.bf16.xpose.msrb.mxu1 %v1498_v26  ;;  %1575 = vmatpush.bf16.xpose.msrb.mxu3 %v1566_v27 }
 0x162   : > { %v1628_v31 = vpop.permute.xlu1 %1627  ;;  %v1490_v32 = vpop.permute.xlu0 %1489 }
 0x163   : > { %v1633_v33 = vsel %vm1426_vm2, %v1628_v31, 0  ;;  %2887 = vmatmul.msk.bf16.vlgmr.msrb.gmra.mxu1 %vm1426_vm2, %v1490_v32  ;;  %2889 = vmatmul.msk.bf16.vlgmr.msrb.gmra.mxu3 %vm1426_vm2, %v1559_v29 }
 0x164   : > { %1642 = vmatpush.bf16.xpose.msra.mxu1 %v1633_v33 }
 0x16a   : > { %v1535_v54 = vpop.permute.xlu0 %1534 }
 0x16b   : > { %1547 = vmatpush.bf16.msrb.mxu2 %v1535_v54 }
 0x173   : > { %2891 = vmatmul.msk.bf16.vlgmr.msra.gmra.mxu1 %vm1426_vm2, %v1626_v38 }
 0x174   : > { %v1442_v39 = vpop.f32.mrf.mxu3 }
 0x175   : > { %v1448_v40 = vsel %vm1447_vm3, %v1442_v39, -inf }
 0x176   : > { %1449 = vmax.xlane.f32.xlu2 %v1448_v40 }
 0x17c   : > { %v1444_v41 = vpop.f32.mrf.mxu3 }
 0x17d   : > { %v1451_v42 = vsel %vm1447_vm3, %v1444_v41, -inf }
 0x17e   : > { %1452 = vmax.xlane.f32.xlu2 %v1451_v42 }
 0x1e0   : > { %v1509_v43 = vpop.f32.mrf.mxu1 }
 0x1e1   : > { %v1514_v44 = vsel %vm1447_vm3, %v1509_v43, -inf }
 0x1e2   : > { %1515 = vmax.xlane.f32.xlu0 %v1514_v44 }
 0x1e6   : > { %v1577_v45 = vpop.f32.mrf.mxu3 }
 0x1e7   : > { %v1582_v46 = vsel %vm1447_vm3, %v1577_v45, -inf }
 0x1e8   : > { %v1511_v47 = vpop.f32.mrf.mxu1  ;;  %1583 = vmax.xlane.f32.xlu1 %v1582_v46 }
 0x1e9   : > { %v1450_v48 = vpop.xlane.xlu2 %1449  ;;  %v1517_v50 = vsel %vm1447_vm3, %v1511_v47, -inf }
 0x1ea   : > { %v1454_v49 = vsub.f32 %v1442_v39, %v1450_v48 }
 0x1ec   : > { %v1456_v52 = vmul.f32 1.442695, %v1454_v49 }
 0x1ee   : > { %3102 = vpow2.f32 %v1456_v52  ;;  %v1579_v63 = vpop.f32.mrf.mxu3 }
 0x1ef   : > { %v1585_v0 = vsel %vm1447_vm3, %v1579_v63, -inf }
 0x1f0   : > { %v1644_v51 = vpop.f32.mrf.mxu1  ;;  %1518 = vmax.xlane.f32.xlu1 %v1517_v50 }
 0x1f1   : > { %v1453_v53 = vpop.xlane.xlu2 %1452  ;;  %v1649_v57 = vsel %vm1447_vm3, %v1644_v51, -inf }
 0x1f2   : > { %v1455_v55 = vsub.f32 %v1444_v41, %v1453_v53 }
 0x1f4   : > { %v1458_v56 = vmul.f32 1.442695, %v1455_v55  ;;  %v3103_v60 = vpop.eup %3102 }
 0x1f6   : > { %3104 = vpow2.f32 %v1458_v56  ;;  %1601 = vrot.lane.b32.xlu0 %v1425_v37, %s3220_s25 }
 0x1f8   : > { %v1646_v58 = vpop.f32.mrf.mxu1  ;;  %1650 = vmax.xlane.f32.xlu1 %v1649_v57 }
 0x1f9   : > { %v1652_v59 = vsel %vm1447_vm3, %v1646_v58, -inf }
 0x1fa   : > { %1653 = vmax.xlane.f32.xlu2 %v1652_v59 }
 0x1fc   : > { %v3105_v61 = vpop.eup %3104 }
 0x1fd   : > { %v1466_v62 = vpack.c.bf16 %v3105_v61, %v3103_v60  ;;  %v1463_v39 = vsel %vm1447_vm3, %v3105_v61, 0.0 }
 0x1ff   : > { %2886 = vmatmul.msk.bf16.vlgmr.msrb.gmra.mxu0 %vm1447_vm3, %v1466_v62 }
 0x202   : > { %1586 = vmax.xlane.f32.xlu2 %v1585_v0 }
 0x211   : > { %1668 = vrot.lane.b32.xlu1 %v1425_v37, %s3222_s16  ;;  %v1460_v37 = vsel %vm1447_vm3, %v3103_v60, 0.0 }
 0x255   : > { %v1516_v1 = vpop.xlane.xlu0 %1515 }
 0x256   : > { %v1520_v2 = vsub.f32 %v1509_v43, %v1516_v1 }
 0x258   : > { %v1522_v3 = vmul.f32 1.442695, %v1520_v2 }
 0x25a   : > { %3106 = vpow2.f32 %v1522_v3 }
 0x25b   : > { %v1584_v4 = vpop.xlane.xlu1 %1583 }
 0x25c   : > { %v1588_v5 = vsub.f32 %v1577_v45, %v1584_v4 }
 0x25e   : > { %v1590_v8 = vmul.f32 1.442695, %v1588_v5 }
 0x260   : > { %v3107_v9 = vpop.eup %3106  ;;  %3108 = vpow2.f32 %v1590_v8  ;;  %v2994_v8 = vld [vmem:[%s3453_s7 + $0x8] sm:$0xff] }
 0x261   : > { %v1526_v10 = vsel %vm1447_vm3, %v3107_v9, 0.0  ;;  %1753 = vmatpush.bf16.msra.mxu3 %v2994_v8 }
 0x262   : > { %1527 = vadd.xlane.f32.xlu2 %v1526_v10 }
 0x263   : > { %v1519_v11 = vpop.xlane.xlu1 %1518 }
 0x264   : > { %v1521_v12 = vsub.f32 %v1511_v47, %v1519_v11 }
 0x266   : > { %v3109_v13 = vpop.eup %3108  ;;  %v1524_v14 = vmul.f32 1.442695, %v1521_v12 }
 0x267   : > { %v1594_v16 = vsel %vm1447_vm3, %v3109_v13, 0.0 }
 0x268   : > { %3110 = vpow2.f32 %v1524_v14  ;;  %v1602_v15 = vpop.permute.xlu0 %1601 }
 0x269   : > { %1614 = vmatpush.bf16.msra.mxu0 %v1602_v15 }
 0x26a   : > { %1595 = vadd.xlane.f32.xlu2 %v1594_v16 }
 0x26b   : > { %v1651_v17 = vpop.xlane.xlu1 %1650 }
 0x26c   : > { %v1655_v18 = vsub.f32 %v1644_v51, %v1651_v17 }
 0x26d   : > { %v1654_v19 = vpop.xlane.xlu2 %1653 }
 0x26e   : > { %v3111_v20 = vpop.eup %3110  ;;  %v1657_v21 = vmul.f32 1.442695, %v1655_v18  ;;  %v1656_v24 = vsub.f32 %v1646_v58, %v1654_v19 }
 0x26f   : > { %v1529_v22 = vsel %vm1447_vm3, %v3111_v20, 0.0  ;;  %v1532_v23 = vpack.c.bf16 %v3111_v20, %v3107_v9  ;;  %v2993_v9 = vld [vmem:[%s3453_s7] sm:$0xff] }
 0x270   : > { %3112 = vpow2.f32 %v1657_v21  ;;  %1530 = vadd.xlane.f32.xlu0 %v1529_v22  ;;  %v1659_v29 = vmul.f32 1.442695, %v1656_v24  ;;  %1754 = vmatpush.bf16.msra.mxu3 %v2993_v9 }
 0x271   : > { %2888 = vmatmul.msk.bf16.vlgmr.msrb.gmra.mxu2 %vm1447_vm3, %v1532_v23 }
 0x275   : > { %v1587_v25 = vpop.xlane.xlu2 %1586 }
 0x276   : > { %v3113_v26 = vpop.eup %3112  ;;  %v1589_v27 = vsub.f32 %v1579_v63, %v1587_v25 }
 0x277   : > { %v1661_v28 = vsel %vm1447_vm3, %v3113_v26, 0.0 }
 0x278   : > { %v1592_v30 = vmul.f32 1.442695, %v1589_v27  ;;  %1662 = vadd.xlane.f32.xlu1 %v1661_v28 }
 0x27a   : > { %3114 = vpow2.f32 %v1592_v30 }
 0x27b   : > { %3116 = vpow2.f32 %v1659_v29 }
 0x27c   : > { %v1479_v42 = vpop.f32.mrf.mxu0 }
 0x280   : > { %v3115_v31 = vpop.eup %3114 }
 0x281   : > { %v1600_v32 = vpack.c.bf16 %v3115_v31, %v3109_v13  ;;  %v1597_v33 = vsel %vm1447_vm3, %v3115_v31, 0.0  ;;  %v3117_v34 = vpop.eup %3116  ;;  %v3089_v31 = vld [vmem:[%s3936_s23] ss:$0 sm:$0xff] }
 0x282   : > { %1598 = vadd.xlane.f32.xlu2 %v1597_v33  ;;  %v1667_v36 = vpack.c.bf16 %v3117_v34, %v3113_v26  ;;  %v1664_v38 = vsel %vm1447_vm3, %v3117_v34, 0.0 }
 0x283   : > { %v1669_v35 = vpop.permute.xlu1 %1668  ;;  %2890 = vmatmul.msk.bf16.vlgmr.msra.gmra.mxu0 %vm1447_vm3, %v1600_v32 }
 0x284   : > { %1681 = vmatpush.bf16.msra.mxu2 %v1669_v35  ;;  %v1481_v46 = vpop.f32.mrf.mxu0 }
 0x287   : > { %2892 = vmatmul.msk.bf16.vlgmr.msra.gmra.mxu2 %vm1447_vm3, %v1667_v36 }
 0x28a   : > { %1461 = vadd.xlane.f32.xlu2 %v1460_v37 }
 0x292   : > { %1665 = vadd.xlane.f32.xlu2 %v1664_v38 }
 0x29a   : > { %1464 = vadd.xlane.f32.xlu2 %v1463_v39 }
 0x2d5   : > { %v1528_v40 = vpop.xlane.xlu2 %1527 }
 0x2d6   : > { %3118 = vrcp.f32 %v1528_v40  ;;  %v3226_v40 = vmov 32.0  }
 0x2dc   : > { %v3119_v47 = vpop.eup %3118 }
 0x2dd   : > { %v1596_v41 = vpop.xlane.xlu2 %1595 }
 0x2e3   : > { %v1531_v43 = vpop.xlane.xlu0 %1530 }
 0x2e4   : > { %3120 = vrcp.f32 %v1531_v43  ;;  %v2998_v43 = vld [vmem:[%s3479_s6 + $0x8] sm:$0xff] }
 0x2e5   : > { %3122 = vrcp.f32 %v1596_v41  ;;  %1894 = vmatpush.bf16.msrb.mxu1 %v2998_v43 }
 0x2ea   : > { %v3121_v48 = vpop.eup %3120 }
 0x2eb   : > { %v3123_v55 = vpop.eup %3122  ;;  %v1663_v57 = vpop.xlane.xlu1 %1662 }
 0x2f4   : > { %v1549_v44 = vpop.f32.mrf.mxu2 }
 0x2f5   : > { %v1599_v45 = vpop.xlane.xlu2 %1598  ;;  %v1556_v50 = vmul.f32 %v3119_v47, %v1549_v44 }
 0x2f6   : > { %3124 = vrcp.f32 %v1599_v45 }
 0x2f7   : > { %3126 = vrcp.f32 %v1663_v57  ;;  %v1314_v57 = vld [vmem:[%s3937_s8] sm:$0xff] }
 0x2fc   : > { %v1551_v49 = vpop.f32.mrf.mxu2  ;;  %v3125_v56 = vpop.eup %3124 }
 0x2fd   : > { %v1557_v51 = vmul.f32 %v3121_v48, %v1551_v49  ;;  %v1462_v53 = vpop.xlane.xlu2 %1461  ;;  %v3127_v0 = vpop.eup %3126 }
 0x2ff   : > { %v3056_v52 = vpack.i.bf16 %v1557_v51, %v1556_v50 }
 0x300   : > { %v1616_v54 = vpop.f32.mrf.mxu0 }
 0x301   : > { %3057 = vrot.lane.b32.xlu0 %v3056_v52, %s3223_s4  ;;  %v1623_v59 = vmul.f32 %v3123_v55, %v1616_v54 }
 0x305   : > { %v1666_v60 = vpop.xlane.xlu2 %1665 }
 0x306   : > { %3128 = vrcp.f32 %v1666_v60  ;;  %v2996_v60 = vld [vmem:[%s3470_s29 + $0x8] sm:$0xff] }
 0x307   : > { %3130 = vrcp.f32 %v1462_v53  ;;  %1857 = vmatpush.bf16.msrb.mxu0 %v2996_v60 }
 0x308   : > { %v1618_v58 = vpop.f32.mrf.mxu0 }
 0x309   : > { %v1624_v61 = vmul.f32 %v3125_v56, %v1618_v58  ;;  %v2997_v56 = vld [vmem:[%s3479_s6] sm:$0xff]  ;;  %v1315_v58 = vld [vmem:[%s3937_s8 + $0x8] sm:$0xff]  ;;  %s3943_s8 = scalar_lea.vmem %s3834_s13, %s3406_s0  ;;  %s3944_s6 = scalar_lea.vmem %s3838_s17, %s3406_s0 }
 0x30a   : > { %v1683_v62 = vpop.f32.mrf.mxu2  ;;  %1895 = vmatpush.bf16.msrb.mxu1 %v2997_v56 }
 0x30b   : > { %v3061_v63 = vpack.i.bf16 %v1624_v61, %v1623_v59  ;;  %v1690_v3 = vmul.f32 %v3127_v0, %v1683_v62  ;;  %v3649_v59 = vpack.c.bf16 %v1315_v58, %v1314_v57  ;;  %v2995_v0 = vld [vmem:[%s3470_s29] sm:$0xff] }
 0x30c   : > { %v3129_v1 = vpop.eup %3128  ;;  %1858 = vmatpush.bf16.msrb.mxu0 %v2995_v0  ;;  %v3094_v58 = vld [vmem:[%s3944_s6] ss:$0 sm:$0xff] }
 0x30d   : > { %3062 = vrot.lane.b32.xlu2 %v3061_v63, %s3224_s11  ;;  %v1465_v10 = vpop.xlane.xlu2 %1464  ;;  %v3131_v12 = vpop.eup %3130  ;;  %2919 = vmatmul.msk.bf16.vlgmr.msrb.gmra.mxu1 %vm1337_vm1, %v3649_v59 }
 0x30e   : > { %3132 = vrcp.f32 %v1465_v10  ;;  %v1486_v16 = vmul.f32 %v3131_v12, %v1479_v42 }
 0x30f   : > { %3134 = vrcp.f32 %v3226_v40 }
 0x312   : > { %v1685_v2 = vpop.f32.mrf.mxu2 }
 0x313   : > { %v1691_v4 = vmul.f32 %v3129_v1, %v1685_v2 }
 0x314   : > { %v3133_v13 = vpop.eup %3132 }
 0x315   : > { %v3066_v5 = vpack.i.bf16 %v1691_v4, %v1690_v3  ;;  %v1487_v17 = vmul.f32 %v3133_v13, %v1481_v46  ;;  %v3135_v41 = vpop.eup %3134 }
 0x316   : > { %v1772_v42 = vmul.f32 32.0, %v3135_v41  ;;  %vm1776_vm5 = vweird.f32 %v3135_v41 }
 0x317   : > { %3067 = vrot.lane.b32.xlu1 %v3066_v5, %s3225_s22 }
 0x318   : > { %v1773_v44 = vsub.f32 1.0, %v1772_v42 }
 0x31a   : > { %v1774_v45 = vmul.f32 %v3135_v41, %v1773_v44 }
 0x367   : > { %v3063_v18 = vpop.permute.xlu2 %3062 }
 0x368   : > { %v3065_v21 = vunpack.i.h.bf16 %v3063_v18  ;;  %v3064_v22 = vunpack.i.l.bf16 %v3063_v18  ;;  %v3090_v18 = vld [vmem:[%s3939_s30] ss:$0 sm:$0xff]  ;;  %s3949_s30 = scalar_lea.vmem %s3948_s9, %s3406_s0 }
 0x373   : > { %v3058_v11 = vpop.permute.xlu0 %3057 }
 0x374   : > { %v3060_v14 = vunpack.i.h.bf16 %v3058_v11  ;;  %v3059_v15 = vunpack.i.l.bf16 %v3058_v11 }
 0x376   : > { %v1716_v19 = vsel %vm1426_vm2, %v1486_v16, %v3059_v15  ;;  %v1717_v20 = vsel %vm1426_vm2, %v1487_v17, %v3060_v14 }
 0x377   : > { %v1718_v26 = vsel %vm1447_vm3, %v1716_v19, %v3064_v22  ;;  %v1719_v27 = vsel %vm1447_vm3, %v1717_v20, %v3065_v21  ;;  %v3091_v22 = vld [vmem:[%s3941_s3] ss:$0 sm:$0xff]  ;;  %s3951_s3 = scalar_lea.vmem %s3950_s27, %s3406_s0 }
 0x389   : > { %v3068_v23 = vpop.permute.xlu1 %3067 }
 0x38a   : > { %v3070_v24 = vunpack.i.h.bf16 %v3068_v23  ;;  %v3069_v25 = vunpack.i.l.bf16 %v3068_v23 }
 0x38c   : > { %v1721_v28 = vsel %vm1720_vm4, %v1718_v26, %v3069_v25  ;;  %v1722_v29 = vsel %vm1720_vm4, %v1719_v27, %v3070_v24 }
 0x38d   : > { %v1723_v30 = vpack.c.bf16 %v1722_v29, %v1721_v28  ;;  %v1897_v29 = vpop.f32.mrf.mxu1 }
 0x38f   : > { %2901 = vmatmul.msk.bf16.vlgmr.msra.gmra.mxu3 %vm1337_vm1, %v1723_v30  ;;  %v3092_v30 = vld [vmem:[%s3942_s1] ss:$0 sm:$0xff]  ;;  %s3952_s1 = sld [smem:[#allocation34_spill]] }
 0x395   : > { %s3953_s10 = scalar_lea.vmem %s3952_s1, %s3406_s0 }
 0x412   : > { %v1756_v32 = vpop.f32.mrf.mxu3 }
 0x413   : > { %v1757_v33 = vadd.f32 %v3089_v31, %v1756_v32  ;;  %v1899_v32 = vpop.f32.mrf.mxu1 }
 0x415   : > { %v1761_v34 = vadd.f32 %v1757_v33, %v3554_v6  ;;  %v1775_v6 = vadd.f32 %v3135_v41, %v1774_v45  ;;  %v1900_v33 = vadd.f32 %v3092_v30, %v1899_v32 }
 0x417   : > { %v1765_v35 = vsel %vm1337_vm1, %v1761_v34, 0.0  ;;  %v3640_v46 = vsel %vm1776_vm5, %v3135_v41, %v1775_v6  ;;  %v3000_v6 = vld [vmem:[%s3488_s26 + $0x8] sm:$0xff] }
 0x418   : > { %1766 = vadd.xlane.f32.xlu0 %v1765_v35  ;;  %1928 = vmatpush.bf16.msrb.mxu2 %v3000_v6 }
 0x41a   : > { %v1758_v36 = vpop.f32.mrf.mxu3 }
 0x41b   : > { %v1759_v37 = vadd.f32 %v3089_v31, %v1758_v36  ;;  %v1898_v31 = vadd.f32 %v3092_v30, %v1897_v29 }
 0x41d   : > { %v1762_v38 = vadd.f32 %v1759_v37, %v3557_v7  ;;  %v3093_v37 = vld [vmem:[%s3943_s8] ss:$0 sm:$0xff] }
 0x41f   : > { %v1768_v39 = vsel %vm1337_vm1, %v1762_v38, 0.0 }
 0x420   : > { %1769 = vadd.xlane.f32.xlu2 %v1768_v39 }
 0x48b   : > { %v1767_v47 = vpop.xlane.xlu0 %1766 }
 0x48c   : > { %v1778_v7 = vmul.f32 %v3640_v46, %v1767_v47  ;;  %v2999_v47 = vld [vmem:[%s3488_s26] sm:$0xff] }
 0x48d   : > { %1929 = vmatpush.bf16.msrb.mxu2 %v2999_v47 }
 0x48e   : > { %v1780_v48 = vsub.f32 %v1761_v34, %v1778_v7  ;;  %v1937_v34 = vpack.c.bf16 %v1900_v33, %v1898_v31 }
 0x490   : > { %v1782_v49 = vmul.f32 %v1780_v48, %v1780_v48  ;;  %2003 = vrot.lane.b32.xlu2 %v1937_v34, %s3221_s12  ;;  %v1943_v35 = vsel %vm1426_vm2, %v1937_v34, 0  ;;  %2928 = vmatmul.msk.bf16.vlgmr.msrb.gmra.mxu2 %vm1337_vm1, %v3649_v59 }
 0x491   : > { %1952 = vmatpush.bf16.xpose.msrb.mxu3 %v1943_v35 }
 0x492   : > { %v1784_v50 = vsel %vm1337_vm1, %v1782_v49, 0.0 }
 0x493   : > { %v1770_v51 = vpop.xlane.xlu2 %1769  ;;  %1785 = vadd.xlane.f32.xlu1 %v1784_v50 }
 0x494   : > { %v1779_v52 = vmul.f32 %v3640_v46, %v1770_v51 }
 0x496   : > { %v1781_v53 = vsub.f32 %v1762_v38, %v1779_v52 }
 0x498   : > { %v1783_v54 = vmul.f32 %v1781_v53, %v1781_v53 }
 0x49a   : > { %v1787_v55 = vsel %vm1337_vm1, %v1783_v54, 0.0 }
 0x49b   : > { %1788 = vadd.xlane.f32.xlu0 %v1787_v55 }
 0x4ac   : > { %2071 = vrot.lane.b32.xlu1 %v1937_v34, %s3220_s25 }
 0x4ea   : > { %v2004_v42 = vpop.permute.xlu2 %2003 }
 0x4eb   : > { %v2009_v43 = vsel %vm1426_vm2, %v2004_v42, 0 }
 0x4ec   : > { %2018 = vmatpush.bf16.xpose.msra.mxu1 %v2009_v43 }
 0x506   : > { %v1786_v61 = vpop.xlane.xlu1 %1785 }
 0x507   : > { %v1790_v62 = vmul.f32 %v1786_v61, %v3640_v46 }
 0x509   : > { %v1792_v63 = vadd.f32 1e-05, %v1790_v62 }
 0x50b   : > { %3136 = vrsqrt.f32 %v1792_v63  ;;  %vm1800_vm7 = vweird.f32 %v1792_v63 }
 0x50e   : > { %v1789_v1 = vpop.xlane.xlu0 %1788 }
 0x50f   : > { %v1791_v2 = vmul.f32 %v1789_v1, %v3640_v46 }
 0x511   : > { %v3137_v3 = vpop.eup %3136  ;;  %v1793_v4 = vadd.f32 1e-05, %v1791_v2 }
 0x512   : > { %v1795_v5 = vmul.f32 %v3137_v3, %v1792_v63  ;;  %vm1801_vm6 = vweird.f32 %v3137_v3 }
 0x513   : > { %3138 = vrsqrt.f32 %v1793_v4  ;;  %vm1802_vm8 = vmor %vm1800_vm7, %vm1801_vm6  ;;  %vm1810_vm10 = vweird.f32 %v1793_v4  ;;  %v1931_v57 = vpop.f32.mrf.mxu2 }
 0x514   : > { %v1796_v8 = vmul.f32 %v3137_v3, %v1795_v5  ;;  %v1932_v60 = vadd.f32 %v3094_v58, %v1931_v57 }
 0x516   : > { %v1797_v9 = vmul.f32 0.5, %v1796_v8 }
 0x518   : > { %v1798_v10 = vsub.f32 1.5, %v1797_v9 }
 0x519   : > { %v3139_v11 = vpop.eup %3138 }
 0x51a   : > { %v1799_v12 = vmul.f32 %v3137_v3, %v1798_v10  ;;  %v1805_v13 = vmul.f32 %v3139_v11, %v1793_v4  ;;  %vm1811_vm9 = vweird.f32 %v3139_v11 }
 0x51b   : > { %vm1812_vm11 = vmor %vm1810_vm10, %vm1811_vm9  ;;  %v1933_v62 = vpop.f32.mrf.mxu2 }
 0x51c   : > { %v1806_v14 = vmul.f32 %v3139_v11, %v1805_v13  ;;  %v1803_v15 = vsel %vm1802_vm8, %v3137_v3, %v1799_v12  ;;  %v1934_v63 = vadd.f32 %v3094_v58, %v1933_v62 }
 0x51d   : > { %v1814_v19 = vmul.f32 %v1803_v15, %v1780_v48 }
 0x51e   : > { %v1807_v16 = vmul.f32 0.5, %v1806_v14  ;;  %v2072_v44 = vpop.permute.xlu1 %2071  ;;  %v1938_v0 = vpack.c.bf16 %v1934_v63, %v1932_v60 }
 0x51f   : > { %v1819_v23 = vmul.f32 %v3090_v18, %v1814_v19  ;;  %v2077_v45 = vsel %vm1426_vm2, %v2072_v44, 0 }
 0x520   : > { %v1808_v17 = vsub.f32 1.5, %v1807_v16  ;;  %2086 = vmatpush.bf16.xpose.msra.mxu3 %v2077_v45  ;;  %1988 = vmatpush.bf16.msra.mxu0 %v1938_v0 }
 0x521   : > { %v3667_v26 = vadd.f32 %v3091_v22, %v1819_v23 }
 0x522   : > { %v1809_v20 = vmul.f32 %v3139_v11, %v1808_v17 }
 0x524   : > { %v1813_v21 = vsel %vm1812_vm11, %v3139_v11, %v1809_v20 }
 0x525   : > { %v1815_v24 = vmul.f32 %v1813_v21, %v1781_v53 }
 0x527   : > { %v1820_v25 = vmul.f32 %v3090_v18, %v1815_v24 }
 0x529   : > { %v3669_v27 = vadd.f32 %v3091_v22, %v1820_v25 }
 0x52b   : > { %v1826_v28 = vpack.c.bf16 %v3669_v27, %v3667_v26 }
 0x52d   : > { %2910 = vmatmul.msk.bf16.vlgmr.msrb.gmra.mxu0 %vm1337_vm1, %v1826_v28 }
 0x5aa   : > { %v1860_v36 = vpop.f32.mrf.mxu0 }
 0x5ab   : > { %v1861_v39 = vadd.f32 %v3093_v37, %v1860_v36 }
 0x5b2   : > { %v1862_v38 = vpop.f32.mrf.mxu0 }
 0x5b3   : > { %v1863_v40 = vadd.f32 %v3093_v37, %v1862_v38 }
 0x5b5   : > { %v1936_v41 = vpack.c.bf16 %v1863_v40, %v1861_v39 }
 0x5b7   : > { %2069 = vrot.lane.b32.xlu2 %v1936_v41, %s3220_s25  ;;  %2000 = vrot.lane.b32.xlu0 %v1936_v41, %s3221_s12 }
 0x5b8   : > { %2929 = vmatmul.msk.bf16.vlgmr.msrb.gmra.mxu3 %vm1426_vm2, %v1936_v41 }
 0x5bf   : > { %2138 = vrot.lane.b32.xlu0 %v1937_v34, %s3222_s16 }
 0x5c7   : > { %2136 = vrot.lane.b32.xlu0 %v1936_v41, %s3222_s16 }
 0x611   : > { %v2070_v7 = vpop.permute.xlu2 %2069 }
 0x612   : > { %2933 = vmatmul.msk.bf16.vlgmr.msra.gmra.mxu3 %vm1426_vm2, %v2070_v7 }
 0x629   : > { %v2001_v48 = vpop.permute.xlu0 %2000 }
 0x62a   : > { %2931 = vmatmul.msk.bf16.vlgmr.msra.gmra.mxu1 %vm1426_vm2, %v2001_v48 }
 0x631   : > { %v2139_v49 = vpop.permute.xlu0 %2138 }
 0x632   : > { %v2144_v50 = vsel %vm1426_vm2, %v2139_v49, 0 }
 0x633   : > { %2153 = vmatpush.bf16.xpose.msrb.mxu1 %v2144_v50 }
 0x639   : > { %v2137_v51 = vpop.permute.xlu0 %2136 }
 0x63a   : > { %2935 = vmatmul.msk.bf16.vlgmr.msrb.gmra.mxu1 %vm1426_vm2, %v2137_v51 }
 0x63b   : > { %v1954_v52 = vpop.f32.mrf.mxu3 }
 0x63c   : > { %v1959_v53 = vsel %vm1447_vm3, %v1954_v52, -inf }
 0x63d   : > { %1960 = vmax.xlane.f32.xlu0 %v1959_v53 }
 0x643   : > { %v1956_v54 = vpop.f32.mrf.mxu3 }
 0x644   : > { %v1962_v55 = vsel %vm1447_vm3, %v1956_v54, -inf }
 0x645   : > { %1963 = vmax.xlane.f32.xlu2 %v1962_v55 }
 0x695   : > { %v2088_v56 = vpop.f32.mrf.mxu3 }
 0x696   : > { %v2093_v5 = vsel %vm1447_vm3, %v2088_v56, -inf }
 0x69d   : > { %v2090_v59 = vpop.f32.mrf.mxu3 }
 0x69e   : > { %v2096_v61 = vsel %vm1447_vm3, %v2090_v59, -inf }
 0x69f   : > { %2097 = vmax.xlane.f32.xlu0 %v2096_v61 }
 0x6a7   : > { %v2020_v1 = vpop.f32.mrf.mxu1 }
 0x6a8   : > { %v2025_v2 = vsel %vm1447_vm3, %v2020_v1, -inf }
 0x6a9   : > { %2026 = vmax.xlane.f32.xlu2 %v2025_v2 }
 0x6af   : > { %v2022_v3 = vpop.f32.mrf.mxu1 }
 0x6b0   : > { %v2028_v4 = vsel %vm1447_vm3, %v2022_v3, -inf  ;;  %v1961_v8 = vpop.xlane.xlu0 %1960 }
 0x6b1   : > { %2029 = vmax.xlane.f32.xlu1 %v2028_v4  ;;  %2094 = vmax.xlane.f32.xlu2 %v2093_v5  ;;  %v1965_v9 = vsub.f32 %v1954_v52, %v1961_v8 }
 0x6b3   : > { %v1967_v11 = vmul.f32 1.442695, %v1965_v9 }
 0x6b5   : > { %3140 = vpow2.f32 %v1967_v11 }
 0x6b7   : > { %v2155_v10 = vpop.f32.mrf.mxu1 }
 0x6b8   : > { %v1964_v12 = vpop.xlane.xlu2 %1963  ;;  %v2160_v13 = vsel %vm1447_vm3, %v2155_v10, -inf }
 0x6b9   : > { %v1966_v14 = vsub.f32 %v1956_v54, %v1964_v12  ;;  %2161 = vmax.xlane.f32.xlu2 %v2160_v13 }
 0x6bb   : > { %v1969_v15 = vmul.f32 1.442695, %v1966_v14  ;;  %v3141_v18 = vpop.eup %3140 }
 0x6bc   : > { %v1971_v50 = vsel %vm1447_vm3, %v3141_v18, 0.0 }
 0x6bd   : > { %3142 = vpow2.f32 %v1969_v15 }
 0x6bf   : > { %v2157_v16 = vpop.f32.mrf.mxu1 }
 0x6c0   : > { %v2163_v17 = vsel %vm1447_vm3, %v2157_v16, -inf }
 0x6c1   : > { %2164 = vmax.xlane.f32.xlu0 %v2163_v17 }
 0x6c3   : > { %v3143_v19 = vpop.eup %3142 }
 0x6c4   : > { %v1977_v20 = vpack.c.bf16 %v3143_v19, %v3141_v18 }
 0x6c6   : > { %2930 = vmatmul.msk.bf16.vlgmr.msra.gmra.mxu0 %vm1447_vm3, %v1977_v20 }
 0x6ca   : > { %2045 = vrot.lane.b32.xlu1 %v1938_v0, %s3221_s12 }
 0x6d1   : > { %2179 = vrot.lane.b32.xlu2 %v1938_v0, %s3222_s16 }
 0x6d5   : > { %2112 = vrot.lane.b32.xlu0 %v1938_v0, %s3220_s25  ;;  %s3945_s25 = sld [smem:[#allocation13_spill]] }
 0x712   : > { %v2098_v21 = vpop.xlane.xlu0 %2097 }
 0x713   : > { %v2100_v24 = vsub.f32 %v2090_v59, %v2098_v21 }
 0x715   : > { %v2103_v28 = vmul.f32 1.442695, %v2100_v24 }
 0x71c   : > { %v2027_v22 = vpop.xlane.xlu2 %2026 }
 0x71d   : > { %v2031_v23 = vsub.f32 %v2020_v1, %v2027_v22 }
 0x71f   : > { %v2033_v25 = vmul.f32 1.442695, %v2031_v23 }
 0x721   : > { %3144 = vpow2.f32 %v2033_v25 }
 0x722   : > { %3146 = vpow2.f32 %v2103_v28 }
 0x724   : > { %v2030_v29 = vpop.xlane.xlu1 %2029  ;;  %v2095_v30 = vpop.xlane.xlu2 %2094 }
 0x725   : > { %v2032_v31 = vsub.f32 %v2022_v3, %v2030_v29  ;;  %v2099_v32 = vsub.f32 %v2088_v56, %v2095_v30  ;;  %v1974_v56 = vsel %vm1447_vm3, %v3143_v19, 0.0  ;;  %v3002_v29 = vld [vmem:[%s3945_s25 + $0x8] sm:$0xff]  ;;  %v3001_v30 = vld [vmem:[%s3945_s25] sm:$0xff] }
 0x726   : > { %2263 = vmatpush.bf16.msrb.mxu3 %v3002_v29  ;;  %v3096_v29 = vld [vmem:[%s3949_s30] ss:$0 sm:$0xff] }
 0x727   : > { %v3145_v33 = vpop.eup %3144  ;;  %v2035_v34 = vmul.f32 1.442695, %v2032_v31  ;;  %v2101_v35 = vmul.f32 1.442695, %v2099_v32 }
 0x728   : > { %v2037_v36 = vsel %vm1447_vm3, %v3145_v33, 0.0  ;;  %v3147_v38 = vpop.eup %3146 }
 0x729   : > { %3148 = vpow2.f32 %v2035_v34  ;;  %2038 = vadd.xlane.f32.xlu1 %v2037_v36  ;;  %v2108_v44 = vsel %vm1447_vm3, %v3147_v38, 0.0 }
 0x72a   : > { %3150 = vpow2.f32 %v2101_v35  ;;  %2264 = vmatpush.bf16.msrb.mxu3 %v3001_v30 }
 0x72c   : > { %v2162_v37 = vpop.xlane.xlu2 %2161 }
 0x72d   : > { %v2166_v39 = vsub.f32 %v2155_v10, %v2162_v37 }
 0x72f   : > { %v3149_v40 = vpop.eup %3148  ;;  %v2168_v41 = vmul.f32 1.442695, %v2166_v39 }
 0x730   : > { %v3151_v42 = vpop.eup %3150  ;;  %v2040_v43 = vsel %vm1447_vm3, %v3149_v40, 0.0  ;;  %v2043_v53 = vpack.c.bf16 %v3149_v40, %v3145_v33 }
 0x731   : > { %3152 = vpow2.f32 %v2168_v41  ;;  %2041 = vadd.xlane.f32.xlu0 %v2040_v43  ;;  %2109 = vadd.xlane.f32.xlu1 %v2108_v44  ;;  %v2105_v45 = vsel %vm1447_vm3, %v3151_v42, 0.0  ;;  %v2111_v58 = vpack.c.bf16 %v3147_v38, %v3151_v42 }
 0x732   : > { %2106 = vadd.xlane.f32.xlu2 %v2105_v45 }
 0x734   : > { %v2165_v6 = vpop.xlane.xlu0 %2164  ;;  %v2180_v52 = vpop.permute.xlu2 %2179 }
 0x735   : > { %v2167_v47 = vsub.f32 %v2157_v16, %v2165_v6 }
 0x737   : > { %v3153_v7 = vpop.eup %3152  ;;  %v2170_v48 = vmul.f32 1.442695, %v2167_v47 }
 0x738   : > { %v2172_v49 = vsel %vm1447_vm3, %v3153_v7, 0.0 }
 0x739   : > { %3154 = vpow2.f32 %v2170_v48  ;;  %2173 = vadd.xlane.f32.xlu1 %v2172_v49 }
 0x73a   : > { %1972 = vadd.xlane.f32.xlu2 %v1971_v50 }
 0x73c   : > { %v2046_v51 = vpop.permute.xlu1 %2045 }
 0x73d   : > { %2058 = vmatpush.bf16.msra.mxu2 %v2046_v51 }
 0x73f   : > { %v3155_v54 = vpop.eup %3154 }
 0x740   : > { %2932 = vmatmul.msk.bf16.vlgmr.msra.gmra.mxu2 %vm1447_vm3, %v2043_v53  ;;  %v2175_v55 = vsel %vm1447_vm3, %v3155_v54, 0.0  ;;  %v2178_v59 = vpack.c.bf16 %v3155_v54, %v3153_v7 }
 0x741   : > { %2192 = vmatpush.bf16.msrb.mxu2 %v2180_v52  ;;  %2176 = vadd.xlane.f32.xlu0 %v2175_v55 }
 0x742   : > { %1975 = vadd.xlane.f32.xlu1 %v1974_v56 }
 0x743   : > { %v1990_v60 = vpop.f32.mrf.mxu0 }
 0x747   : > { %v2113_v57 = vpop.permute.xlu0 %2112 }
 0x748   : > { %2125 = vmatpush.bf16.msrb.mxu0 %v2113_v57 }
 0x74b   : > { %2934 = vmatmul.msk.bf16.vlgmr.msrb.gmra.mxu0 %vm1447_vm3, %v2111_v58  ;;  %v1992_v62 = vpop.f32.mrf.mxu0 }
 0x750   : > { %2936 = vmatmul.msk.bf16.vlgmr.msrb.gmra.mxu2 %vm1447_vm3, %v2178_v59 }
 0x79c   : > { %v2039_v61 = vpop.xlane.xlu1 %2038 }
 0x79d   : > { %3156 = vrcp.f32 %v2039_v61 }
 0x7a3   : > { %v3157_v4 = vpop.eup %3156 }
 0x7a4   : > { %v2042_v63 = vpop.xlane.xlu0 %2041  ;;  %v2110_v1 = vpop.xlane.xlu1 %2109 }
 0x7a5   : > { %3158 = vrcp.f32 %v2042_v63  ;;  %v2107_v2 = vpop.xlane.xlu2 %2106 }
 0x7a6   : > { %3160 = vrcp.f32 %v2110_v1 }
 0x7a7   : > { %3162 = vrcp.f32 %v2107_v2 }
 0x7ab   : > { %v3159_v5 = vpop.eup %3158 }
 0x7ac   : > { %v3161_v12 = vpop.eup %3160  ;;  %v2174_v15 = vpop.xlane.xlu1 %2173 }
 0x7ad   : > { %v3163_v13 = vpop.eup %3162  ;;  %3164 = vrcp.f32 %v2174_v15  ;;  %v1973_v31 = vpop.xlane.xlu2 %1972 }
 0x7b3   : > { %v3165_v21 = vpop.eup %3164 }
 0x7b4   : > { %v2177_v18 = vpop.xlane.xlu0 %2176 }
 0x7b5   : > { %3166 = vrcp.f32 %v2177_v18  ;;  %v1976_v32 = vpop.xlane.xlu1 %1975 }
 0x7b6   : > { %3168 = vrcp.f32 %v1973_v31 }
 0x7b7   : > { %3170 = vrcp.f32 %v1976_v32 }
 0x7bb   : > { %v3167_v22 = vpop.eup %3166 }
 0x7bc   : > { %v3169_v34 = vpop.eup %3168 }
 0x7bd   : > { %v3171_v35 = vpop.eup %3170  ;;  %v1997_v38 = vmul.f32 %v3169_v34, %v1990_v60 }
 0x7be   : > { %v1998_v39 = vmul.f32 %v3171_v35, %v1992_v62 }
 0x7c3   : > { %v2060_v0 = vpop.f32.mrf.mxu2 }
 0x7c4   : > { %v2067_v9 = vmul.f32 %v3157_v4, %v2060_v0 }
 0x7c8   : > { %v2127_v3 = vpop.f32.mrf.mxu0 }
 0x7c9   : > { %v2134_v16 = vmul.f32 %v3163_v13, %v2127_v3 }
 0x7cb   : > { %v2062_v8 = vpop.f32.mrf.mxu2 }
 0x7cc   : > { %v2068_v10 = vmul.f32 %v3159_v5, %v2062_v8  ;;  %v3004_v8 = vld [vmem:[%s3514_s5 + $0x8] sm:$0xff] }
 0x7cd   : > { %2359 = vmatpush.bf16.msra.mxu0 %v3004_v8 }
 0x7ce   : > { %v3071_v11 = vpack.i.bf16 %v2068_v10, %v2067_v9 }
 0x7d0   : > { %3072 = vrot.lane.b32.xlu0 %v3071_v11, %s3223_s4  ;;  %v2129_v14 = vpop.f32.mrf.mxu0  ;;  %s3946_s4 = sld [smem:[#allocation30_spill]]  ;;  %v3003_v11 = vld [vmem:[%s3514_s5] sm:$0xff] }
 0x7d1   : > { %v2135_v17 = vmul.f32 %v3161_v12, %v2129_v14  ;;  %2360 = vmatpush.bf16.msra.mxu0 %v3003_v11 }
 0x7d3   : > { %v3076_v19 = vpack.i.bf16 %v2135_v17, %v2134_v16  ;;  %v2194_v20 = vpop.f32.mrf.mxu2 }
 0x7d4   : > { %v2201_v24 = vmul.f32 %v3165_v21, %v2194_v20 }
 0x7d5   : > { %3077 = vrot.lane.b32.xlu2 %v3076_v19, %s3224_s11 }
 0x7d6   : > { %s3947_s11 = scalar_lea.vmem %s3946_s4, %s3406_s0 }
 0x7d7   : > { %v3095_v52 = vld [vmem:[%s3947_s11] ss:$0 sm:$0xff] }
 0x7db   : > { %v2196_v23 = vpop.f32.mrf.mxu2 }
 0x7dc   : > { %v2202_v25 = vmul.f32 %v3167_v22, %v2196_v23 }
 0x7de   : > { %v3081_v28 = vpack.i.bf16 %v2202_v25, %v2201_v24 }
 0x7e0   : > { %3082 = vrot.lane.b32.xlu1 %v3081_v28, %s3225_s22 }
 0x82f   : > { %v3078_v40 = vpop.permute.xlu2 %3077 }
 0x830   : > { %v3080_v43 = vunpack.i.h.bf16 %v3078_v40  ;;  %v3079_v44 = vunpack.i.l.bf16 %v3078_v40  ;;  %v3008_v40 = vld [vmem:[%s3524_s19 + $0x18] sm:$0xff] }
 0x831   : > { %2414 = vmatpush.bf16.msra.mxu1 %v3008_v40 }
 0x842   : > { %v3073_v33 = vpop.permute.xlu0 %3072 }
 0x843   : > { %v3075_v36 = vunpack.i.h.bf16 %v3073_v33  ;;  %v3074_v37 = vunpack.i.l.bf16 %v3073_v33  ;;  %v3097_v33 = vld [vmem:[%s3951_s3] ss:$0 sm:$0xff] }
 0x845   : > { %v2227_v41 = vsel %vm1426_vm2, %v1997_v38, %v3074_v37  ;;  %v2228_v42 = vsel %vm1426_vm2, %v1998_v39, %v3075_v36 }
 0x846   : > { %v2229_v7 = vsel %vm1447_vm3, %v2227_v41, %v3079_v44  ;;  %v2230_v48 = vsel %vm1447_vm3, %v2228_v42, %v3080_v43  ;;  %v3007_v41 = vld [vmem:[%s3524_s19 + $0x10] sm:$0xff]  ;;  %v3006_v42 = vld [vmem:[%s3524_s19 + $0x8] sm:$0xff]  ;;  %v3005_v43 = vld [vmem:[%s3524_s19] sm:$0xff]  ;;  %vm2406_vm3 = vcmask 523264  }
 0x847   : > { %2415 = vmatpush.bf16.msra.mxu1 %v3007_v41 }
 0x84b   : > { %2416 = vmatpush.bf16.msra.mxu1 %v3006_v42 }
 0x84f   : > { %2417 = vmatpush.bf16.msra.mxu1 %v3005_v43 }
 0x852   : > { %v3083_v45 = vpop.permute.xlu1 %3082 }
 0x853   : > { %v3085_v6 = vunpack.i.h.bf16 %v3083_v45  ;;  %v3084_v47 = vunpack.i.l.bf16 %v3083_v45  ;;  %v3098_v45 = vld [vmem:[%s3953_s10] ss:$0 sm:$0xff] }
 0x855   : > { %v2231_v49 = vsel %vm1720_vm4, %v2229_v7, %v3084_v47  ;;  %v2232_v50 = vsel %vm1720_vm4, %v2230_v48, %v3085_v6 }
 0x856   : > { %v2233_v51 = vpack.c.bf16 %v2232_v50, %v2231_v49 }
 0x858   : > { %2945 = vmatmul.msk.bf16.vlgmr.msrb.gmra.mxu3 %vm1337_vm1, %v2233_v51  ;;  %v3099_v51 = vld [vmem:[%s1290_s24] ss:$0 sm:$0xff] }
 0x8db   : > { %v2266_v53 = vpop.f32.mrf.mxu3 }
 0x8dc   : > { %v2267_v54 = vadd.f32 %v3095_v52, %v2266_v53 }
 0x8de   : > { %v2271_v55 = vadd.f32 %v2267_v54, %v3667_v26 }
 0x8e0   : > { %v2275_v56 = vsel %vm1337_vm1, %v2271_v55, 0.0 }
 0x8e1   : > { %2276 = vadd.xlane.f32.xlu0 %v2275_v56 }
 0x8e3   : > { %v2268_v57 = vpop.f32.mrf.mxu3 }
 0x8e4   : > { %v2269_v58 = vadd.f32 %v3095_v52, %v2268_v57 }
 0x8e6   : > { %v2272_v59 = vadd.f32 %v2269_v58, %v3669_v27 }
 0x8e8   : > { %v2278_v60 = vsel %vm1337_vm1, %v2272_v59, 0.0 }
 0x8e9   : > { %2279 = vadd.xlane.f32.xlu2 %v2278_v60 }
 0x954   : > { %v2277_v61 = vpop.xlane.xlu0 %2276 }
 0x955   : > { %v2281_v62 = vmul.f32 %v2277_v61, %v3640_v46 }
 0x957   : > { %v2283_v63 = vsub.f32 %v2271_v55, %v2281_v62 }
 0x959   : > { %v2285_v0 = vmul.f32 %v2283_v63, %v2283_v63 }
 0x95b   : > { %v2287_v1 = vsel %vm1337_vm1, %v2285_v0, 0.0 }
 0x95c   : > { %v2280_v26 = vpop.xlane.xlu2 %2279  ;;  %2288 = vadd.xlane.f32.xlu1 %v2287_v1 }
 0x95d   : > { %v2282_v2 = vmul.f32 %v2280_v26, %v3640_v46 }
 0x95f   : > { %v2284_v3 = vsub.f32 %v2272_v59, %v2282_v2 }
 0x961   : > { %v2286_v4 = vmul.f32 %v2284_v3, %v2284_v3 }
 0x963   : > { %v2290_v27 = vsel %vm1337_vm1, %v2286_v4, 0.0 }
 0x964   : > { %2291 = vadd.xlane.f32.xlu0 %v2290_v27 }
 0x9cf   : > { %v2289_v5 = vpop.xlane.xlu1 %2288 }
 0x9d0   : > { %v2293_v9 = vmul.f32 %v2289_v5, %v3640_v46 }
 0x9d2   : > { %v2295_v10 = vadd.f32 1e-05, %v2293_v9 }
 0x9d4   : > { %3172 = vrsqrt.f32 %v2295_v10  ;;  %vm2303_vm13 = vweird.f32 %v2295_v10 }
 0x9d7   : > { %v2292_v12 = vpop.xlane.xlu0 %2291 }
 0x9d8   : > { %v2294_v13 = vmul.f32 %v2292_v12, %v3640_v46 }
 0x9da   : > { %v3173_v14 = vpop.eup %3172  ;;  %v2296_v15 = vadd.f32 1e-05, %v2294_v13 }
 0x9db   : > { %v2298_v16 = vmul.f32 %v3173_v14, %v2295_v10  ;;  %vm2304_vm12 = vweird.f32 %v3173_v14 }
 0x9dc   : > { %3174 = vrsqrt.f32 %v2296_v15  ;;  %vm2305_vm14 = vmor %vm2303_vm13, %vm2304_vm12  ;;  %vm2313_vm0 = vweird.f32 %v2296_v15 }
 0x9dd   : > { %v2299_v17 = vmul.f32 %v3173_v14, %v2298_v16 }
 0x9df   : > { %v2300_v18 = vmul.f32 0.5, %v2299_v17 }
 0x9e1   : > { %v2301_v19 = vsub.f32 1.5, %v2300_v18 }
 0x9e2   : > { %v3175_v20 = vpop.eup %3174 }
 0x9e3   : > { %v2302_v21 = vmul.f32 %v3173_v14, %v2301_v19  ;;  %v2308_v22 = vmul.f32 %v3175_v20, %v2296_v15  ;;  %vm2314_vm15 = vweird.f32 %v3175_v20 }
 0x9e4   : > { %vm2315_vm2 = vmor %vm2313_vm0, %vm2314_vm15 }
 0x9e5   : > { %v2309_v23 = vmul.f32 %v3175_v20, %v2308_v22  ;;  %v2306_v24 = vsel %vm2305_vm14, %v3173_v14, %v2302_v21  ;;  %v3101_v22 = vld [vmem:[%s1296_s20] ss:$0 sm:$0xff] }
 0x9e6   : > { %v2317_v30 = vmul.f32 %v2306_v24, %v2283_v63 }
 0x9e7   : > { %v2310_v25 = vmul.f32 0.5, %v2309_v23 }
 0x9e8   : > { %v2322_v34 = vmul.f32 %v3096_v29, %v2317_v30 }
 0x9e9   : > { %v2311_v28 = vsub.f32 1.5, %v2310_v25 }
 0x9ea   : > { %v2327_v37 = vadd.f32 %v3097_v33, %v2322_v34 }
 0x9eb   : > { %v2312_v31 = vmul.f32 %v3175_v20, %v2311_v28 }
 0x9ed   : > { %v2316_v32 = vsel %vm2315_vm2, %v3175_v20, %v2312_v31  ;;  %v3100_v20 = vld [vmem:[%s1293_s14] ss:$0 sm:$0xff] }
 0x9ee   : > { %v2318_v35 = vmul.f32 %v2316_v32, %v2284_v3 }
 0x9f0   : > { %v2323_v36 = vmul.f32 %v3096_v29, %v2318_v35 }
 0x9f2   : > { %v2328_v38 = vadd.f32 %v3097_v33, %v2323_v36 }
 0x9f4   : > { %v2329_v39 = vpack.c.bf16 %v2328_v38, %v2327_v37 }
 0x9f6   : > { %2954 = vmatmul.msk.bf16.vlgmr.msra.gmra.mxu0 %vm1337_vm1, %v2329_v39 }
 0xa73   : > { %v2362_v44 = vpop.f32.mrf.mxu0 }
 0xa74   : > { %v2363_v6 = vadd.f32 %v3098_v45, %v2362_v44 }
 0xa76   : > { %v2367_v48 = vmax.f32 %v2363_v6, 0.0 }
 0xa7b   : > { %v2364_v47 = vpop.f32.mrf.mxu0 }
 0xa7c   : > { %v2365_v7 = vadd.f32 %v3098_v45, %v2364_v47 }
 0xa7e   : > { %v2368_v49 = vmax.f32 %v2365_v7, 0.0 }
 0xa80   : > { %v2369_v50 = vpack.c.bf16 %v2368_v49, %v2367_v48 }
 0xa82   : > { %2971 = vmatmul.msk.bf16.vlgmr.msra.gmra.mxu1 %vm2406_vm3, %v2369_v50 }
 0xaff   : > { %v2419_v52 = vpop.f32.mrf.mxu1 }
 0xb00   : > { %v2420_v53 = vadd.f32 %v3099_v51, %v2419_v52 }
 0xb02   : > { %v2424_v54 = vadd.f32 %v2420_v53, %v2327_v37 }
 0xb04   : > { %v2428_v55 = vsel %vm1337_vm1, %v2424_v54, 0.0 }
 0xb05   : > { %2429 = vadd.xlane.f32.xlu2 %v2428_v55 }
 0xb07   : > { %v2421_v56 = vpop.f32.mrf.mxu1 }
 0xb08   : > { %v2422_v57 = vadd.f32 %v3099_v51, %v2421_v56 }
 0xb0a   : > { %v2425_v58 = vadd.f32 %v2422_v57, %v2328_v38 }
 0xb0c   : > { %v2431_v59 = vsel %vm1337_vm1, %v2425_v58, 0.0 }
 0xb0d   : > { %2432 = vadd.xlane.f32.xlu0 %v2431_v59 }
 0xb78   : > { %v2430_v60 = vpop.xlane.xlu2 %2429 }
 0xb79   : > { %v2434_v61 = vmul.f32 %v2430_v60, %v3640_v46 }
 0xb7b   : > { %v2436_v62 = vsub.f32 %v2424_v54, %v2434_v61 }
 0xb7d   : > { %v2438_v63 = vmul.f32 %v2436_v62, %v2436_v62 }
 0xb7f   : > { %v2440_v0 = vsel %vm1337_vm1, %v2438_v63, 0.0 }
 0xb80   : > { %v2433_v1 = vpop.xlane.xlu0 %2432  ;;  %2441 = vadd.xlane.f32.xlu1 %v2440_v0 }
 0xb81   : > { %v2435_v26 = vmul.f32 %v2433_v1, %v3640_v46 }
 0xb83   : > { %v2437_v2 = vsub.f32 %v2425_v58, %v2435_v26 }
 0xb85   : > { %v2439_v3 = vmul.f32 %v2437_v2, %v2437_v2 }
 0xb87   : > { %v2443_v4 = vsel %vm1337_vm1, %v2439_v3, 0.0 }
 0xb88   : > { %2444 = vadd.xlane.f32.xlu2 %v2443_v4 }
 0xbf3   : > { %v2442_v27 = vpop.xlane.xlu1 %2441 }
 0xbf4   : > { %v2446_v5 = vmul.f32 %v2442_v27, %v3640_v46 }
 0xbf6   : > { %v2448_v8 = vadd.f32 1e-05, %v2446_v5 }
 0xbf8   : > { %3176 = vrsqrt.f32 %v2448_v8  ;;  %vm2456_vm5 = vweird.f32 %v2448_v8 }
 0xbfb   : > { %v2445_v9 = vpop.xlane.xlu2 %2444 }
 0xbfc   : > { %v2447_v10 = vmul.f32 %v2445_v9, %v3640_v46 }
 0xbfe   : > { %v3177_v11 = vpop.eup %3176  ;;  %v2449_v12 = vadd.f32 1e-05, %v2447_v10 }
 0xbff   : > { %v2451_v13 = vmul.f32 %v3177_v11, %v2448_v8  ;;  %vm2457_vm4 = vweird.f32 %v3177_v11 }
 0xc00   : > { %3178 = vrsqrt.f32 %v2449_v12  ;;  %vm2458_vm6 = vmor %vm2456_vm5, %vm2457_vm4  ;;  %vm2466_vm8 = vweird.f32 %v2449_v12 }
 0xc01   : > { %v2452_v14 = vmul.f32 %v3177_v11, %v2451_v13 }
 0xc03   : > { %v2453_v15 = vmul.f32 0.5, %v2452_v14 }
 0xc05   : > { %v2454_v16 = vsub.f32 1.5, %v2453_v15 }
 0xc06   : > { %v3179_v17 = vpop.eup %3178 }
 0xc07   : > { %v2455_v18 = vmul.f32 %v3177_v11, %v2454_v16  ;;  %v2461_v19 = vmul.f32 %v3179_v17, %v2449_v12  ;;  %vm2467_vm7 = vweird.f32 %v3179_v17 }
 0xc08   : > { %vm2468_vm9 = vmor %vm2466_vm8, %vm2467_vm7 }
 0xc09   : > { %v2459_v46 = vsel %vm2458_vm6, %v3177_v11, %v2455_v18  ;;  %v2462_v21 = vmul.f32 %v3179_v17, %v2461_v19 }
 0xc0a   : > { %v2470_v23 = vmul.f32 %v2459_v46, %v2436_v62 }
 0xc0b   : > { %v2463_v24 = vmul.f32 0.5, %v2462_v21 }
 0xc0c   : > { %v2475_v25 = vmul.f32 %v3100_v20, %v2470_v23 }
 0xc0d   : > { %v2464_v28 = vsub.f32 1.5, %v2463_v24 }
 0xc0e   : > { %v2480_v29 = vadd.f32 %v3101_v22, %v2475_v25 }
 0xc0f   : > { %v2465_v30 = vmul.f32 %v3179_v17, %v2464_v28 }
 0xc10   : > { %2482 = vst.msk [vmem:[%s3542_s18] sm:$0xff] %vm1337_vm1, %v2480_v29 }
 0xc11   : > { %v2469_v31 = vsel %vm2468_vm9, %v3179_v17, %v2465_v30 }
 0xc12   : > { %v2471_v32 = vmul.f32 %v2469_v31, %v2437_v2 }
 0xc14   : > { %v2476_v33 = vmul.f32 %v3100_v20, %v2471_v32 }
 0xc16   : > { %v2481_v34 = vadd.f32 %v3101_v22, %v2476_v33 }
 0xc18   : > { %2483 = vst.msk [vmem:[%s3542_s18 + $0x8] sm:$0xff] %vm1337_vm1, %v2481_v34 }
 0xc19 PF: > { %s3957_s0 = sld [smem:[#allocation5_spill]] }
 0xc1a   : > { %s3958_s8 = sld [smem:[#allocation3_spill]] }
 0xc1b   : > { %s3959_s5 = sld [smem:[#allocation4_spill]] }
 0xc1c   : > { %s3960_s9 = sld [smem:[#allocation6_spill]] }
 0xc1d   : > { %s3961_s30 = sld [smem:[#allocation7_spill]] }
 0xc1f   : > { %s38_s3 = sadd.s32 1, %s3957_s0  }
 0xc20   : > { %p35_p8 = scmp.ge.s32.totalorder %s38_s3, 6  }
 0xc22   :  { %37 = sbr.rel (!%p35_p8) target bundleno = 27 (0x1b), region = 247 }

</bundles_post_ra>
